<compile_context>
chip_gen: v7x
topology: tpu7x:2x2x1
jax: 0.10.0
libtpu: 0.0.40
codegen_flags: <defaults>
</compile_context>

<pallas_src>
import functools

import jax
import jax.numpy as jnp
from jax.experimental import pallas as pl
from jax.experimental.pallas import tpu as pltpu

INPUT_SIZE = 640
MID_SIZE = 128
BOTTLENECK = 8
BN_EPS = 1e-5

# (in, out) for every layer; layers 0..8 are FCBNReLU, layer 9 is plain Linear.
LAYER_DIMS = [
    (INPUT_SIZE, MID_SIZE), (MID_SIZE, MID_SIZE), (MID_SIZE, MID_SIZE),
    (MID_SIZE, MID_SIZE), (MID_SIZE, BOTTLENECK),
    (BOTTLENECK, MID_SIZE), (MID_SIZE, MID_SIZE), (MID_SIZE, MID_SIZE),
    (MID_SIZE, MID_SIZE), (MID_SIZE, INPUT_SIZE),
]
NUM_LAYERS = len(LAYER_DIMS)
NUM_MID = 8  # layers 1..8 are 128x128 after bottleneck padding


def _round_up(a, m):
    return ((a + m - 1) // m) * m


def _default_bf16_epilogue():
    """bf16 VALU epilogue on v6e/v7x; f32 epilogue on older chips (no bf16 VPU)."""
    try:
        kind = jax.devices()[0].device_kind.lower()
        return not any(g in kind for g in ("v2", "v3", "v4", "v5"))
    except Exception:  # pragma: no cover - conservative fallback
        return False


def fc_ae_kernel(x_ref, wf_ref, wm_ref, wl_ref, bm_ref, bl_ref, o_ref, *, bf16_epilogue):
    """Fused 10-layer MLP for one (batch_tile, 640) block.

    x_ref  : (TB, 640)        f32 (or bf16)  input tile; cast to bf16 for the MXU here
    wf_ref : (640, 128)       bf16   layer 0 weight (BN folded)
    wm_ref : (8, 128, 128)    bf16   layers 1..8 weights (BN folded, bottleneck padded)
    wl_ref : (128, 640)       bf16   layer 9 weight (plain Linear)
    bm_ref : (9, 128)         f32    biases of layers 0..8 (BN folded, padded)
    bl_ref : (1, 640)         f32    bias of layer 9
    o_ref  : (TB, 640)        bf16 (default) or f32
    """
    x = x_ref[...].astype(jnp.bfloat16)

    def epilogue(h32, b_row):  # bias-add + ReLU, returns bf16 for the next MXU op
        if bf16_epilogue:
            return jnp.maximum(h32.astype(jnp.bfloat16) + b_row.astype(jnp.bfloat16), 0.0)
        return jnp.maximum(h32 + b_row, 0.0).astype(jnp.bfloat16)

    # Layer 0: 640 -> 128.
    h32 = jnp.dot(x, wf_ref[...], preferred_element_type=jnp.float32)
    h = epilogue(h32, bm_ref[pl.ds(0, 1), :])

    # Layers 1..8: 128 -> 128 (layer 4/5 bottleneck is zero-padded to 128 lanes).
    for i in range(NUM_MID):
        h32 = jnp.dot(h, wm_ref[i], preferred_element_type=jnp.float32)
        h = epilogue(h32, bm_ref[pl.ds(i + 1, 1), :])

    # Layer 9: plain Linear 128 -> 640, no ReLU; bias-add in f32, cast once to output dtype.
    out = jnp.dot(h, wl_ref[...], preferred_element_type=jnp.float32)
    o_ref[...] = (out + bl_ref[...]).astype(o_ref.dtype)


def fc_ae_forward(x, params, *, batch_tile=512, out_dtype=jnp.bfloat16, bf16_epilogue=None):
    """x: (N, INPUT_SIZE) float (f32 or bf16). Returns (N, INPUT_SIZE) `out_dtype`."""
    w_first, w_mid, w_last, b_mid, b_last = params
    n = x.shape[0]
    assert n > 0 and x.shape[1] == INPUT_SIZE
    assert jnp.issubdtype(x.dtype, jnp.floating)
    if bf16_epilogue is None:
        bf16_epilogue = _default_bf16_epilogue()

    # Tile selection: big tiles amortize the ~0.35us per-grid-step overhead, but cap the
    # tile so the grid always has >= 2 steps (v7x megacore: both TCs get work). Tiles are
    # multiples of 8 (sublane); the ragged last tile is handled by Pallas OOB masking.
    tile = min(int(batch_tile), max(8, _round_up(pl.cdiv(n, 2), 8)))
    tile = max(8, _round_up(tile, 8))
    grid = pl.cdiv(n, tile)

    kernel = functools.partial(fc_ae_kernel, bf16_epilogue=bool(bf16_epilogue))

    in_specs = [
        pl.BlockSpec((tile, INPUT_SIZE), lambda i: (i, 0)),   # x tile (streamed)
        pl.BlockSpec(w_first.shape, lambda i: (0, 0)),        # resident params below
        pl.BlockSpec(w_mid.shape, lambda i: (0, 0, 0)),
        pl.BlockSpec(w_last.shape, lambda i: (0, 0)),
        pl.BlockSpec(b_mid.shape, lambda i: (0, 0)),
        pl.BlockSpec(b_last.shape, lambda i: (0, 0)),
    ]
    out_spec = pl.BlockSpec((tile, INPUT_SIZE), lambda i: (i, 0))

    # Advisory cost estimate for XLA's scheduler.
    flops = 2 * n * (INPUT_SIZE * MID_SIZE            # layer 0
                     + NUM_MID * MID_SIZE * MID_SIZE  # layers 1..8
                     + MID_SIZE * INPUT_SIZE)         # layer 9
    param_bytes = sum(int(p.size) * p.dtype.itemsize for p in params)
    bytes_accessed = (n * INPUT_SIZE * (x.dtype.itemsize + jnp.dtype(out_dtype).itemsize)
                      + param_bytes)

    out = pl.pallas_call(
        kernel,
        out_shape=jax.ShapeDtypeStruct((n, INPUT_SIZE), out_dtype),
        grid_spec=pltpu.PrefetchScalarGridSpec(
            num_scalar_prefetch=0,
            grid=(grid,),
            in_specs=in_specs,
            out_specs=out_spec,
        ),
        compiler_params=pltpu.CompilerParams(
            dimension_semantics=("parallel",),   # batch axis shards across TCs (v7x megacore)
            vmem_limit_bytes=32 << 20,           # v7x-safe; actual footprint is a few MiB
        ),
        cost_estimate=pl.CostEstimate(
            flops=flops, transcendentals=0, bytes_accessed=bytes_accessed),
    )(x, w_first, w_mid, w_last, b_mid, b_last)

    return out


def init_params(key):
    """Deterministic synthetic parameters mirroring the PyTorch module's shapes."""
    raw = []  # (W(in,out), b(out), gamma, beta, r_mean, r_var or None)
    for li, (din, dout) in enumerate(LAYER_DIMS):
        key, kw, kb, kg, kbe, km, kv = jax.random.split(key, 7)
        bound = 1.0 / jnp.sqrt(din)
        w = jax.random.uniform(kw, (din, dout), jnp.float32, -bound, bound)
        b = jax.random.uniform(kb, (dout,), jnp.float32, -bound, bound)
        if li < NUM_LAYERS - 1:  # FCBNReLU layers carry BatchNorm1d params
            gamma = 1.0 + 0.1 * jax.random.normal(kg, (dout,), jnp.float32)
            beta = 0.1 * jax.random.normal(kbe, (dout,), jnp.float32)
            r_mean = 0.05 * jax.random.normal(km, (dout,), jnp.float32)
            r_var = jax.random.uniform(kv, (dout,), jnp.float32, 0.5, 1.5)
            raw.append((w, b, gamma, beta, r_mean, r_var))
        else:
            raw.append((w, b, None, None, None, None))
    return raw


def fold_bn(raw):
    """Fold eval-mode BatchNorm1d into effective (W, b) per layer (exact algebra)."""
    weights, biases = [], []
    for (w, b, gamma, beta, r_mean, r_var) in raw:
        if gamma is None:
            w_eff, b_eff = w, b
        else:
            scale = gamma / jnp.sqrt(r_var + BN_EPS)           # per output feature
            w_eff = w * scale[None, :]
            b_eff = (b - r_mean) * scale + beta
        weights.append(w_eff)
        biases.append(b_eff.reshape(1, -1))
    return weights, biases


def pack_params(weights, biases):
    """Zero-pad the 8-wide bottleneck to 128 lanes and pack params into 5 arrays.

    Padding is exact: padded output columns of layer 4 have zero weight and zero
    bias so ReLU gives exactly 0, and the padded input rows of layer 5 are zero.
    """
    weights = list(weights)
    biases = list(biases)
    pad = MID_SIZE - BOTTLENECK
    weights[4] = jnp.pad(weights[4], ((0, 0), (0, pad)))   # (128, 8)  -> (128, 128)
    biases[4] = jnp.pad(biases[4], ((0, 0), (0, pad)))     # (1, 8)    -> (1, 128)
    weights[5] = jnp.pad(weights[5], ((0, pad), (0, 0)))   # (8, 128)  -> (128, 128)

    w_first = weights[0].astype(jnp.bfloat16)                              # (640, 128)
    w_mid = jnp.stack(weights[1:1 + NUM_MID]).astype(jnp.bfloat16)         # (8, 128, 128)
    w_last = weights[NUM_LAYERS - 1].astype(jnp.bfloat16)                  # (128, 640)
    b_mid = jnp.concatenate(biases[:NUM_LAYERS - 1], axis=0)               # (9, 128) f32
    b_last = biases[NUM_LAYERS - 1]                                        # (1, 640) f32
    return w_first, w_mid, w_last, b_mid, b_last


def reference_forward(x, raw):
    """Pure-JAX f32 reference using the *unfolded* Linear->BN->ReLU formulation."""
    h = x
    for (w, b, gamma, beta, r_mean, r_var) in raw:
        h = h @ w + b
        if gamma is not None:
            h = (h - r_mean) / jnp.sqrt(r_var + BN_EPS) * gamma + beta
            h = jnp.maximum(h, 0.0)
    return h


def reference_forward_folded(x, params, *, bf16_epilogue, out_dtype=jnp.bfloat16):
    """Pure-JAX reference that mirrors the kernel's mixed-precision arithmetic."""
    w_first, w_mid, w_last, b_mid, b_last = params

    def epilogue(h32, b_row):
        if bf16_epilogue:
            return jnp.maximum(h32.astype(jnp.bfloat16) + b_row.astype(jnp.bfloat16), 0.0)
        return jnp.maximum(h32 + b_row, 0.0).astype(jnp.bfloat16)

    h = x.astype(jnp.bfloat16)
    h32 = jnp.dot(h, w_first, preferred_element_type=jnp.float32)
    h = epilogue(h32, b_mid[0:1, :])
    for i in range(NUM_MID):
        h32 = jnp.dot(h, w_mid[i], preferred_element_type=jnp.float32)
        h = epilogue(h32, b_mid[i + 1:i + 2, :])
    out = jnp.dot(h, w_last, preferred_element_type=jnp.float32) + b_last
    return out.astype(out_dtype)


if __name__ == "__main__":
    key = jax.random.PRNGKey(0)
    key, kx = jax.random.split(key)

    # Deliberately not a multiple of the tile: exercises grid=2 (megacore) + ragged tail.
    batch = 200
    x = jax.random.normal(kx, (batch, INPUT_SIZE), jnp.float32)

    raw_params = init_params(key)
    weights, biases = fold_bn(raw_params)
    params = pack_params(weights, biases)

    bf16_epi = _default_bf16_epilogue()
    out = fc_ae_forward(x, params, batch_tile=512, out_dtype=jnp.bfloat16,
                        bf16_epilogue=bf16_epi)
    out = jax.block_until_ready(out)
    assert out.shape == (batch, INPUT_SIZE)
    out32 = out.astype(jnp.float32)

    # Tight check vs. a pure-JAX reference using the identical mixed-precision arithmetic.
    ref_bits = reference_forward_folded(x, params, bf16_epilogue=bf16_epi).astype(jnp.float32)
    assert jnp.allclose(out32, ref_bits, atol=3e-2, rtol=3e-2), "kernel/bf16-reference mismatch"

    # Semantic sanity check vs. the exact f32 unfolded Linear->BN->ReLU chain
    # (looser tolerance only because weights/activations/output are bf16).
    ref_exact = reference_forward(x, raw_params)
    assert jnp.allclose(out32, ref_exact, atol=2e-1, rtol=2e-1), "kernel/exact-reference mismatch"

    print("KERNEL_OK")
</pallas_src>

<mosaic_0001>
module attributes {stable_mosaic.version = 11 : i64} {
  func.func @fc_ae_kernel(%arg0: i32, %arg1: memref<104x640xf32, #tpu.memory_space<vmem>>, %arg2: memref<640x128xbf16, #tpu.memory_space<vmem>>, %arg3: memref<8x128x128xbf16, #tpu.memory_space<vmem>>, %arg4: memref<128x640xbf16, #tpu.memory_space<vmem>>, %arg5: memref<9x128xf32, #tpu.memory_space<vmem>>, %arg6: memref<1x640xf32, #tpu.memory_space<vmem>>, %arg7: memref<104x640xbf16, #tpu.memory_space<vmem>>) attributes {dimension_semantics = [#tpu.dimension_semantics<parallel>], iteration_bounds = array<i64: 2>, scalar_prefetch = 0 : i64, scratch_operands = 0 : i64, tpu.core_type = #tpu.core_type<tc>, window_params = [{transform_indices = @transform_0, window_bounds = array<i64: 104, 640>}, {pipeline_mode = #tpu.pipeline_mode<synchronous>, transform_indices = @transform_1, window_bounds = array<i64: 640, 128>}, {pipeline_mode = #tpu.pipeline_mode<synchronous>, transform_indices = @transform_2, window_bounds = array<i64: 8, 128, 128>}, {pipeline_mode = #tpu.pipeline_mode<synchronous>, transform_indices = @transform_3, window_bounds = array<i64: 128, 640>}, {pipeline_mode = #tpu.pipeline_mode<synchronous>, transform_indices = @transform_4, window_bounds = array<i64: 9, 128>}, {pipeline_mode = #tpu.pipeline_mode<synchronous>, transform_indices = @transform_5, window_bounds = array<i64: 1, 640>}, {transform_indices = @transform_6, window_bounds = array<i64: 104, 640>}]} {
    %c0 = arith.constant 0 : index
    %c0_0 = arith.constant 0 : index
    %0 = vector.load %arg1[%c0, %c0_0] : memref<104x640xf32, #tpu.memory_space<vmem>>, vector<104x640xf32>
    %1 = arith.truncf %0 : vector<104x640xf32> to vector<104x640xbf16>
    %c0_1 = arith.constant 0 : index
    %c0_2 = arith.constant 0 : index
    %2 = vector.load %arg2[%c0_1, %c0_2] : memref<640x128xbf16, #tpu.memory_space<vmem>>, vector<640x128xbf16>
    %cst = arith.constant dense<0.000000e+00> : vector<104x128xf32>
    %3 = tpu.matmul %1, %2, %cst {dimension_numbers = #tpu.dot_dimension_numbers<[1], [0], [0], [1], [0, 0, 1, 1], [], []>} : vector<104x640xbf16>, vector<640x128xbf16>, vector<104x128xf32> -> vector<104x128xf32>
    %c0_3 = arith.constant 0 : index
    %c0_4 = arith.constant 0 : index
    %4 = vector.load %arg5[%c0_3, %c0_4] : memref<9x128xf32, #tpu.memory_space<vmem>>, vector<1x128xf32>
    %5 = arith.truncf %3 : vector<104x128xf32> to vector<104x128xbf16>
    %6 = arith.truncf %4 : vector<1x128xf32> to vector<1x128xbf16>
    %7 = vector.broadcast %6 : vector<1x128xbf16> to vector<104x128xbf16>
    %8 = arith.addf %5, %7 : vector<104x128xbf16>
    %cst_5 = arith.constant 0.000000e+00 : bf16
    %9 = vector.broadcast %cst_5 : bf16 to vector<104x128xbf16>
    %10 = arith.maximumf %8, %9 : vector<104x128xbf16>
    %c0_6 = arith.constant 0 : index
    %c0_7 = arith.constant 0 : index
    %c0_8 = arith.constant 0 : index
    %11 = vector.load %arg3[%c0_6, %c0_7, %c0_8] : memref<8x128x128xbf16, #tpu.memory_space<vmem>>, vector<1x128x128xbf16>
    %12 = vector.shape_cast %11 : vector<1x128x128xbf16> to vector<128x128xbf16>
    %cst_9 = arith.constant dense<0.000000e+00> : vector<104x128xf32>
    %13 = tpu.matmul %10, %12, %cst_9 {dimension_numbers = #tpu.dot_dimension_numbers<[1], [0], [0], [1], [0, 0, 1, 1], [], []>} : vector<104x128xbf16>, vector<128x128xbf16>, vector<104x128xf32> -> vector<104x128xf32>
    %c1 = arith.constant 1 : index
    %c0_10 = arith.constant 0 : index
    %14 = vector.load %arg5[%c1, %c0_10] : memref<9x128xf32, #tpu.memory_space<vmem>>, vector<1x128xf32>
    %15 = arith.truncf %13 : vector<104x128xf32> to vector<104x128xbf16>
    %16 = arith.truncf %14 : vector<1x128xf32> to vector<1x128xbf16>
    %17 = vector.broadcast %16 : vector<1x128xbf16> to vector<104x128xbf16>
    %18 = arith.addf %15, %17 : vector<104x128xbf16>
    %cst_11 = arith.constant 0.000000e+00 : bf16
    %19 = vector.broadcast %cst_11 : bf16 to vector<104x128xbf16>
    %20 = arith.maximumf %18, %19 : vector<104x128xbf16>
    %c1_12 = arith.constant 1 : index
    %c0_13 = arith.constant 0 : index
    %c0_14 = arith.constant 0 : index
    %21 = vector.load %arg3[%c1_12, %c0_13, %c0_14] : memref<8x128x128xbf16, #tpu.memory_space<vmem>>, vector<1x128x128xbf16>
    %22 = vector.shape_cast %21 : vector<1x128x128xbf16> to vector<128x128xbf16>
    %cst_15 = arith.constant dense<0.000000e+00> : vector<104x128xf32>
    %23 = tpu.matmul %20, %22, %cst_15 {dimension_numbers = #tpu.dot_dimension_numbers<[1], [0], [0], [1], [0, 0, 1, 1], [], []>} : vector<104x128xbf16>, vector<128x128xbf16>, vector<104x128xf32> -> vector<104x128xf32>
    %c2 = arith.constant 2 : index
    %c0_16 = arith.constant 0 : index
    %24 = vector.load %arg5[%c2, %c0_16] : memref<9x128xf32, #tpu.memory_space<vmem>>, vector<1x128xf32>
    %25 = arith.truncf %23 : vector<104x128xf32> to vector<104x128xbf16>
    %26 = arith.truncf %24 : vector<1x128xf32> to vector<1x128xbf16>
    %27 = vector.broadcast %26 : vector<1x128xbf16> to vector<104x128xbf16>
    %28 = arith.addf %25, %27 : vector<104x128xbf16>
    %cst_17 = arith.constant 0.000000e+00 : bf16
    %29 = vector.broadcast %cst_17 : bf16 to vector<104x128xbf16>
    %30 = arith.maximumf %28, %29 : vector<104x128xbf16>
    %c2_18 = arith.constant 2 : index
    %c0_19 = arith.constant 0 : index
    %c0_20 = arith.constant 0 : index
    %31 = vector.load %arg3[%c2_18, %c0_19, %c0_20] : memref<8x128x128xbf16, #tpu.memory_space<vmem>>, vector<1x128x128xbf16>
    %32 = vector.shape_cast %31 : vector<1x128x128xbf16> to vector<128x128xbf16>
    %cst_21 = arith.constant dense<0.000000e+00> : vector<104x128xf32>
    %33 = tpu.matmul %30, %32, %cst_21 {dimension_numbers = #tpu.dot_dimension_numbers<[1], [0], [0], [1], [0, 0, 1, 1], [], []>} : vector<104x128xbf16>, vector<128x128xbf16>, vector<104x128xf32> -> vector<104x128xf32>
    %c3 = arith.constant 3 : index
    %c0_22 = arith.constant 0 : index
    %34 = vector.load %arg5[%c3, %c0_22] : memref<9x128xf32, #tpu.memory_space<vmem>>, vector<1x128xf32>
    %35 = arith.truncf %33 : vector<104x128xf32> to vector<104x128xbf16>
    %36 = arith.truncf %34 : vector<1x128xf32> to vector<1x128xbf16>
    %37 = vector.broadcast %36 : vector<1x128xbf16> to vector<104x128xbf16>
    %38 = arith.addf %35, %37 : vector<104x128xbf16>
    %cst_23 = arith.constant 0.000000e+00 : bf16
    %39 = vector.broadcast %cst_23 : bf16 to vector<104x128xbf16>
    %40 = arith.maximumf %38, %39 : vector<104x128xbf16>
    %c3_24 = arith.constant 3 : index
    %c0_25 = arith.constant 0 : index
    %c0_26 = arith.constant 0 : index
    %41 = vector.load %arg3[%c3_24, %c0_25, %c0_26] : memref<8x128x128xbf16, #tpu.memory_space<vmem>>, vector<1x128x128xbf16>
    %42 = vector.shape_cast %41 : vector<1x128x128xbf16> to vector<128x128xbf16>
    %cst_27 = arith.constant dense<0.000000e+00> : vector<104x128xf32>
    %43 = tpu.matmul %40, %42, %cst_27 {dimension_numbers = #tpu.dot_dimension_numbers<[1], [0], [0], [1], [0, 0, 1, 1], [], []>} : vector<104x128xbf16>, vector<128x128xbf16>, vector<104x128xf32> -> vector<104x128xf32>
    %c4 = arith.constant 4 : index
    %c0_28 = arith.constant 0 : index
    %44 = vector.load %arg5[%c4, %c0_28] : memref<9x128xf32, #tpu.memory_space<vmem>>, vector<1x128xf32>
    %45 = arith.truncf %43 : vector<104x128xf32> to vector<104x128xbf16>
    %46 = arith.truncf %44 : vector<1x128xf32> to vector<1x128xbf16>
    %47 = vector.broadcast %46 : vector<1x128xbf16> to vector<104x128xbf16>
    %48 = arith.addf %45, %47 : vector<104x128xbf16>
    %cst_29 = arith.constant 0.000000e+00 : bf16
    %49 = vector.broadcast %cst_29 : bf16 to vector<104x128xbf16>
    %50 = arith.maximumf %48, %49 : vector<104x128xbf16>
    %c4_30 = arith.constant 4 : index
    %c0_31 = arith.constant 0 : index
    %c0_32 = arith.constant 0 : index
    %51 = vector.load %arg3[%c4_30, %c0_31, %c0_32] : memref<8x128x128xbf16, #tpu.memory_space<vmem>>, vector<1x128x128xbf16>
    %52 = vector.shape_cast %51 : vector<1x128x128xbf16> to vector<128x128xbf16>
    %cst_33 = arith.constant dense<0.000000e+00> : vector<104x128xf32>
    %53 = tpu.matmul %50, %52, %cst_33 {dimension_numbers = #tpu.dot_dimension_numbers<[1], [0], [0], [1], [0, 0, 1, 1], [], []>} : vector<104x128xbf16>, vector<128x128xbf16>, vector<104x128xf32> -> vector<104x128xf32>
    %c5 = arith.constant 5 : index
    %c0_34 = arith.constant 0 : index
    %54 = vector.load %arg5[%c5, %c0_34] : memref<9x128xf32, #tpu.memory_space<vmem>>, vector<1x128xf32>
    %55 = arith.truncf %53 : vector<104x128xf32> to vector<104x128xbf16>
    %56 = arith.truncf %54 : vector<1x128xf32> to vector<1x128xbf16>
    %57 = vector.broadcast %56 : vector<1x128xbf16> to vector<104x128xbf16>
    %58 = arith.addf %55, %57 : vector<104x128xbf16>
    %cst_35 = arith.constant 0.000000e+00 : bf16
    %59 = vector.broadcast %cst_35 : bf16 to vector<104x128xbf16>
    %60 = arith.maximumf %58, %59 : vector<104x128xbf16>
    %c5_36 = arith.constant 5 : index
    %c0_37 = arith.constant 0 : index
    %c0_38 = arith.constant 0 : index
    %61 = vector.load %arg3[%c5_36, %c0_37, %c0_38] : memref<8x128x128xbf16, #tpu.memory_space<vmem>>, vector<1x128x128xbf16>
    %62 = vector.shape_cast %61 : vector<1x128x128xbf16> to vector<128x128xbf16>
    %cst_39 = arith.constant dense<0.000000e+00> : vector<104x128xf32>
    %63 = tpu.matmul %60, %62, %cst_39 {dimension_numbers = #tpu.dot_dimension_numbers<[1], [0], [0], [1], [0, 0, 1, 1], [], []>} : vector<104x128xbf16>, vector<128x128xbf16>, vector<104x128xf32> -> vector<104x128xf32>
    %c6 = arith.constant 6 : index
    %c0_40 = arith.constant 0 : index
    %64 = vector.load %arg5[%c6, %c0_40] : memref<9x128xf32, #tpu.memory_space<vmem>>, vector<1x128xf32>
    %65 = arith.truncf %63 : vector<104x128xf32> to vector<104x128xbf16>
    %66 = arith.truncf %64 : vector<1x128xf32> to vector<1x128xbf16>
    %67 = vector.broadcast %66 : vector<1x128xbf16> to vector<104x128xbf16>
    %68 = arith.addf %65, %67 : vector<104x128xbf16>
    %cst_41 = arith.constant 0.000000e+00 : bf16
    %69 = vector.broadcast %cst_41 : bf16 to vector<104x128xbf16>
    %70 = arith.maximumf %68, %69 : vector<104x128xbf16>
    %c6_42 = arith.constant 6 : index
    %c0_43 = arith.constant 0 : index
    %c0_44 = arith.constant 0 : index
    %71 = vector.load %arg3[%c6_42, %c0_43, %c0_44] : memref<8x128x128xbf16, #tpu.memory_space<vmem>>, vector<1x128x128xbf16>
    %72 = vector.shape_cast %71 : vector<1x128x128xbf16> to vector<128x128xbf16>
    %cst_45 = arith.constant dense<0.000000e+00> : vector<104x128xf32>
    %73 = tpu.matmul %70, %72, %cst_45 {dimension_numbers = #tpu.dot_dimension_numbers<[1], [0], [0], [1], [0, 0, 1, 1], [], []>} : vector<104x128xbf16>, vector<128x128xbf16>, vector<104x128xf32> -> vector<104x128xf32>
    %c7 = arith.constant 7 : index
    %c0_46 = arith.constant 0 : index
    %74 = vector.load %arg5[%c7, %c0_46] : memref<9x128xf32, #tpu.memory_space<vmem>>, vector<1x128xf32>
    %75 = arith.truncf %73 : vector<104x128xf32> to vector<104x128xbf16>
    %76 = arith.truncf %74 : vector<1x128xf32> to vector<1x128xbf16>
    %77 = vector.broadcast %76 : vector<1x128xbf16> to vector<104x128xbf16>
    %78 = arith.addf %75, %77 : vector<104x128xbf16>
    %cst_47 = arith.constant 0.000000e+00 : bf16
    %79 = vector.broadcast %cst_47 : bf16 to vector<104x128xbf16>
    %80 = arith.maximumf %78, %79 : vector<104x128xbf16>
    %c7_48 = arith.constant 7 : index
    %c0_49 = arith.constant 0 : index
    %c0_50 = arith.constant 0 : index
    %81 = vector.load %arg3[%c7_48, %c0_49, %c0_50] : memref<8x128x128xbf16, #tpu.memory_space<vmem>>, vector<1x128x128xbf16>
    %82 = vector.shape_cast %81 : vector<1x128x128xbf16> to vector<128x128xbf16>
    %cst_51 = arith.constant dense<0.000000e+00> : vector<104x128xf32>
    %83 = tpu.matmul %80, %82, %cst_51 {dimension_numbers = #tpu.dot_dimension_numbers<[1], [0], [0], [1], [0, 0, 1, 1], [], []>} : vector<104x128xbf16>, vector<128x128xbf16>, vector<104x128xf32> -> vector<104x128xf32>
    %c8 = arith.constant 8 : index
    %c0_52 = arith.constant 0 : index
    %84 = vector.load %arg5[%c8, %c0_52] : memref<9x128xf32, #tpu.memory_space<vmem>>, vector<1x128xf32>
    %85 = arith.truncf %83 : vector<104x128xf32> to vector<104x128xbf16>
    %86 = arith.truncf %84 : vector<1x128xf32> to vector<1x128xbf16>
    %87 = vector.broadcast %86 : vector<1x128xbf16> to vector<104x128xbf16>
    %88 = arith.addf %85, %87 : vector<104x128xbf16>
    %cst_53 = arith.constant 0.000000e+00 : bf16
    %89 = vector.broadcast %cst_53 : bf16 to vector<104x128xbf16>
    %90 = arith.maximumf %88, %89 : vector<104x128xbf16>
    %c0_54 = arith.constant 0 : index
    %c0_55 = arith.constant 0 : index
    %91 = vector.load %arg4[%c0_54, %c0_55] : memref<128x640xbf16, #tpu.memory_space<vmem>>, vector<128x640xbf16>
    %cst_56 = arith.constant dense<0.000000e+00> : vector<104x640xf32>
    %92 = tpu.matmul %90, %91, %cst_56 {dimension_numbers = #tpu.dot_dimension_numbers<[1], [0], [0], [1], [0, 0, 1, 1], [], []>} : vector<104x128xbf16>, vector<128x640xbf16>, vector<104x640xf32> -> vector<104x640xf32>
    %c0_57 = arith.constant 0 : index
    %c0_58 = arith.constant 0 : index
    %93 = vector.load %arg6[%c0_57, %c0_58] : memref<1x640xf32, #tpu.memory_space<vmem>>, vector<1x640xf32>
    %94 = vector.broadcast %93 : vector<1x640xf32> to vector<104x640xf32>
    %95 = arith.addf %92, %94 : vector<104x640xf32>
    %96 = arith.truncf %95 : vector<104x640xf32> to vector<104x640xbf16>
    %c0_59 = arith.constant 0 : index
    %c0_60 = arith.constant 0 : index
    %97 = vector.load %arg7[%c0_59, %c0_60] : memref<104x640xbf16, #tpu.memory_space<vmem>>, vector<104x640xbf16>
    tpu.vector_store %arg7[%c0_59, %c0_60], %96 {strides = array<i32>} : memref<104x640xbf16, #tpu.memory_space<vmem>>, vector<104x640xbf16>,
    return
  }
  func.func @transform_0(%arg0: i32) -> (i32, i32) {
    %c0_i32 = arith.constant 0 : i32
    %c0_i32_0 = arith.constant 0 : i32
    return %arg0, %c0_i32 : i32, i32
  }
  func.func @transform_1(%arg0: i32) -> (i32, i32) {
    %c0_i32 = arith.constant 0 : i32
    %c0_i32_0 = arith.constant 0 : i32
    %c0_i32_1 = arith.constant 0 : i32
    return %c0_i32, %c0_i32_0 : i32, i32
  }
  func.func @transform_2(%arg0: i32) -> (i32, i32, i32) {
    %c0_i32 = arith.constant 0 : i32
    %c0_i32_0 = arith.constant 0 : i32
    %c0_i32_1 = arith.constant 0 : i32
    %c0_i32_2 = arith.constant 0 : i32
    return %c0_i32, %c0_i32_0, %c0_i32_1 : i32, i32, i32
  }
  func.func @transform_3(%arg0: i32) -> (i32, i32) {
    %c0_i32 = arith.constant 0 : i32
    %c0_i32_0 = arith.constant 0 : i32
    %c0_i32_1 = arith.constant 0 : i32
    return %c0_i32, %c0_i32_0 : i32, i32
  }
  func.func @transform_4(%arg0: i32) -> (i32, i32) {
    %c0_i32 = arith.constant 0 : i32
    %c0_i32_0 = arith.constant 0 : i32
    %c0_i32_1 = arith.constant 0 : i32
    return %c0_i32, %c0_i32_0 : i32, i32
  }
  func.func @transform_5(%arg0: i32) -> (i32, i32) {
    %c0_i32 = arith.constant 0 : i32
    %c0_i32_0 = arith.constant 0 : i32
    %c0_i32_1 = arith.constant 0 : i32
    return %c0_i32, %c0_i32_0 : i32, i32
  }
  func.func @transform_6(%arg0: i32) -> (i32, i32) {
    %c0_i32 = arith.constant 0 : i32
    %c0_i32_0 = arith.constant 0 : i32
    return %arg0, %c0_i32 : i32, i32
  }
}

</mosaic_0001>

<bundles_post_ra>
// kernel: tpu_custom_call.1
= control target key start
LH: loop header
LB: loop body
LE: loop exit
PB: predicated region body
PF: predicated region fallthrough
CT: control target
= control target key end

     0   :  { %s5849_s0 = inlined_call_operand.hbm [shape: f32[200,640], index: 0, kind: input, shape index: {}]   ;;  %s5850_s1 = inlined_call_operand.hbm [shape: bf16[640,128], index: 1, kind: input, shape index: {}]   ;;  %s5851_s2 = inlined_call_operand.hbm [shape: bf16[8,128,128], index: 2, kind: input, shape index: {}]   ;;  %s5852_s3 = inlined_call_operand.hbm [shape: bf16[128,640], index: 3, kind: input, shape index: {}]   ;;  %s5853_s4 = inlined_call_operand.hbm [shape: f32[9,128], index: 4, kind: input, shape index: {}]   ;;  %s5854_s5 = inlined_call_operand.vmem [shape: f32[1,640], index: 5, kind: input, shape index: {}]   ;;  %s5855_s6 = inlined_call_operand.hbm [shape: bf16[200,640], index: 6, kind: output, shape index: {}]  }
   0x1   :  { %5866 = sst [smem:[#allocation20_spill]] %s5850_s1 }
   0x2   :  { %5867 = sst [smem:[#allocation21_spill]] %s5855_s6 }
   0x3   :  { %11 = vsyncpa [#allocation3], 0 }
   0x4   :  { %13 = vsyncpa [#allocation3 + $0x1], 0 }
   0x5   :  { %14 = vsyncpa [#allocation6], 0 }
   0x6   :  { %15 = vsyncpa [#allocation9], 0 }
   0x7   :  { %16 = vsyncpa [#allocation4], 0 }
   0x8   :  { %18 = vsyncpa [#allocation4 + $0x1], 0  ;;  %s4966_s21 = smov 0   ;;  %s4968_s22 = smov 0  }
   0x9   :  { %s4970_s23 = smov 0   ;;  %s4972_s24 = smov 0  }
   0xa LB: > { %5868 = sst [smem:[#allocation16_spill]] %s4898_s21  ;;  %s4987_s25 = sadd.s32 4294967295, %s4910_s24   ;;  %s4910_s24 = sphi %s4972_s24, %s5894_s24   ;;  %s4906_s23 = sphi %s4970_s23, %s5898_s23   ;;  %s4902_s22 = sphi %s4968_s22, %s5897_s22   ;;  %s4898_s21 = sphi %s4966_s21, %s5896_s21  }
   0xb   : > { %s3484_s26 = sadd.s32 4294967294, %s4910_s24   ;;  %s4991_s27 = sadd.s32 1, %s4910_s24  }
   0xc   : > { %5869 = sst [smem:[#allocation17_spill]] %s4991_s27  ;;  %s31_s28 = sadd.s32 1, %s4906_s23 }
   0xd   : > { %s28_s29 = ssub.s32 %s4910_s24, %s4991_s27  ;;  %p38_p0 = scmp.ne.s32.totalorder %s4906_s23, %s4902_s22 }
   0xe   : > { %p29_p1 = scmp.eq.s32.totalorder %s28_s29, 0  ;;  %p39_p2 = scmp.eq.s32.totalorder %s4910_s24, 0 }
   0xf   : > { %p44_p3 = scmp.ne.s32.totalorder %s4902_s22, %s4898_s21  ;;  %p5856_p4 = scmp.eq.s32.totalorder %s4987_s25, 0 }
  0x10   : > { %s5003_s30 = scalar_select %p29_p1, %s4906_s23, %s31_s28  }
  0x11   : > { %p5005_p5 = por %p39_p2, %p38_p0  ;;  %p5011_p6 = por %p5856_p4, %p44_p3 }
  0x12   : > { %5870 = sst [smem:[#allocation18_spill]] %s5003_s30  ;;  %p173_p7 = scmp.eq.s32.totalorder %s4987_s25, 1 }
  0x13   : > { %s5871_s7 = scalar_select %p5005_p5, 1, 0 }
  0x14   : > { %s5872_s8 = scalar_select %p5011_p6, 1, 0 }
  0x15   : > { %p179_p8 = scmp.eq.s32.totalorder %s3484_s26, 1  ;;  %p3485_p9 = scmp.ge.s32.totalorder %s4910_s24, 1 }
  0x16   : > { %p186_p10 = scmp.lt.s32.totalorder %s4910_s24, 3  ;;  %p5018_p11 = por %p173_p7, %p38_p0 }
  0x17   : > { %p5022_p12 = por %p179_p8, %p44_p3  ;;  %s4912_s12 = smov [#allocation5]  }
  0x18   : > { %s5873_s9 = scalar_select %p5018_p11, 1, 0 }
  0x19   : > { %s5874_s10 = scalar_select %p5022_p12, 1, 0 }
  0x1a   : > { %p5026_p13 = pnand %p3485_p9, %p186_p10  ;;  %s198_s13 = sshll.u32 %s4912_s12, 4  ;;  %s199_s13 = int_to_ptr.vmem [resolvable:$true] %s198_s13 }
  0x1b   : > { %5875 = sst [smem:[#allocation19_spill]] %s5874_s10  ;;  %s4913_s15 = smov [#allocation8]  }
  0x1c   : > { %s5876_s11 = scalar_select %p5026_p13, 1, 0 }
  0x1d   : > { %p4459_p1 = pneg %p5026_p13  ;;  %s224_s16 = sshll.u32 %s4913_s15, 4  ;;  %s5038_s16 = int_to_ptr.vmem [resolvable:$true] %s224_s16 }
  0x1e   : > { %s5878_s1 = sld [smem:[#allocation20_spill]] }
  0x1f   : > { %p5034_p2 = pnand %p4459_p1, %p5856_p4 }
  0x21   : > { %p5048_p3 = pneg %p5034_p2 }
  0x24   : > { %s4696_s19 = scalar_lea.hbm %s5878_s1, 5120 }
  0x25   : > { %p4697_p0 = scmp.ne.s32.totalorder %s5878_s1, %s4696_s19  ;;  %p4703_p9 = scmp.lt.u32.totalorder %s4696_s19, %s5878_s1 }
  0x27   : > { %p4699_p7 = pnand %p5048_p3, %p4697_p0 }
  0x29   : > { %p4700_p8 = pneg %p4699_p7 }
  0x2b   : > { %p4705_p10 = pnand %p4703_p9, %p4700_p8 }
  0x2d   : > { %4708 = shalt.err (!%p4705_p10)
}
  0x2e   : > { %s4709_s15 = scalar_lea.vmem %s199_s13, 5120  ;;  %p4717_p11 = scmp.lt.s32.totalorder %s199_s13, %s199_s13 }
  0x2f   : > { %p4710_p1 = scmp.ne.s32.totalorder %s199_s13, %s4709_s15  ;;  %p4718_p6 = scmp.lt.s32.totalorder %s4709_s15, %s4709_s15 }
  0x31   : > { %p4712_p4 = pnand %p4710_p1, %p5048_p3  ;;  %p4719_p13 = por %p4718_p6, %p4717_p11 }
  0x33   : > { %p4713_p12 = pneg %p4712_p4 }
  0x35   : > { %p4720_p5 = pnand %p4719_p13, %p4713_p12 }
  0x37   : > { %4723 = shalt.err (!%p4720_p5)
}
  0x38   : > { %s5862_s17 = smov 64   ;;  %s5863_s18 = smov 4  }
  0x39   : > { %4462 = dma.hbm_to_vmem [thread:$0]  (!%p5034_p2), %s5878_s1, 5120, %s199_s13, [#allocation6], %s5862_s17, %s5862_s17, %s5863_s18  }
  0x3a   : > { %s4724_s12 = scalar_lea.hbm %s5852_s3, 5120 }
  0x3b   : > { %p4725_p4 = scmp.ne.s32.totalorder %s5852_s3, %s4724_s12  ;;  %p4731_p11 = scmp.lt.u32.totalorder %s4724_s12, %s5852_s3 }
  0x3d   : > { %p4727_p5 = pnand %p4725_p4, %p5048_p3 }
  0x3f   : > { %p4728_p6 = pneg %p4727_p5 }
  0x41   : > { %p4733_p12 = pnand %p4731_p11, %p4728_p6 }
  0x43   : > { %4736 = shalt.err (!%p4733_p12)
}
  0x44   : > { %s4737_s13 = scalar_lea.vmem %s5038_s16, 5120  ;;  %p4745_p8 = scmp.lt.s32.totalorder %s5038_s16, %s5038_s16 }
  0x45   : > { %p4738_p13 = scmp.ne.s32.totalorder %s5038_s16, %s4737_s13  ;;  %p4746_p9 = scmp.lt.s32.totalorder %s4737_s13, %s4737_s13 }
  0x47   : > { %p4740_p0 = pnand %p4738_p13, %p5048_p3  ;;  %p4747_p10 = por %p4746_p9, %p4745_p8 }
  0x49   : > { %p4741_p7 = pneg %p4740_p0 }
  0x4b   : > { %p4748_p1 = pnand %p4747_p10, %p4741_p7 }
  0x4d   : > { %4751 = shalt.err (!%p4748_p1)
}
  0x4e   : > { %s4916_s30 = smov 320   ;;  %s4917_s27 = smov 20  }
  0x4f   : > { %4468 = dma.hbm_to_vmem [thread:$0]  (!%p5034_p2), %s5852_s3, 5120, %s5038_s16, [#allocation9], %s4916_s30, %s4916_s30, %s4917_s27  }
  0x50   : > { %s4918_s20 = smov [#allocation7]   ;;  %s4919_s29 = smov [#allocation10]  }
  0x51   : > { %s211_s26 = sshll.u32 %s4918_s20, 4  ;;  %s237_s12 = sshll.u32 %s4919_s29, 4  ;;  %s212_s26 = int_to_ptr.vmem [resolvable:$true] %s211_s26  ;;  %s238_s12 = int_to_ptr.vmem [resolvable:$true] %s237_s12 }
  0x52   : > { %s4752_s17 = scalar_lea.hbm %s5851_s2, 8192 }
  0x53   : > { %p4753_p4 = scmp.ne.s32.totalorder %s5851_s2, %s4752_s17  ;;  %p4759_p11 = scmp.lt.u32.totalorder %s4752_s17, %s5851_s2 }
  0x55   : > { %p4755_p5 = pnand %p4753_p4, %p5048_p3 }
  0x57   : > { %p4756_p6 = pneg %p4755_p5 }
  0x59   : > { %p4761_p12 = pnand %p4759_p11, %p4756_p6 }
  0x5b   : > { %4764 = shalt.err (!%p4761_p12)
}
  0x5c   : > { %s4765_s16 = scalar_lea.vmem %s212_s26, 8192  ;;  %p4773_p8 = scmp.lt.s32.totalorder %s212_s26, %s212_s26 }
  0x5d   : > { %p4766_p13 = scmp.ne.s32.totalorder %s212_s26, %s4765_s16  ;;  %p4774_p9 = scmp.lt.s32.totalorder %s4765_s16, %s4765_s16 }
  0x5f   : > { %p4768_p0 = pnand %p4766_p13, %p5048_p3  ;;  %p4775_p10 = por %p4774_p9, %p4773_p8 }
  0x61   : > { %p4769_p7 = pneg %p4768_p0 }
  0x63   : > { %p4776_p1 = pnand %p4775_p10, %p4769_p7 }
  0x65   : > { %4779 = shalt.err (!%p4776_p1)
}
  0x66   : > { %s5880_s1 = smov 4   ;;  %s5881_s18 = smov 64  }
  0x67   : > { %4465 = dma.hbm_to_vmem [thread:$0]  (!%p5034_p2), %s5851_s2, 8192, %s212_s26, [#allocation6], %s5881_s18, %s5881_s18, %s5880_s1  }
  0x68   : > { %s4780_s27 = scalar_lea.hbm %s5853_s4, 256 }
  0x69   : > { %p4781_p4 = scmp.ne.s32.totalorder %s5853_s4, %s4780_s27  ;;  %p4787_p11 = scmp.lt.u32.totalorder %s4780_s27, %s5853_s4 }
  0x6b   : > { %p4783_p5 = pnand %p4781_p4, %p5048_p3 }
  0x6d   : > { %p4784_p6 = pneg %p4783_p5 }
  0x6f   : > { %p4789_p12 = pnand %p4787_p11, %p4784_p6 }
  0x71   : > { %4792 = shalt.err (!%p4789_p12)
}
  0x72   : > { %s4793_s15 = scalar_lea.vmem %s238_s12, 256  ;;  %p4801_p8 = scmp.lt.s32.totalorder %s238_s12, %s238_s12 }
  0x73   : > { %p4794_p13 = scmp.ne.s32.totalorder %s238_s12, %s4793_s15  ;;  %p4802_p9 = scmp.lt.s32.totalorder %s4793_s15, %s4793_s15 }
  0x75   : > { %p4796_p0 = pnand %p4794_p13, %p5048_p3  ;;  %p4803_p10 = por %p4802_p9, %p4801_p8 }
  0x77   : > { %p4797_p7 = pneg %p4796_p0 }
  0x79   : > { %p4804_p1 = pnand %p4803_p10, %p4797_p7 }
  0x7b   : > { %4807 = shalt.err (!%p4804_p1)
}
  0x7c   : > { %s4920_s26 = smov 128   ;;  %s4921_s13 = smov 8  }
  0x7d   : > { %4471 = dma.hbm_to_vmem [thread:$0]  (!%p5034_p2), %s5853_s4, 256, %s238_s12, [#allocation9], %s4920_s26, %s4920_s26, %s4921_s13  }
  0x7e   : > { %p3490_p4 = scmp.ge.s32.totalorder %s4910_s24, 2 }
  0x7f   : > { %p5882_p3 = scmp.ne.s32.totalorder (!%p3490_p4), %s5871_s7, 0 }
  0x80   : > { %250 = sbr.rel (%p3490_p4) target bundleno = 171 (0xab), region = 36 }
  0x87   : > { %253 = sbr.rel (!%p5882_p3) target bundleno = 171 (0xab), region = 40  ;;  %s254_s28 = sand.u32 (%p5882_p3), 1, %s4906_s23  }
  0x88   : > { %s259_s18 = smul.u32 (%p5882_p3), 13, %s4910_s24  ;;  %s5139_s17 = scalar_lea.sflag (%p5882_p3), [#allocation3], %s254_s28 }
  0x89   : > { %s4436_s6 = smul.u32 (%p5882_p3), 520, %s254_s28 }
  0x8a   : > { %s260_s21 = ssub.s32 (%p5882_p3), 25, %s259_s18 }
  0x8b   : > { %p261_p5 = scmp.lt.s32.totalorder (%p5882_p3), %s260_s21, 13  ;;  %s258_s30 = scalar_lea.vmem (%p5882_p3), [#allocation2], %s4436_s6 }
  0x8e   : > { %s5900_s21 = smov (!%p261_p5, %s260_s21), 13 }
  0x8f   : > { %s5136_s14 = smul.u32 640, %s5900_s21 }
  0x91   : > { %s266_s12 = ssub.s32 8320, %s5136_s14 }
  0x92   : > { %267 = vsyncadd %s5139_s17, %s266_s12  ;;  %p3493_p2 = scmp.ne.s32.totalorder %s5136_s14, 0  ;;  %s4480_s7 = smul.u32 8320, %s4910_s24 }
  0x93   : > { %s273_s27 = sshll.u32 %s258_s30, 4  ;;  %s4812_s13 = scalar_lea.hbm %s5849_s0, 16000  ;;  %s5149_s27 = int_to_ptr.vmem [resolvable:$true] %s273_s27 }
  0x94   : > { %s5147_s20 = scalar_lea.hbm %s5849_s0, %s4480_s7 }
  0x95   : > { %s4808_s29 = scalar_lea.hbm %s5147_s20, %s5136_s14  ;;  %p4813_p13 = scmp.lt.u32.totalorder %s5147_s20, %s5849_s0 }
  0x96   : > { %p4809_p6 = scmp.ne.s32.totalorder %s5147_s20, %s4808_s29  ;;  %p4814_p0 = scmp.lt.u32.totalorder %s4812_s13, %s4808_s29 }
  0x97   : > { %p4816_p8 = scmp.lt.u32.totalorder %s4808_s29, %s5147_s20 }
  0x98   : > { %p4810_p11 = pnand %p4809_p6, %p3493_p2  ;;  %p4815_p7 = por %p4814_p0, %p4813_p13 }
  0x9a   : > { %p4811_p12 = pneg %p4810_p11  ;;  %p4817_p9 = por %p4816_p8, %p4815_p7 }
  0x9c   : > { %p4818_p10 = pnand %p4817_p9, %p4811_p12 }
  0x9e   : > { %4821 = shalt.err (!%p4818_p10)
}
  0x9f   : > { %s4822_s28 = scalar_lea.vmem %s5149_s27, %s5136_s14  ;;  %s4922_s18 = smov [#allocation2]  }
  0xa0   : > { %p4823_p1 = scmp.ne.s32.totalorder %s5149_s27, %s4822_s28  ;;  %s4826_s6 = sshll.u32 %s4922_s18, 4  ;;  %s4827_s6 = int_to_ptr.vmem [resolvable:$false] %s4826_s6 }
  0xa1   : > { %s4828_s21 = scalar_lea.vmem %s4827_s6, 16640  ;;  %p4829_p6 = scmp.lt.s32.totalorder %s5149_s27, %s4827_s6 }
  0xa2   : > { %p4824_p3 = pnand %p4823_p1, %p3493_p2  ;;  %p4830_p11 = scmp.lt.s32.totalorder %s4828_s21, %s4822_s28 }
  0xa4   : > { %p4825_p5 = pneg %p4824_p3  ;;  %p4831_p13 = por %p4830_p11, %p4829_p6 }
  0xa6   : > { %p4832_p0 = pnand %p4831_p13, %p4825_p5 }
  0xa8   : > { %4835 = shalt.err (!%p4832_p0)
}
  0xa9   : > { %s4923_s12 = smov 640   ;;  %s4924_s30 = smov 40  }
  0xaa   : > { %279 = dma.hbm_to_vmem [thread:$0]  (%p3493_p2), %s5147_s20, %s5136_s14, %s5149_s27, %s5139_s17, %s4923_s12, %s4923_s12, %s4924_s30  }
  0xab PF: > { %p5883_p12 = scmp.ne.s32.totalorder %s5876_s11, 0 }
  0xac   : > { %s5179_s7 = sand.u32 (!%p5883_p12), 1, %s4902_s22   ;;  %p5884_p7 = scmp.ne.s32.totalorder (!%p5883_p12), %s5872_s8, 0 }
  0xad   : > { %285 = sbr.rel (%p5883_p12) target bundleno = 2610 (0xa32), region = 44  ;;  %s288_s19 = scalar_lea.sflag (!%p5883_p12), [#allocation3], %s5179_s7 }
  0xae   : > { %s4438_s10 = smul.u32 (!%p5883_p12), 520, %s5179_s7 }
  0xb0   : > { %s5183_s29 = scalar_lea.vmem (!%p5883_p12), [#allocation2], %s4438_s10 }
  0xb4   : > { %4881 = dma.done.wait (%p5884_p7), %s288_s19, 8320  }
  0xb5   : > { %4883 = vsyncadd (%p5884_p7), %s288_s19, 4294958976  ;;  %p5885_p2 = scmp.eq.s32.totalorder %s4987_s25, 0 }
  0xb7   : > { %4885 = dma.done.wait (%p5885_p2), [#allocation6], 13312   ;;  %p5886_p8 = pmov %p5885_p2 }
  0xb8   : > { %p5887_p9 = pmov %p5885_p2 }
  0xb9   : > { %4887 = vsyncadd (%p5886_p8), [#allocation6], 4294953984 }
  0xba   : > { %4889 = dma.done.wait (%p5887_p9), [#allocation9], 5376   ;;  %p5888_p10 = pmov %p5885_p2 }
  0xbb   : > { %v4536_v0 = vld [vmem:[#allocation5 + $0x40] sm:$0xff]   ;;  %v4540_v4 = vld [vmem:[#allocation5 + $0x48] sm:$0xff]   ;;  %v4544_v8 = vld [vmem:[#allocation5 + $0x50] sm:$0xff]   ;;  %v4925_v39 = vmov 0.0   ;;  %vm4926_vm0 = vmmov 0   ;;  %s4439_s14 = smul.u32 260, %s5179_s7 }
  0xbc   : > { %4891 = vsyncadd (%p5888_p10), [#allocation9], 4294961920  ;;  %v4537_v1 = vld [vmem:[#allocation5 + $0xc0] sm:$0xff]   ;;  %3730 = vmatprep.subr.bf16.mxu0 %v4536_v0  ;;  %v4541_v5 = vld [vmem:[#allocation5 + $0xc8] sm:$0xff]   ;;  %s3352_s27 = scalar_lea.sflag [#allocation4], %s5179_s7  ;;  %p5889_p1 = scmp.ne.s32.totalorder %s5873_s9, 0 }
  0xbd   : > { %v4538_v2 = vld [vmem:[#allocation5] sm:$0xff]   ;;  %3788 = vmatprep.subr.bf16.mxu1 %v4537_v1  ;;  %v4542_v6 = vld [vmem:[#allocation5 + $0x8] sm:$0xff]   ;;  %v4545_v9 = vld [vmem:[#allocation5 + $0xd0] sm:$0xff]   ;;  %s5684_s17 = scalar_lea.vmem [#allocation11], %s4439_s14  ;;  %s3359_s20 = smul.u32 (%p5889_p1), 13, %s4987_s25 }
  0xbe   : > { %v4539_v3 = vld [vmem:[#allocation5 + $0x80] sm:$0xff]   ;;  %3731 = vmatpush3.bf16.msra.mxu0 %v4538_v2  ;;  %v4543_v7 = vld [vmem:[#allocation5 + $0x88] sm:$0xff]   ;;  %v4546_v10 = vld [vmem:[#allocation5 + $0x10] sm:$0xff]  }
  0xbf   : > { %3789 = vmatpush3.bf16.msra.mxu1 %v4539_v3  ;;  %3732 = vmatprep.subr.bf16.mxu0 %v4540_v4  ;;  %v4547_v11 = vld [vmem:[#allocation5 + $0x90] sm:$0xff]   ;;  %v4548_v12 = vld [vmem:[#allocation5 + $0x58] sm:$0xff]   ;;  %v4552_v16 = vld [vmem:[#allocation5 + $0x60] sm:$0xff]   ;;  %s3360_s15 = ssub.s32 (%p5889_p1), 25, %s3359_s20 }
  0xc0   : > { %3790 = vmatprep.subr.bf16.mxu1 %v4541_v5  ;;  %v4549_v13 = vld [vmem:[#allocation5 + $0xd8] sm:$0xff]   ;;  %v4553_v17 = vld [vmem:[#allocation5 + $0xe0] sm:$0xff]   ;;  %v4556_v20 = vld [vmem:[#allocation5 + $0x68] sm:$0xff]   ;;  %p3361_p3 = scmp.lt.s32.totalorder (%p5889_p1), %s3360_s15, 13 }
  0xc1   : > { %v4550_v14 = vld [vmem:[#allocation5 + $0x18] sm:$0xff]   ;;  %v4554_v18 = vld [vmem:[#allocation5 + $0x20] sm:$0xff]   ;;  %v4557_v21 = vld [vmem:[#allocation5 + $0xe8] sm:$0xff]  }
  0xc2   : > { %3733 = vmatpush3.bf16.msra.mxu0 %v4542_v6  ;;  %v4551_v15 = vld [vmem:[#allocation5 + $0x98] sm:$0xff]   ;;  %v4555_v19 = vld [vmem:[#allocation5 + $0xa0] sm:$0xff]   ;;  %v4558_v22 = vld [vmem:[#allocation5 + $0x28] sm:$0xff]  }
  0xc3   : > { %3791 = vmatpush3.bf16.msra.mxu1 %v4543_v7  ;;  %3734 = vmatprep.subr.bf16.mxu0 %v4544_v8  ;;  %v4559_v23 = vld [vmem:[#allocation5 + $0xa8] sm:$0xff]   ;;  %v4560_v24 = vld [vmem:[#allocation5 + $0x70] sm:$0xff]   ;;  %v4564_v28 = vld [vmem:[#allocation5 + $0x78] sm:$0xff]  }
  0xc4   : > { %3792 = vmatprep.subr.bf16.mxu1 %v4545_v9  ;;  %v4561_v25 = vld [vmem:[#allocation5 + $0xf0] sm:$0xff]   ;;  %v4565_v29 = vld [vmem:[#allocation5 + $0xf8] sm:$0xff]   ;;  %v355_v33 = vld [vmem:[%s5183_s29 + $0x30] sm:$0xff] }
  0xc5   : > { %v4562_v26 = vld [vmem:[#allocation5 + $0x30] sm:$0xff]   ;;  %v4566_v30 = vld [vmem:[#allocation5 + $0x38] sm:$0xff]   ;;  %v351_v42 = vld [vmem:[%s5183_s29 + $0x10] sm:$0xff] }
  0xc6   : > { %3735 = vmatpush3.bf16.msra.mxu0 %v4546_v10  ;;  %v4563_v27 = vld [vmem:[#allocation5 + $0xb0] sm:$0xff]   ;;  %v4567_v31 = vld [vmem:[#allocation5 + $0xb8] sm:$0xff]   ;;  %v4568_v45 = vld [vmem:[#allocation5 + $0x100] sm:$0xff]  }
  0xc7   : > { %3793 = vmatpush3.bf16.msra.mxu1 %v4547_v11  ;;  %3736 = vmatprep.subr.bf16.mxu0 %v4548_v12  ;;  %v350_v32 = vld [vmem:[%s5183_s29 + $0x8] sm:$0xff]  ;;  %v352_v34 = vld [vmem:[%s5183_s29 + $0x18] sm:$0xff]  ;;  %v357_v36 = vld [vmem:[%s5183_s29 + $0x40] sm:$0xff] }
  0xc8   : > { %3794 = vmatprep.subr.bf16.mxu1 %v4549_v13  ;;  %v415_v35 = vpack.c.bf16 %v355_v33, %v350_v32  ;;  %v349_v37 = vld [vmem:[%s5183_s29] sm:$0xff]  ;;  %v354_v38 = vld [vmem:[%s5183_s29 + $0x28] sm:$0xff]  ;;  %v417_v40 = vpack.c.bf16 %v357_v36, %v352_v34  ;;  %v356_v43 = vld [vmem:[%s5183_s29 + $0x38] sm:$0xff] }
  0xc9   : > { %v414_v41 = vpack.c.bf16 %v354_v38, %v349_v37  ;;  %v416_v44 = vpack.c.bf16 %v356_v43, %v351_v42  ;;  %v360_v46 = vld [vmem:[%s5183_s29 + $0x58] sm:$0xff]  ;;  %v365_v47 = vld [vmem:[%s5183_s29 + $0x80] sm:$0xff]  ;;  %v362_v48 = vld [vmem:[%s5183_s29 + $0x68] sm:$0xff] }
  0xca   : > { %3737 = vmatpush3.bf16.msra.mxu0 %v4550_v14  ;;  %801 = vmatprep.mubr.bf16.mxu0 %v415_v35  ;;  %v367_v49 = vld [vmem:[%s5183_s29 + $0x90] sm:$0xff]  ;;  %v420_v50 = vpack.c.bf16 %v365_v47, %v360_v46  ;;  %v364_v53 = vld [vmem:[%s5183_s29 + $0x78] sm:$0xff]  ;;  %v361_v54 = vld [vmem:[%s5183_s29 + $0x60] sm:$0xff] }
  0xcb   : > { %3795 = vmatpush3.bf16.msra.mxu1 %v4551_v15  ;;  %3738 = vmatprep.subr.bf16.mxu0 %v4552_v16  ;;  %v422_v51 = vpack.c.bf16 %v367_v49, %v362_v48  ;;  %v359_v52 = vld [vmem:[%s5183_s29 + $0x50] sm:$0xff]  ;;  %v366_v55 = vld [vmem:[%s5183_s29 + $0x88] sm:$0xff]  ;;  %v372_v60 = vld [vmem:[%s5183_s29 + $0xb8] sm:$0xff] }
  0xcc   : > { %3796 = vmatprep.subr.bf16.mxu1 %v4553_v17  ;;  %889 = vmatprep.mubr.bf16.mxu1 %v417_v40  ;;  %v4569_v56 = vld [vmem:[#allocation5 + $0x108] sm:$0xff]   ;;  %v370_v57 = vld [vmem:[%s5183_s29 + $0xa8] sm:$0xff]  ;;  %v419_v59 = vpack.c.bf16 %v364_v53, %v359_v52  ;;  %v377_v61 = vld [vmem:[%s5183_s29 + $0xe0] sm:$0xff]  ;;  %v421_v62 = vpack.c.bf16 %v366_v55, %v361_v54 }
  0xcd   : > { %v375_v58 = vld [vmem:[%s5183_s29 + $0xd0] sm:$0xff]  ;;  %v427_v0 = vpack.c.bf16 %v377_v61, %v372_v60  ;;  %v4570_v1 = vld [vmem:[#allocation5 + $0x110] sm:$0xff]   ;;  %v374_v3 = vld [vmem:[%s5183_s29 + $0xc8] sm:$0xff] }
  0xce   : > { %3739 = vmatpush3.bf16.msra.mxu0 %v4554_v18  ;;  %v425_v63 = vpack.c.bf16 %v375_v58, %v370_v57  ;;  %v369_v2 = vld [vmem:[%s5183_s29 + $0xa0] sm:$0xff]  ;;  %v371_v4 = vld [vmem:[%s5183_s29 + $0xb0] sm:$0xff]  ;;  %v376_v5 = vld [vmem:[%s5183_s29 + $0xd8] sm:$0xff] }
  0xcf   : > { %3797 = vmatpush3.bf16.msra.mxu1 %v4555_v19  ;;  %3740 = vmatprep.subr.bf16.mxu0 %v4556_v20  ;;  %v4571_v6 = vld [vmem:[#allocation5 + $0x118] sm:$0xff]   ;;  %v380_v7 = vld [vmem:[%s5183_s29 + $0xf8] sm:$0xff]  ;;  %v387_v10 = vld [vmem:[%s5183_s29 + $0x130] sm:$0xff]  ;;  %v424_v11 = vpack.c.bf16 %v374_v3, %v369_v2  ;;  %v426_v12 = vpack.c.bf16 %v376_v5, %v371_v4 }
  0xd0   : > { %3798 = vmatprep.subr.bf16.mxu1 %v4557_v21  ;;  %v385_v8 = vld [vmem:[%s5183_s29 + $0x120] sm:$0xff]  ;;  %v382_v9 = vld [vmem:[%s5183_s29 + $0x108] sm:$0xff]  ;;  %v379_v16 = vld [vmem:[%s5183_s29 + $0xf0] sm:$0xff] }
  0xd1   : > { %v430_v13 = vpack.c.bf16 %v385_v8, %v380_v7  ;;  %v432_v14 = vpack.c.bf16 %v387_v10, %v382_v9  ;;  %v4572_v15 = vld [vmem:[#allocation5 + $0x120] sm:$0xff]   ;;  %v384_v17 = vld [vmem:[%s5183_s29 + $0x118] sm:$0xff]  ;;  %v381_v18 = vld [vmem:[%s5183_s29 + $0x100] sm:$0xff] }
  0xd2   : > { %3741 = vmatpush3.bf16.msra.mxu0 %v4558_v22  ;;  %v386_v19 = vld [vmem:[%s5183_s29 + $0x128] sm:$0xff]  ;;  %v395_v21 = vld [vmem:[%s5183_s29 + $0x170] sm:$0xff]  ;;  %v396_v33 = vld [vmem:[%s5183_s29 + $0x178] sm:$0xff] }
  0xd3   : > { %3799 = vmatpush3.bf16.msra.mxu1 %v4559_v23  ;;  %3742 = vmatprep.subr.bf16.mxu0 %v4560_v24  ;;  %v390_v20 = vld [vmem:[%s5183_s29 + $0x148] sm:$0xff]  ;;  %v4573_v22 = vld [vmem:[#allocation5 + $0x128] sm:$0xff]   ;;  %v397_v24 = vld [vmem:[%s5183_s29 + $0x180] sm:$0xff] }
  0xd4   : > { %3800 = vmatprep.subr.bf16.mxu1 %v4561_v25  ;;  %v392_v23 = vld [vmem:[%s5183_s29 + $0x158] sm:$0xff]  ;;  %v429_v25 = vpack.c.bf16 %v384_v17, %v379_v16  ;;  %v391_v32 = vld [vmem:[%s5183_s29 + $0x150] sm:$0xff]  ;;  %v405_v35 = vld [vmem:[%s5183_s29 + $0x1c0] sm:$0xff] }
  0xd5   : > { %v400_v34 = vld [vmem:[%s5183_s29 + $0x198] sm:$0xff]  ;;  %v402_v36 = vld [vmem:[%s5183_s29 + $0x1a8] sm:$0xff]  ;;  %v407_v37 = vld [vmem:[%s5183_s29 + $0x1d0] sm:$0xff] }
  0xd6   : > { %3743 = vmatpush3.bf16.msra.mxu0 %v4562_v26  ;;  %v431_v26 = vpack.c.bf16 %v386_v19, %v381_v18  ;;  %v4575_v38 = vld [vmem:[#allocation5 + $0x138] sm:$0xff]   ;;  %v440_v42 = vpack.c.bf16 %v405_v35, %v400_v34  ;;  %v442_v43 = vpack.c.bf16 %v407_v37, %v402_v36  ;;  %v412_v49 = vld [vmem:[%s5183_s29 + $0x1f8] sm:$0xff]  ;;  %v411_v55 = vld [vmem:[%s5183_s29 + $0x1f0] sm:$0xff] }
  0xd7   : > { %3801 = vmatpush3.bf16.msra.mxu1 %v4563_v27  ;;  %3744 = vmatprep.subr.bf16.mxu0 %v4564_v28  ;;  %v435_v27 = vpack.c.bf16 %v395_v21, %v390_v20  ;;  %v437_v28 = vpack.c.bf16 %v397_v24, %v392_v23  ;;  %v401_v46 = vld [vmem:[%s5183_s29 + $0x1a0] sm:$0xff]  ;;  %v406_v47 = vld [vmem:[%s5183_s29 + $0x1c8] sm:$0xff]  ;;  %v447_v53 = vpack.c.bf16 %v412_v49, %v412_v49  ;;  %v363_v61 = vld [vmem:[%s5183_s29 + $0x70] sm:$0xff] }
  0xd8   : > { %3802 = vmatprep.subr.bf16.mxu1 %v4565_v29  ;;  %v4574_v29 = vld [vmem:[#allocation5 + $0x130] sm:$0xff]   ;;  %v410_v48 = vld [vmem:[%s5183_s29 + $0x1e8] sm:$0xff]  ;;  %v446_v57 = vpack.c.bf16 %v411_v55, %v411_v55  ;;  %v383_v3 = vld [vmem:[%s5183_s29 + $0x110] sm:$0xff] }
  0xd9   : > { %v445_v52 = vpack.c.bf16 %v410_v48, %v410_v48  ;;  %v409_v54 = vld [vmem:[%s5183_s29 + $0x1e0] sm:$0xff]  ;;  %v388_v4 = vld [vmem:[%s5183_s29 + $0x138] sm:$0xff]  ;;  %v398_v7 = vld [vmem:[%s5183_s29 + $0x188] sm:$0xff] }
  0xda   : > { %3745 = vmatpush3.bf16.msra.mxu0 %v4566_v30  ;;  %v389_v30 = vld [vmem:[%s5183_s29 + $0x140] sm:$0xff]  ;;  %v433_v5 = vpack.c.bf16 %v388_v4, %v383_v3  ;;  %v403_v9 = vld [vmem:[%s5183_s29 + $0x1b0] sm:$0xff]  ;;  %v408_v10 = vld [vmem:[%s5183_s29 + $0x1d8] sm:$0xff] }
  0xdb   : > { %3803 = vmatpush3.bf16.msra.mxu1 %v4567_v31  ;;  %3996 = vmatprep.subr.bf16.mxu0 %v4925_v39  ;;  %v394_v31 = vld [vmem:[%s5183_s29 + $0x168] sm:$0xff]  ;;  %v353_v58 = vld [vmem:[%s5183_s29 + $0x20] sm:$0xff]  ;;  %v4581_v19 = vld [vmem:[#allocation7 + $0x28] sm:$0xff]  }
  0xdc   : > { %4040 = vmatprep.subr.bf16.mxu1 %v4925_v39  ;;  %v434_v40 = vpack.c.bf16 %v394_v31, %v389_v30  ;;  %v4578_v16 = vld [vmem:[#allocation7 + $0x10] sm:$0xff]   ;;  %v4579_v17 = vld [vmem:[#allocation7 + $0x18] sm:$0xff]   ;;  %v4580_v18 = vld [vmem:[#allocation7 + $0x20] sm:$0xff]  }
  0xdd   : > { %802 = vmatmul.mubr.bf16.vlgmr.msra.gmra.mrb[0].mxu0 %v414_v41  ;;  %v436_v41 = vpack.c.bf16 %v396_v33, %v391_v32  ;;  %v4582_v20 = vld [vmem:[#allocation7 + $0x30] sm:$0xff]   ;;  %v4583_v21 = vld [vmem:[#allocation7 + $0x38] sm:$0xff]   ;;  %v4585_v23 = vld [vmem:[#allocation7 + $0x48] sm:$0xff]  }
  0xde   : > { %890 = vmatmul.mubr.bf16.vlgmr.msra.gmra.mrb[0].mxu1 %v416_v44  ;;  %3997 = vmatpush3.bf16.msra.mxu0 %v4568_v45  ;;  %v399_v44 = vld [vmem:[%s5183_s29 + $0x190] sm:$0xff]  ;;  %v404_v45 = vld [vmem:[%s5183_s29 + $0x1b8] sm:$0xff] }
  0xdf   : > { %3998 = vmatprep.subr.bf16.mxu0 %v4925_v39  ;;  %809 = vmatprep.mubr.bf16.mxu0 %v420_v50  ;;  %v439_v50 = vpack.c.bf16 %v404_v45, %v399_v44  ;;  %v4586_v24 = vld [vmem:[#allocation7 + $0x50] sm:$0xff]  }
  0xe0   : > { %897 = vmatprep.mubr.bf16.mxu1 %v422_v51  ;;  %v441_v51 = vpack.c.bf16 %v406_v47, %v401_v46  ;;  %v4590_v46 = vld [vmem:[#allocation7 + $0x70] sm:$0xff]  }
  0xe2   : > { %3999 = vmatpush3.bf16.msra.mxu0 %v4569_v56  ;;  %v444_v56 = vpack.c.bf16 %v409_v54, %v409_v54 }
  0xe3   : > { %4000 = vmatprep.subr.bf16.mxu0 %v4925_v39 }
  0xe5   : > { %810 = vmatmul.mubr.bf16.gmra.mrb[4].mxu0 %v419_v59  ;;  %v358_v59 = vld [vmem:[%s5183_s29 + $0x48] sm:$0xff] }
  0xe6   : > { %898 = vmatmul.mubr.bf16.gmra.mrb[4].mxu1 %v421_v62  ;;  %817 = vmatprep.mubr.bf16.mxu0 %v425_v63  ;;  %v418_v60 = vpack.c.bf16 %v358_v59, %v353_v58  ;;  %v368_v62 = vld [vmem:[%s5183_s29 + $0x98] sm:$0xff] }
  0xe7   : > { %905 = vmatprep.mubr.bf16.mxu1 %v427_v0  ;;  %4001 = vmatpush3.bf16.msra.mxu0 %v4570_v1  ;;  %v423_v63 = vpack.c.bf16 %v368_v62, %v363_v61  ;;  %v373_v0 = vld [vmem:[%s5183_s29 + $0xc0] sm:$0xff]  ;;  %v378_v1 = vld [vmem:[%s5183_s29 + $0xe8] sm:$0xff] }
  0xe8   : > { %4002 = vmatprep.subr.bf16.mxu0 %v4925_v39  ;;  %v428_v2 = vpack.c.bf16 %v378_v1, %v373_v0 }
  0xeb   : > { %4003 = vmatpush3.bf16.msra.mxu0 %v4571_v6  ;;  %v393_v6 = vld [vmem:[%s5183_s29 + $0x160] sm:$0xff] }
  0xec   : > { %4004 = vmatprep.subr.bf16.mxu0 %v4925_v39  ;;  %v438_v8 = vpack.c.bf16 %v398_v7, %v393_v6 }
  0xed   : > { %818 = vmatmul.mubr.bf16.gmra.mrb[8].mxu0 %v424_v11  ;;  %v443_v11 = vpack.c.bf16 %v408_v10, %v403_v9 }
  0xee   : > { %906 = vmatmul.mubr.bf16.gmra.mrb[8].mxu1 %v426_v12  ;;  %825 = vmatprep.mubr.bf16.mxu0 %v430_v13  ;;  %v4576_v12 = vld [vmem:[#allocation7] sm:$0xff]   ;;  %v413_v13 = vld [vmem:[%s5183_s29 + $0x200] sm:$0xff] }
  0xef   : > { %913 = vmatprep.mubr.bf16.mxu1 %v432_v14  ;;  %4005 = vmatpush3.bf16.msra.mxu0 %v4572_v15  ;;  %v448_v14 = vpack.c.bf16 %v413_v13, %v413_v13  ;;  %v4577_v15 = vld [vmem:[#allocation7 + $0x8] sm:$0xff]  }
  0xf0   : > { %4006 = vmatprep.subr.bf16.mxu0 %v4925_v39  ;;  %4041 = vmatpush3.bf16.msra.mxu1 %v4576_v12 }
  0xf1   : > { %4042 = vmatprep.subr.bf16.mxu1 %v4925_v39 }
  0xf3   : > { %4007 = vmatpush3.bf16.msra.mxu0 %v4573_v22  ;;  %v4584_v22 = vld [vmem:[#allocation7 + $0x40] sm:$0xff]  }
  0xf4   : > { %4008 = vmatprep.subr.bf16.mxu0 %v4925_v39  ;;  %4043 = vmatpush3.bf16.msra.mxu1 %v4577_v15 }
  0xf5   : > { %826 = vmatmul.mubr.bf16.gmra.mrb[12].mxu0 %v429_v25  ;;  %4044 = vmatprep.subr.bf16.mxu1 %v4925_v39  ;;  %v4587_v25 = vld [vmem:[#allocation7 + $0x58] sm:$0xff]  }
  0xf6   : > { %914 = vmatmul.mubr.bf16.gmra.mrb[12].mxu1 %v431_v26  ;;  %833 = vmatprep.mubr.bf16.mxu0 %v435_v27 }
  0xf7   : > { %921 = vmatprep.mubr.bf16.mxu1 %v437_v28  ;;  %4009 = vmatpush3.bf16.msra.mxu0 %v4574_v29  ;;  %v4588_v29 = vld [vmem:[#allocation7 + $0x60] sm:$0xff]  }
  0xf8   : > { %4010 = vmatprep.subr.bf16.mxu0 %v4925_v39  ;;  %4045 = vmatpush3.bf16.msra.mxu1 %v4578_v16 }
  0xf9   : > { %4046 = vmatprep.subr.bf16.mxu1 %v4925_v39 }
  0xfb   : > { %4011 = vmatpush3.bf16.msra.mxu0 %v4575_v38 }
  0xfc   : > { %4084 = vmatprep.subr.bf16.mxu0 %v4925_v39  ;;  %4047 = vmatpush3.bf16.msra.mxu1 %v4579_v17 }
  0xfd   : > { %834 = vmatmul.mubr.bf16.gmra.mrb[16].mxu0 %v434_v40  ;;  %4048 = vmatprep.subr.bf16.mxu1 %v4925_v39 }
  0xfe   : > { %922 = vmatmul.mubr.bf16.gmra.mrb[16].mxu1 %v436_v41  ;;  %841 = vmatprep.mubr.bf16.mxu0 %v440_v42  ;;  %v4589_v41 = vld [vmem:[#allocation7 + $0x68] sm:$0xff]  }
  0xff   : > { %929 = vmatprep.mubr.bf16.mxu1 %v442_v43 }
 0x100   : > { %4049 = vmatpush3.bf16.msra.mxu1 %v4580_v18 }
 0x101   : > { %4050 = vmatprep.subr.bf16.mxu1 %v4925_v39 }
 0x104   : > { %4051 = vmatpush3.bf16.msra.mxu1 %v4581_v19 }
 0x105   : > { %842 = vmatmul.mubr.bf16.gmra.mrb[20].mxu0 %v439_v50  ;;  %4052 = vmatprep.subr.bf16.mxu1 %v4925_v39 }
 0x106   : > { %930 = vmatmul.mubr.bf16.gmra.mrb[20].mxu1 %v441_v51  ;;  %849 = vmatprep.mubr.bf16.mxu0 %v445_v52 }
 0x107   : > { %937 = vmatprep.mubr.bf16.mxu1 %v447_v53 }
 0x108   : > { %4053 = vmatpush3.bf16.msra.mxu1 %v4582_v20 }
 0x109   : > { %4054 = vmatprep.subr.bf16.mxu1 %v4925_v39 }
 0x10c   : > { %4055 = vmatpush3.bf16.msra.mxu1 %v4583_v21 }
 0x10d   : > { %850 = vmatmul.mubr.bf16.gmra.mrb[24].mxu0 %v444_v56  ;;  %4128 = vmatprep.subr.bf16.mxu1 %v4925_v39 }
 0x10e   : > { %938 = vmatmul.mubr.bf16.gmra.mrb[24].mxu1 %v446_v57  ;;  %4012 = vmatprep.mubr.msk.bf16.mxu0 %vm4926_vm0, %v4925_v39 }
 0x10f   : > { %4056 = vmatprep.mubr.msk.bf16.mxu1 %vm4926_vm0, %v4925_v39 }
 0x115   : > { %4013 = vmatmul.mubr.bf16.vlgmr.msra.gmra.mrb[28].mxu0 %v418_v60 }
 0x116   : > { %4016 = vmatprep.mubr.msk.bf16.mxu0 %vm4926_vm0, %v4925_v39  ;;  %4085 = vmatpush3.bf16.msra.mxu0 %v4584_v22 }
 0x117   : > { %4086 = vmatprep.subr.bf16.mxu0 %v4925_v39 }
 0x11a   : > { %4087 = vmatpush3.bf16.msra.mxu0 %v4585_v23 }
 0x11b   : > { %4088 = vmatprep.subr.bf16.mxu0 %v4925_v39 }
 0x11d   : > { %4017 = vmatmul.mubr.bf16.gmra.mrb[32].mxu0 %v423_v63 }
 0x11e   : > { %4020 = vmatprep.mubr.msk.bf16.mxu0 %vm4926_vm0, %v4925_v39  ;;  %4089 = vmatpush3.bf16.msra.mxu0 %v4586_v24 }
 0x11f   : > { %4090 = vmatprep.subr.bf16.mxu0 %v4925_v39 }
 0x122   : > { %4091 = vmatpush3.bf16.msra.mxu0 %v4587_v25 }
 0x123   : > { %4092 = vmatprep.subr.bf16.mxu0 %v4925_v39 }
 0x125   : > { %4021 = vmatmul.mubr.bf16.gmra.mrb[36].mxu0 %v428_v2 }
 0x126   : > { %4024 = vmatprep.mubr.msk.bf16.mxu0 %vm4926_vm0, %v4925_v39  ;;  %4093 = vmatpush3.bf16.msra.mxu0 %v4588_v29 }
 0x127   : > { %4094 = vmatprep.subr.bf16.mxu0 %v4925_v39 }
 0x12a   : > { %4095 = vmatpush3.bf16.msra.mxu0 %v4589_v41 }
 0x12b   : > { %4096 = vmatprep.subr.bf16.mxu0 %v4925_v39 }
 0x12d   : > { %4025 = vmatmul.mubr.bf16.gmra.mrb[40].mxu0 %v433_v5 }
 0x12e   : > { %4028 = vmatprep.mubr.msk.bf16.mxu0 %vm4926_vm0, %v4925_v39  ;;  %4097 = vmatpush3.bf16.msra.mxu0 %v4590_v46 }
 0x12f   : > { %4098 = vmatprep.subr.bf16.mxu0 %v4925_v39 }
 0x135   : > { %4029 = vmatmul.mubr.bf16.gmra.mrb[44].mxu0 %v438_v8 }
 0x136   : > { %4032 = vmatprep.mubr.msk.bf16.mxu0 %vm4926_vm0, %v4925_v39 }
 0x13d   : > { %4033 = vmatmul.mubr.bf16.gmra.mrb[48].mxu0 %v443_v11 }
 0x13e   : > { %4036 = vmatprep.mubr.msk.bf16.mxu0 %vm4926_vm0, %v4925_v39 }
 0x145   : > { %4037 = vmatmul.mubr.bf16.gmra.mrb[52].mxu0 %v448_v14 }
 0x146   : > { %4100 = vmatprep.mubr.msk.bf16.mxu0 %vm4926_vm0, %v4925_v39 }
 0x1b0   : > { %v3746_v26 = vpop.f32.mrb[0].mxu0 }
 0x1b1   : > { %v3804_v27 = vpop.f32.mrb[0].mxu1  ;;  %v3747_v28 = vpop.f32.mrb[1].mxu0 }
 0x1b2   : > { %v3748_v30 = vadd.f32 %v3747_v28, %v3746_v26  ;;  %v3805_v31 = vpop.f32.mrb[1].mxu1  ;;  %v3749_v32 = vpop.f32.mrb[2].mxu0 }
 0x1b3   : > { %v3806_v33 = vadd.f32 %v3805_v31, %v3804_v27  ;;  %v3807_v34 = vpop.f32.mrb[2].mxu1  ;;  %v3750_v35 = vpop.f32.mrb[3].mxu0 }
 0x1b4   : > { %v3751_v36 = vadd.f32 %v3750_v35, %v3749_v32  ;;  %v3808_v37 = vpop.f32.mrb[3].mxu1 }
 0x1b5   : > { %v3809_v38 = vadd.f32 %v3808_v37, %v3807_v34  ;;  %v5302_v40 = vadd.f32 %v3806_v33, %v3748_v30 }
 0x1b7   : > { %v5305_v42 = vadd.f32 %v3809_v38, %v3751_v36 }
 0x1b8   : > { %v3752_v43 = vpop.f32.mrb[4].mxu0 }
 0x1b9   : > { %v3810_v44 = vpop.f32.mrb[4].mxu1  ;;  %v3753_v45 = vpop.f32.mrb[5].mxu0 }
 0x1ba   : > { %v3754_v47 = vadd.f32 %v3753_v45, %v3752_v43  ;;  %v3811_v48 = vpop.f32.mrb[5].mxu1  ;;  %v3755_v49 = vpop.f32.mrb[6].mxu0 }
 0x1bb   : > { %v3812_v50 = vadd.f32 %v3811_v48, %v3810_v44  ;;  %v3813_v51 = vpop.f32.mrb[6].mxu1  ;;  %v3756_v52 = vpop.f32.mrb[7].mxu0 }
 0x1bc   : > { %v3757_v53 = vadd.f32 %v3756_v52, %v3755_v49  ;;  %v3814_v54 = vpop.f32.mrb[7].mxu1  ;;  %v1045_v52 = vlaneseq }
 0x1bd   : > { %v3815_v55 = vadd.f32 %v3814_v54, %v3813_v51  ;;  %v5308_v56 = vadd.f32 %v3812_v50, %v3754_v47 }
 0x1bf   : > { %v5311_v57 = vadd.f32 %v3815_v55, %v3757_v53  ;;  %v1033_v55 = vld [vmem:[#allocation10] sm:$0x1] }
 0x1c0   : > { %v3758_v58 = vpop.f32.mrb[8].mxu0 }
 0x1c1   : > { %v3816_v59 = vpop.f32.mrb[8].mxu1  ;;  %v3759_v60 = vpop.f32.mrb[9].mxu0 }
 0x1c2   : > { %v3760_v61 = vadd.f32 %v3759_v60, %v3758_v58  ;;  %v3817_v62 = vpop.f32.mrb[9].mxu1  ;;  %v3761_v63 = vpop.f32.mrb[10].mxu0 }
 0x1c3   : > { %v3818_v0 = vadd.f32 %v3817_v62, %v3816_v59  ;;  %v3819_v1 = vpop.f32.mrb[10].mxu1  ;;  %v3762_v2 = vpop.f32.mrb[11].mxu0 }
 0x1c4   : > { %v3763_v3 = vadd.f32 %v3762_v2, %v3761_v63  ;;  %v3820_v4 = vpop.f32.mrb[11].mxu1  ;;  %v5329_v2 = vshrl.u32 %v1045_v52, 7 }
 0x1c5   : > { %v3821_v5 = vadd.f32 %v3820_v4, %v3819_v1  ;;  %v5313_v6 = vadd.f32 %v3818_v0, %v3760_v61  ;;  %v1041_v1 = vpack.c.bf16 %v1033_v55, %v1033_v55 }
 0x1c7   : > { %v5315_v7 = vadd.f32 %v3821_v5, %v3763_v3 }
 0x1c8   : > { %v3764_v8 = vpop.f32.mrb[12].mxu0 }
 0x1c9   : > { %v3822_v9 = vpop.f32.mrb[12].mxu1  ;;  %v3765_v10 = vpop.f32.mrb[13].mxu0 }
 0x1ca   : > { %v3766_v11 = vadd.f32 %v3765_v10, %v3764_v8  ;;  %v3823_v12 = vpop.f32.mrb[13].mxu1  ;;  %v3767_v13 = vpop.f32.mrb[14].mxu0  ;;  %v1043_v8 = vpack.i.b16 %v1041_v1, %v1041_v1 }
 0x1cb   : > { %v3824_v14 = vadd.f32 %v3823_v12, %v3822_v9  ;;  %v3825_v15 = vpop.f32.mrb[14].mxu1  ;;  %v3768_v16 = vpop.f32.mrb[15].mxu0  ;;  %v5334_v9 = vsub.s32 0, %v5329_v2 }
 0x1cc   : > { %v3769_v17 = vadd.f32 %v3768_v16, %v3767_v13  ;;  %v3826_v18 = vpop.f32.mrb[15].mxu1 }
 0x1cd   : > { %v3827_v19 = vadd.f32 %v3826_v18, %v3825_v15  ;;  %v5317_v20 = vadd.f32 %v3824_v14, %v3766_v11  ;;  %v5339_v15 = vrot.slane %v1043_v8, %v5334_v9 }
 0x1cf   : > { %v5319_v21 = vadd.f32 %v3827_v19, %v3769_v17 }
 0x1d0   : > { %v3770_v22 = vpop.f32.mrb[16].mxu0 }
 0x1d1   : > { %v3828_v23 = vpop.f32.mrb[16].mxu1  ;;  %v3771_v24 = vpop.f32.mrb[17].mxu0 }
 0x1d2   : > { %v3772_v25 = vadd.f32 %v3771_v24, %v3770_v22  ;;  %v3829_v26 = vpop.f32.mrb[17].mxu1  ;;  %v3773_v27 = vpop.f32.mrb[18].mxu0  ;;  %v4927_v22 = vmov 0  }
 0x1d3   : > { %v3830_v28 = vadd.f32 %v3829_v26, %v3828_v23  ;;  %v3831_v29 = vpop.f32.mrb[18].mxu1  ;;  %v3774_v30 = vpop.f32.mrb[19].mxu0 }
 0x1d4   : > { %v3775_v31 = vadd.f32 %v3774_v30, %v3773_v27  ;;  %v3832_v32 = vpop.f32.mrb[19].mxu1 }
 0x1d5   : > { %v3833_v33 = vadd.f32 %v3832_v32, %v3831_v29  ;;  %v5321_v34 = vadd.f32 %v3830_v28, %v3772_v25 }
 0x1d7   : > { %v5323_v35 = vadd.f32 %v3833_v33, %v3775_v31 }
 0x1d8   : > { %v3776_v36 = vpop.f32.mrb[20].mxu0 }
 0x1d9   : > { %v3834_v37 = vpop.f32.mrb[20].mxu1  ;;  %v3777_v38 = vpop.f32.mrb[21].mxu0 }
 0x1da   : > { %v3778_v41 = vadd.f32 %v3777_v38, %v3776_v36  ;;  %v3835_v43 = vpop.f32.mrb[21].mxu1  ;;  %v3779_v44 = vpop.f32.mrb[22].mxu0 }
 0x1db   : > { %v3836_v45 = vadd.f32 %v3835_v43, %v3834_v37  ;;  %v3837_v46 = vpop.f32.mrb[22].mxu1  ;;  %v3780_v47 = vpop.f32.mrb[23].mxu0 }
 0x1dc   : > { %v3781_v48 = vadd.f32 %v3780_v47, %v3779_v44  ;;  %v3838_v49 = vpop.f32.mrb[23].mxu1 }
 0x1dd   : > { %v3839_v50 = vadd.f32 %v3838_v49, %v3837_v46  ;;  %v5325_v51 = vadd.f32 %v3836_v45, %v3778_v41 }
 0x1df   : > { %v5327_v53 = vadd.f32 %v3839_v50, %v3781_v48 }
 0x1e0   : > { %v3782_v54 = vpop.f32.mrb[24].mxu0 }
 0x1e1   : > { %v3840_v58 = vpop.f32.mrb[24].mxu1  ;;  %v3783_v59 = vpop.f32.mrb[25].mxu0 }
 0x1e2   : > { %v3784_v60 = vadd.f32 %v3783_v59, %v3782_v54  ;;  %v3841_v61 = vpop.f32.mrb[25].mxu1  ;;  %v3785_v62 = vpop.f32.mrb[26].mxu0 }
 0x1e3   : > { %v3842_v63 = vadd.f32 %v3841_v61, %v3840_v58  ;;  %v3786_v0 = vpop.f32.mrb[27].mxu0  ;;  %v3843_v3 = vpop.f32.mrb[26].mxu1 }
 0x1e4   : > { %v3844_v4 = vpop.f32.mrb[27].mxu1 }
 0x1e5   : > { %v5331_v5 = vadd.f32 %v3842_v63, %v3784_v60 }
 0x1e8   : > { %v979_v10 = vpop.f32.mrb[28].mxu0 }
 0x1e9   : > { %v980_v11 = vadd.f32 %v979_v10, %v5302_v40  ;;  %v4014_v12 = vpop.f32.mrb[29].mxu0 }
 0x1ea   : > { %v982_v13 = vpop.f32.mrb[30].mxu0 }
 0x1eb   : > { %v983_v14 = vadd.f32 %v982_v13, %v5305_v42  ;;  %v4015_v16 = vpop.f32.mrb[31].mxu0 }
 0x1ec   : > { %v4593_v16 = vld [vmem:[#allocation7 + $0x88] sm:$0xff]  }
 0x1ed   : > { %v1034_v17 = vpack.c.bf16 %v983_v14, %v980_v11  ;;  %v4591_v14 = vld [vmem:[#allocation7 + $0x78] sm:$0xff]  }
 0x1ee   : > { %4099 = vmatpush3.bf16.msra.mxu0 %v4591_v14 }
 0x1ef   : > { %v1049_v18 = vadd.bf16 %v5339_v15, %v1034_v17  ;;  %4172 = vmatprep.subr.bf16.mxu0 %v4925_v39  ;;  %v4594_v17 = vld [vmem:[#allocation7 + $0x90] sm:$0xff]  }
 0x1f0   : > { %v987_v19 = vpop.f32.mrb[32].mxu0 }
 0x1f1   : > { %v1056_v23 = vmax.bf16 %v4927_v22, %v1049_v18  ;;  %v988_v24 = vadd.f32 %v987_v19, %v5308_v56  ;;  %v4018_v25 = vpop.f32.mrb[33].mxu0  ;;  %v4596_v18 = vld [vmem:[#allocation7 + $0xa0] sm:$0xff]   ;;  %v4597_v19 = vld [vmem:[#allocation7 + $0xa8] sm:$0xff]  }
 0x1f2   : > { %v990_v26 = vpop.f32.mrb[34].mxu0 }
 0x1f3   : > { %v991_v40 = vadd.f32 %v990_v26, %v5311_v57  ;;  %v4019_v27 = vpop.f32.mrb[35].mxu0  ;;  %4057 = vmatmul.mubr.bf16.vlgmr.msra.gmra.mrb[28].mxu1 %v1056_v23  ;;  %v4598_v23 = vld [vmem:[#allocation7 + $0xb0] sm:$0xff]  }
 0x1f4   : > { %4060 = vmatprep.mubr.msk.bf16.mxu1 %vm4926_vm0, %v4925_v39 }
 0x1f5   : > { %v1035_v42 = vpack.c.bf16 %v991_v40, %v988_v24  ;;  %v1215_v24 = vld [vmem:[#allocation10 + $0x1] sm:$0x1] }
 0x1f6   : > { %v1223_v25 = vpack.c.bf16 %v1215_v24, %v1215_v24  ;;  %v4606_v24 = vld [vmem:[#allocation7 + $0xf0] sm:$0xff]  }
 0x1f7   : > { %v1050_v28 = vadd.bf16 %v5339_v15, %v1035_v42 }
 0x1f8   : > { %v995_v29 = vpop.f32.mrb[36].mxu0  ;;  %v1225_v26 = vpack.i.b16 %v1223_v25, %v1223_v25  ;;  %v1398_v25 = vld [vmem:[#allocation10 + $0x2] sm:$0x1] }
 0x1f9   : > { %v996_v30 = vadd.f32 %v995_v29, %v5313_v6  ;;  %v4022_v31 = vpop.f32.mrb[37].mxu0  ;;  %v1057_v32 = vmax.bf16 %v4927_v22, %v1050_v28 }
 0x1fa   : > { %v998_v33 = vpop.f32.mrb[38].mxu0  ;;  %v1230_v42 = vrot.slane %v1225_v26, %v5334_v9  ;;  %v1406_v26 = vpack.c.bf16 %v1398_v25, %v1398_v25  ;;  %v4614_v25 = vld [vmem:[#allocation7 + $0x130] sm:$0xff]  }
 0x1fb   : > { %v999_v56 = vadd.f32 %v998_v33, %v5315_v7  ;;  %v4023_v36 = vpop.f32.mrb[39].mxu0  ;;  %4061 = vmatmul.mubr.bf16.gmra.mrb[32].mxu1 %v1057_v32 }
 0x1fc   : > { %4064 = vmatprep.mubr.msk.bf16.mxu1 %vm4926_vm0, %v4925_v39 }
 0x1fd   : > { %v1036_v57 = vpack.c.bf16 %v999_v56, %v996_v30 }
 0x1ff   : > { %v1051_v37 = vadd.bf16 %v5339_v15, %v1036_v57 }
 0x200   : > { %v1003_v38 = vpop.f32.mrb[40].mxu0 }
 0x201   : > { %v1004_v41 = vadd.f32 %v1003_v38, %v5317_v20  ;;  %v4026_v43 = vpop.f32.mrb[41].mxu0  ;;  %v1058_v6 = vmax.bf16 %v4927_v22, %v1051_v37 }
 0x202   : > { %v1006_v44 = vpop.f32.mrb[42].mxu0 }
 0x203   : > { %v1007_v45 = vadd.f32 %v1006_v44, %v5319_v21  ;;  %v4027_v46 = vpop.f32.mrb[43].mxu0  ;;  %4065 = vmatmul.mubr.bf16.gmra.mrb[36].mxu1 %v1058_v6 }
 0x204   : > { %4068 = vmatprep.mubr.msk.bf16.mxu1 %vm4926_vm0, %v4925_v39 }
 0x205   : > { %v1037_v7 = vpack.c.bf16 %v1007_v45, %v1004_v41 }
 0x207   : > { %v1052_v47 = vadd.bf16 %v5339_v15, %v1037_v7 }
 0x208   : > { %v1011_v48 = vpop.f32.mrb[44].mxu0 }
 0x209   : > { %v1012_v49 = vadd.f32 %v1011_v48, %v5321_v34  ;;  %v4030_v50 = vpop.f32.mrb[45].mxu0  ;;  %v1059_v20 = vmax.bf16 %v4927_v22, %v1052_v47 }
 0x20a   : > { %v1014_v52 = vpop.f32.mrb[46].mxu0 }
 0x20b   : > { %v1015_v54 = vadd.f32 %v1014_v52, %v5323_v35  ;;  %v4031_v55 = vpop.f32.mrb[47].mxu0  ;;  %4069 = vmatmul.mubr.bf16.gmra.mrb[40].mxu1 %v1059_v20 }
 0x20c   : > { %4072 = vmatprep.mubr.msk.bf16.mxu1 %vm4926_vm0, %v4925_v39 }
 0x20d   : > { %v1038_v21 = vpack.c.bf16 %v1015_v54, %v1012_v49 }
 0x20f   : > { %v1053_v58 = vadd.bf16 %v5339_v15, %v1038_v21 }
 0x210   : > { %v1019_v59 = vpop.f32.mrb[48].mxu0 }
 0x211   : > { %v1020_v60 = vadd.f32 %v1019_v59, %v5325_v51  ;;  %v4034_v61 = vpop.f32.mrb[49].mxu0  ;;  %v1060_v34 = vmax.bf16 %v4927_v22, %v1053_v58 }
 0x212   : > { %v1022_v62 = vpop.f32.mrb[50].mxu0 }
 0x213   : > { %v1023_v63 = vadd.f32 %v1022_v62, %v5327_v53  ;;  %v4035_v0 = vpop.f32.mrb[51].mxu0  ;;  %4073 = vmatmul.mubr.bf16.gmra.mrb[44].mxu1 %v1060_v34 }
 0x214   : > { %4076 = vmatprep.mubr.msk.bf16.mxu1 %vm4926_vm0, %v4925_v39 }
 0x215   : > { %v1039_v35 = vpack.c.bf16 %v1023_v63, %v1020_v60 }
 0x217   : > { %v1054_v1 = vadd.bf16 %v5339_v15, %v1039_v35 }
 0x218   : > { %v1027_v3 = vpop.f32.mrb[52].mxu0 }
 0x219   : > { %v1028_v4 = vadd.f32 %v1027_v3, %v5331_v5  ;;  %v1061_v8 = vmax.bf16 %v4927_v22, %v1054_v1  ;;  %v4038_v51 = vpop.f32.mrb[53].mxu0  ;;  %v4592_v5 = vld [vmem:[#allocation7 + $0x80] sm:$0xff]  }
 0x21a   : > { %v1030_v10 = vpop.f32.mrb[54].mxu0  ;;  %4129 = vmatpush3.bf16.msra.mxu1 %v4592_v5  ;;  %v4599_v5 = vld [vmem:[#allocation7 + $0xb8] sm:$0xff]  }
 0x21b   : > { %v1040_v11 = vpack.c.bf16 %v1028_v4, %v1028_v4  ;;  %4077 = vmatmul.mubr.bf16.gmra.mrb[48].mxu1 %v1061_v8  ;;  %v4039_v12 = vpop.f32.mrb[55].mxu0  ;;  %4130 = vmatprep.subr.bf16.mxu1 %v4925_v39 }
 0x21c   : > { %4080 = vmatprep.mubr.msk.bf16.mxu1 %vm4926_vm0, %v4925_v39 }
 0x21d   : > { %v1055_v53 = vadd.bf16 %v5339_v15, %v1040_v11  ;;  %v4595_v15 = vld [vmem:[#allocation7 + $0x98] sm:$0xff]  }
 0x21e   : > { %4131 = vmatpush3.bf16.msra.mxu1 %v4593_v16  ;;  %v4600_v16 = vld [vmem:[#allocation7 + $0xc0] sm:$0xff]  }
 0x21f   : > { %v1062_v13 = vmax.bf16 %v4927_v22, %v1055_v53  ;;  %4132 = vmatprep.subr.bf16.mxu1 %v4925_v39 }
 0x222   : > { %4133 = vmatpush3.bf16.msra.mxu1 %v4594_v17  ;;  %v4601_v17 = vld [vmem:[#allocation7 + $0xc8] sm:$0xff]  }
 0x223   : > { %4081 = vmatmul.mubr.bf16.gmra.mrb[52].mxu1 %v1062_v13  ;;  %4134 = vmatprep.subr.bf16.mxu1 %v4925_v39 }
 0x224   : > { %4144 = vmatprep.mubr.msk.bf16.mxu1 %vm4926_vm0, %v4925_v39 }
 0x226   : > { %4135 = vmatpush3.bf16.msra.mxu1 %v4595_v15  ;;  %v4602_v15 = vld [vmem:[#allocation7 + $0xd0] sm:$0xff]  }
 0x227   : > { %4136 = vmatprep.subr.bf16.mxu1 %v4925_v39 }
 0x22a   : > { %4137 = vmatpush3.bf16.msra.mxu1 %v4596_v18  ;;  %v4603_v18 = vld [vmem:[#allocation7 + $0xd8] sm:$0xff]  }
 0x22b   : > { %4138 = vmatprep.subr.bf16.mxu1 %v4925_v39 }
 0x22e   : > { %4139 = vmatpush3.bf16.msra.mxu1 %v4597_v19  ;;  %v4604_v19 = vld [vmem:[#allocation7 + $0xe0] sm:$0xff]  }
 0x22f   : > { %4140 = vmatprep.subr.bf16.mxu1 %v4925_v39 }
 0x232   : > { %4141 = vmatpush3.bf16.msra.mxu1 %v4598_v23  ;;  %v4605_v23 = vld [vmem:[#allocation7 + $0xe8] sm:$0xff]  }
 0x233   : > { %4142 = vmatprep.subr.bf16.mxu1 %v4925_v39 }
 0x236   : > { %4143 = vmatpush3.bf16.msra.mxu1 %v4599_v5 }
 0x237   : > { %4216 = vmatprep.subr.bf16.mxu1 %v4925_v39 }
 0x2c6   : > { %v1161_v40 = vpop.f32.mrb[28].mxu1 }
 0x2c7   : > { %v4058_v27 = vpop.f32.mrb[29].mxu1 }
 0x2c8   : > { %v1164_v28 = vpop.f32.mrb[30].mxu1 }
 0x2c9   : > { %v1216_v29 = vpack.c.bf16 %v1164_v28, %v1161_v40  ;;  %v4059_v30 = vpop.f32.mrb[31].mxu1  ;;  %v1408_v40 = vpack.i.b16 %v1406_v26, %v1406_v26  ;;  %v1581_v26 = vld [vmem:[#allocation10 + $0x3] sm:$0x1] }
 0x2cb   : > { %v1231_v31 = vadd.bf16 %v1230_v42, %v1216_v29  ;;  %v1413_v28 = vrot.slane %v1408_v40, %v5334_v9  ;;  %v1589_v40 = vpack.c.bf16 %v1581_v26, %v1581_v26  ;;  %v4622_v26 = vld [vmem:[#allocation7 + $0x170] sm:$0xff]  }
 0x2cd   : > { %v1238_v32 = vmax.bf16 %v4927_v22, %v1231_v31 }
 0x2ce   : > { %v1169_v33 = vpop.f32.mrb[32].mxu1 }
 0x2cf   : > { %v4062_v56 = vpop.f32.mrb[33].mxu1  ;;  %4101 = vmatmul.mubr.bf16.vlgmr.msra.gmra.mrb[56].mxu0 %v1238_v32 }
 0x2d0   : > { %v1172_v36 = vpop.f32.mrb[34].mxu1  ;;  %4104 = vmatprep.mubr.msk.bf16.mxu0 %vm4926_vm0, %v4925_v39  ;;  %4173 = vmatpush3.bf16.msra.mxu0 %v4600_v16  ;;  %v4607_v16 = vld [vmem:[#allocation7 + $0xf8] sm:$0xff]  }
 0x2d1   : > { %v1217_v57 = vpack.c.bf16 %v1172_v36, %v1169_v33  ;;  %v4063_v37 = vpop.f32.mrb[35].mxu1  ;;  %4174 = vmatprep.subr.bf16.mxu0 %v4925_v39 }
 0x2d3   : > { %v1232_v38 = vadd.bf16 %v1230_v42, %v1217_v57 }
 0x2d4   : > { %4175 = vmatpush3.bf16.msra.mxu0 %v4601_v17  ;;  %v4608_v17 = vld [vmem:[#allocation7 + $0x100] sm:$0xff]  }
 0x2d5   : > { %v1239_v41 = vmax.bf16 %v4927_v22, %v1232_v38  ;;  %4176 = vmatprep.subr.bf16.mxu0 %v4925_v39 }
 0x2d6   : > { %v1177_v43 = vpop.f32.mrb[36].mxu1 }
 0x2d7   : > { %v4066_v6 = vpop.f32.mrb[37].mxu1  ;;  %4105 = vmatmul.mubr.bf16.gmra.mrb[60].mxu0 %v1239_v41 }
 0x2d8   : > { %v1180_v44 = vpop.f32.mrb[38].mxu1  ;;  %4108 = vmatprep.mubr.msk.bf16.mxu0 %vm4926_vm0, %v4925_v39  ;;  %4177 = vmatpush3.bf16.msra.mxu0 %v4602_v15  ;;  %v4609_v15 = vld [vmem:[#allocation7 + $0x108] sm:$0xff]  }
 0x2d9   : > { %v1218_v45 = vpack.c.bf16 %v1180_v44, %v1177_v43  ;;  %v4067_v46 = vpop.f32.mrb[39].mxu1  ;;  %4178 = vmatprep.subr.bf16.mxu0 %v4925_v39 }
 0x2db   : > { %v1233_v7 = vadd.bf16 %v1230_v42, %v1218_v45 }
 0x2dc   : > { %4179 = vmatpush3.bf16.msra.mxu0 %v4603_v18  ;;  %v4610_v18 = vld [vmem:[#allocation7 + $0x110] sm:$0xff]  }
 0x2dd   : > { %v1240_v47 = vmax.bf16 %v4927_v22, %v1233_v7  ;;  %4180 = vmatprep.subr.bf16.mxu0 %v4925_v39 }
 0x2de   : > { %v1185_v48 = vpop.f32.mrb[40].mxu1 }
 0x2df   : > { %v4070_v49 = vpop.f32.mrb[41].mxu1  ;;  %4109 = vmatmul.mubr.bf16.gmra.mrb[64].mxu0 %v1240_v47 }
 0x2e0   : > { %v1188_v50 = vpop.f32.mrb[42].mxu1  ;;  %4112 = vmatprep.mubr.msk.bf16.mxu0 %vm4926_vm0, %v4925_v39  ;;  %4181 = vmatpush3.bf16.msra.mxu0 %v4604_v19  ;;  %v4611_v19 = vld [vmem:[#allocation7 + $0x118] sm:$0xff]  }
 0x2e1   : > { %v1219_v20 = vpack.c.bf16 %v1188_v50, %v1185_v48  ;;  %v4071_v52 = vpop.f32.mrb[43].mxu1  ;;  %4182 = vmatprep.subr.bf16.mxu0 %v4925_v39 }
 0x2e3   : > { %v1234_v54 = vadd.bf16 %v1230_v42, %v1219_v20 }
 0x2e4   : > { %4183 = vmatpush3.bf16.msra.mxu0 %v4605_v23  ;;  %v4612_v23 = vld [vmem:[#allocation7 + $0x120] sm:$0xff]  }
 0x2e5   : > { %v1241_v55 = vmax.bf16 %v4927_v22, %v1234_v54  ;;  %4184 = vmatprep.subr.bf16.mxu0 %v4925_v39 }
 0x2e6   : > { %v1193_v21 = vpop.f32.mrb[44].mxu1 }
 0x2e7   : > { %v4074_v58 = vpop.f32.mrb[45].mxu1  ;;  %4113 = vmatmul.mubr.bf16.gmra.mrb[68].mxu0 %v1241_v55 }
 0x2e8   : > { %v1196_v59 = vpop.f32.mrb[46].mxu1  ;;  %4116 = vmatprep.mubr.msk.bf16.mxu0 %vm4926_vm0, %v4925_v39  ;;  %4185 = vmatpush3.bf16.msra.mxu0 %v4606_v24  ;;  %v4613_v24 = vld [vmem:[#allocation7 + $0x128] sm:$0xff]  }
 0x2e9   : > { %v1220_v60 = vpack.c.bf16 %v1196_v59, %v1193_v21  ;;  %v4075_v61 = vpop.f32.mrb[47].mxu1  ;;  %4186 = vmatprep.subr.bf16.mxu0 %v4925_v39 }
 0x2eb   : > { %v1235_v34 = vadd.bf16 %v1230_v42, %v1220_v60 }
 0x2ec   : > { %4187 = vmatpush3.bf16.msra.mxu0 %v4607_v16 }
 0x2ed   : > { %v1242_v62 = vmax.bf16 %v4927_v22, %v1235_v34  ;;  %4260 = vmatprep.subr.bf16.mxu0 %v4925_v39 }
 0x2ee   : > { %v1201_v63 = vpop.f32.mrb[48].mxu1 }
 0x2ef   : > { %v4078_v0 = vpop.f32.mrb[49].mxu1  ;;  %4117 = vmatmul.mubr.bf16.gmra.mrb[72].mxu0 %v1242_v62 }
 0x2f0   : > { %v1204_v35 = vpop.f32.mrb[50].mxu1  ;;  %4120 = vmatprep.mubr.msk.bf16.mxu0 %vm4926_vm0, %v4925_v39 }
 0x2f1   : > { %v1221_v1 = vpack.c.bf16 %v1204_v35, %v1201_v63  ;;  %v4079_v3 = vpop.f32.mrb[51].mxu1 }
 0x2f3   : > { %v1236_v4 = vadd.bf16 %v1230_v42, %v1221_v1 }
 0x2f5   : > { %v1243_v8 = vmax.bf16 %v4927_v22, %v1236_v4 }
 0x2f6   : > { %v1209_v51 = vpop.f32.mrb[52].mxu1 }
 0x2f7   : > { %v1222_v10 = vpack.c.bf16 %v1209_v51, %v1209_v51  ;;  %v4082_v11 = vpop.f32.mrb[53].mxu1  ;;  %4121 = vmatmul.mubr.bf16.gmra.mrb[76].mxu0 %v1243_v8 }
 0x2f8   : > { %v1212_v12 = vpop.f32.mrb[54].mxu1  ;;  %4124 = vmatprep.mubr.msk.bf16.mxu0 %vm4926_vm0, %v4925_v39 }
 0x2f9   : > { %v1237_v53 = vadd.bf16 %v1230_v42, %v1222_v10  ;;  %v4083_v13 = vpop.f32.mrb[55].mxu1 }
 0x2fb   : > { %v1244_v14 = vmax.bf16 %v4927_v22, %v1237_v53 }
 0x2ff   : > { %4125 = vmatmul.mubr.bf16.gmra.mrb[80].mxu0 %v1244_v14 }
 0x300   : > { %4188 = vmatprep.mubr.msk.bf16.mxu0 %vm4926_vm0, %v4925_v39 }
 0x3a2   : > { %v1344_v27 = vpop.f32.mrb[56].mxu0 }
 0x3a3   : > { %v4102_v42 = vpop.f32.mrb[57].mxu0 }
 0x3a4   : > { %v1347_v29 = vpop.f32.mrb[58].mxu0 }
 0x3a5   : > { %v1399_v30 = vpack.c.bf16 %v1347_v29, %v1344_v27  ;;  %v4103_v31 = vpop.f32.mrb[59].mxu0  ;;  %v1591_v27 = vpack.i.b16 %v1589_v40, %v1589_v40  ;;  %v1764_v40 = vld [vmem:[#allocation10 + $0x4] sm:$0x1] }
 0x3a7   : > { %v1414_v32 = vadd.bf16 %v1413_v28, %v1399_v30  ;;  %v1596_v29 = vrot.slane %v1591_v27, %v5334_v9  ;;  %v1772_v27 = vpack.c.bf16 %v1764_v40, %v1764_v40  ;;  %v4630_v40 = vld [vmem:[#allocation7 + $0x1b0] sm:$0xff]  }
 0x3a9   : > { %v1421_v33 = vmax.bf16 %v4927_v22, %v1414_v32 }
 0x3aa   : > { %v1352_v56 = vpop.f32.mrb[60].mxu0 }
 0x3ab   : > { %v4106_v36 = vpop.f32.mrb[61].mxu0  ;;  %4145 = vmatmul.mubr.bf16.vlgmr.msra.gmra.mrb[56].mxu1 %v1421_v33 }
 0x3ac   : > { %v1355_v57 = vpop.f32.mrb[62].mxu0  ;;  %4148 = vmatprep.mubr.msk.bf16.mxu1 %vm4926_vm0, %v4925_v39  ;;  %4217 = vmatpush3.bf16.msra.mxu1 %v4608_v17  ;;  %v4615_v17 = vld [vmem:[#allocation7 + $0x138] sm:$0xff]  }
 0x3ad   : > { %v1400_v37 = vpack.c.bf16 %v1355_v57, %v1352_v56  ;;  %v4107_v38 = vpop.f32.mrb[63].mxu0  ;;  %4218 = vmatprep.subr.bf16.mxu1 %v4925_v39 }
 0x3af   : > { %v1415_v41 = vadd.bf16 %v1413_v28, %v1400_v37 }
 0x3b0   : > { %4219 = vmatpush3.bf16.msra.mxu1 %v4609_v15  ;;  %v4616_v15 = vld [vmem:[#allocation7 + $0x140] sm:$0xff]  }
 0x3b1   : > { %v1422_v43 = vmax.bf16 %v4927_v22, %v1415_v41  ;;  %4220 = vmatprep.subr.bf16.mxu1 %v4925_v39 }
 0x3b2   : > { %v1360_v6 = vpop.f32.mrb[64].mxu0 }
 0x3b3   : > { %v4110_v44 = vpop.f32.mrb[65].mxu0  ;;  %4149 = vmatmul.mubr.bf16.gmra.mrb[60].mxu1 %v1422_v43 }
 0x3b4   : > { %v1363_v45 = vpop.f32.mrb[66].mxu0  ;;  %4152 = vmatprep.mubr.msk.bf16.mxu1 %vm4926_vm0, %v4925_v39  ;;  %4221 = vmatpush3.bf16.msra.mxu1 %v4610_v18  ;;  %v4617_v18 = vld [vmem:[#allocation7 + $0x148] sm:$0xff]  }
 0x3b5   : > { %v1401_v46 = vpack.c.bf16 %v1363_v45, %v1360_v6  ;;  %v4111_v7 = vpop.f32.mrb[67].mxu0  ;;  %4222 = vmatprep.subr.bf16.mxu1 %v4925_v39 }
 0x3b7   : > { %v1416_v47 = vadd.bf16 %v1413_v28, %v1401_v46 }
 0x3b8   : > { %4223 = vmatpush3.bf16.msra.mxu1 %v4611_v19  ;;  %v4618_v19 = vld [vmem:[#allocation7 + $0x150] sm:$0xff]  }
 0x3b9   : > { %v1423_v48 = vmax.bf16 %v4927_v22, %v1416_v47  ;;  %4224 = vmatprep.subr.bf16.mxu1 %v4925_v39 }
 0x3ba   : > { %v1368_v49 = vpop.f32.mrb[68].mxu0 }
 0x3bb   : > { %v4114_v50 = vpop.f32.mrb[69].mxu0  ;;  %4153 = vmatmul.mubr.bf16.gmra.mrb[64].mxu1 %v1423_v48 }
 0x3bc   : > { %v1371_v20 = vpop.f32.mrb[70].mxu0  ;;  %4156 = vmatprep.mubr.msk.bf16.mxu1 %vm4926_vm0, %v4925_v39  ;;  %4225 = vmatpush3.bf16.msra.mxu1 %v4612_v23  ;;  %v4619_v23 = vld [vmem:[#allocation7 + $0x158] sm:$0xff]  }
 0x3bd   : > { %v1402_v52 = vpack.c.bf16 %v1371_v20, %v1368_v49  ;;  %v4115_v54 = vpop.f32.mrb[71].mxu0  ;;  %4226 = vmatprep.subr.bf16.mxu1 %v4925_v39 }
 0x3bf   : > { %v1417_v55 = vadd.bf16 %v1413_v28, %v1402_v52 }
 0x3c0   : > { %4227 = vmatpush3.bf16.msra.mxu1 %v4613_v24  ;;  %v4620_v24 = vld [vmem:[#allocation7 + $0x160] sm:$0xff]  }
 0x3c1   : > { %v1424_v21 = vmax.bf16 %v4927_v22, %v1417_v55  ;;  %4228 = vmatprep.subr.bf16.mxu1 %v4925_v39 }
 0x3c2   : > { %v1376_v58 = vpop.f32.mrb[72].mxu0 }
 0x3c3   : > { %v4118_v59 = vpop.f32.mrb[73].mxu0  ;;  %4157 = vmatmul.mubr.bf16.gmra.mrb[68].mxu1 %v1424_v21 }
 0x3c4   : > { %v1379_v60 = vpop.f32.mrb[74].mxu0  ;;  %4160 = vmatprep.mubr.msk.bf16.mxu1 %vm4926_vm0, %v4925_v39  ;;  %4229 = vmatpush3.bf16.msra.mxu1 %v4614_v25  ;;  %v4621_v25 = vld [vmem:[#allocation7 + $0x168] sm:$0xff]  }
 0x3c5   : > { %v1403_v61 = vpack.c.bf16 %v1379_v60, %v1376_v58  ;;  %v4119_v34 = vpop.f32.mrb[75].mxu0  ;;  %4230 = vmatprep.subr.bf16.mxu1 %v4925_v39 }
 0x3c7   : > { %v1418_v62 = vadd.bf16 %v1413_v28, %v1403_v61 }
 0x3c8   : > { %4231 = vmatpush3.bf16.msra.mxu1 %v4615_v17 }
 0x3c9   : > { %v1425_v63 = vmax.bf16 %v4927_v22, %v1418_v62  ;;  %4304 = vmatprep.subr.bf16.mxu1 %v4925_v39 }
 0x3ca   : > { %v1384_v0 = vpop.f32.mrb[76].mxu0 }
 0x3cb   : > { %v4122_v35 = vpop.f32.mrb[77].mxu0  ;;  %4161 = vmatmul.mubr.bf16.gmra.mrb[72].mxu1 %v1425_v63 }
 0x3cc   : > { %v1387_v1 = vpop.f32.mrb[78].mxu0  ;;  %4164 = vmatprep.mubr.msk.bf16.mxu1 %vm4926_vm0, %v4925_v39 }
 0x3cd   : > { %v1404_v3 = vpack.c.bf16 %v1387_v1, %v1384_v0  ;;  %v4123_v4 = vpop.f32.mrb[79].mxu0 }
 0x3cf   : > { %v1419_v8 = vadd.bf16 %v1413_v28, %v1404_v3 }
 0x3d1   : > { %v1426_v51 = vmax.bf16 %v4927_v22, %v1419_v8 }
 0x3d2   : > { %v1392_v10 = vpop.f32.mrb[80].mxu0 }
 0x3d3   : > { %v1405_v11 = vpack.c.bf16 %v1392_v10, %v1392_v10  ;;  %v4126_v12 = vpop.f32.mrb[81].mxu0  ;;  %4165 = vmatmul.mubr.bf16.gmra.mrb[76].mxu1 %v1426_v51 }
 0x3d4   : > { %v1395_v53 = vpop.f32.mrb[82].mxu0  ;;  %4168 = vmatprep.mubr.msk.bf16.mxu1 %vm4926_vm0, %v4925_v39 }
 0x3d5   : > { %v1420_v13 = vadd.bf16 %v1413_v28, %v1405_v11  ;;  %v4127_v14 = vpop.f32.mrb[83].mxu0 }
 0x3d7   : > { %v1427_v5 = vmax.bf16 %v4927_v22, %v1420_v13 }
 0x3db   : > { %4169 = vmatmul.mubr.bf16.gmra.mrb[80].mxu1 %v1427_v5 }
 0x3dc   : > { %4232 = vmatprep.mubr.msk.bf16.mxu1 %vm4926_vm0, %v4925_v39 }
 0x47e   : > { %v1527_v42 = vpop.f32.mrb[56].mxu1 }
 0x47f   : > { %v4146_v28 = vpop.f32.mrb[57].mxu1 }
 0x480   : > { %v1530_v30 = vpop.f32.mrb[58].mxu1 }
 0x481   : > { %v1582_v31 = vpack.c.bf16 %v1530_v30, %v1527_v42  ;;  %v4147_v32 = vpop.f32.mrb[59].mxu1  ;;  %v1774_v42 = vpack.i.b16 %v1772_v27, %v1772_v27  ;;  %v1947_v27 = vld [vmem:[#allocation10 + $0x5] sm:$0x1] }
 0x483   : > { %v1597_v33 = vadd.bf16 %v1596_v29, %v1582_v31  ;;  %v1779_v30 = vrot.slane %v1774_v42, %v5334_v9  ;;  %v1955_v42 = vpack.c.bf16 %v1947_v27, %v1947_v27  ;;  %v4638_v27 = vld [vmem:[#allocation7 + $0x1f0] sm:$0xff]  }
 0x485   : > { %v1604_v56 = vmax.bf16 %v4927_v22, %v1597_v33 }
 0x486   : > { %v1535_v36 = vpop.f32.mrb[60].mxu1 }
 0x487   : > { %v4150_v57 = vpop.f32.mrb[61].mxu1  ;;  %4189 = vmatmul.mubr.bf16.vlgmr.msra.gmra.mrb[84].mxu0 %v1604_v56 }
 0x488   : > { %v1538_v37 = vpop.f32.mrb[62].mxu1  ;;  %4192 = vmatprep.mubr.msk.bf16.mxu0 %vm4926_vm0, %v4925_v39  ;;  %4261 = vmatpush3.bf16.msra.mxu0 %v4616_v15  ;;  %v4623_v15 = vld [vmem:[#allocation7 + $0x178] sm:$0xff]  }
 0x489   : > { %v1583_v38 = vpack.c.bf16 %v1538_v37, %v1535_v36  ;;  %v4151_v41 = vpop.f32.mrb[63].mxu1  ;;  %4262 = vmatprep.subr.bf16.mxu0 %v4925_v39 }
 0x48b   : > { %v1598_v43 = vadd.bf16 %v1596_v29, %v1583_v38 }
 0x48c   : > { %4263 = vmatpush3.bf16.msra.mxu0 %v4617_v18  ;;  %v4624_v18 = vld [vmem:[#allocation7 + $0x180] sm:$0xff]  }
 0x48d   : > { %v1605_v6 = vmax.bf16 %v4927_v22, %v1598_v43  ;;  %4264 = vmatprep.subr.bf16.mxu0 %v4925_v39 }
 0x48e   : > { %v1543_v44 = vpop.f32.mrb[64].mxu1 }
 0x48f   : > { %v4154_v45 = vpop.f32.mrb[65].mxu1  ;;  %4193 = vmatmul.mubr.bf16.gmra.mrb[88].mxu0 %v1605_v6 }
 0x490   : > { %v1546_v46 = vpop.f32.mrb[66].mxu1  ;;  %4196 = vmatprep.mubr.msk.bf16.mxu0 %vm4926_vm0, %v4925_v39  ;;  %4265 = vmatpush3.bf16.msra.mxu0 %v4618_v19  ;;  %v4625_v19 = vld [vmem:[#allocation7 + $0x188] sm:$0xff]  }
 0x491   : > { %v1584_v7 = vpack.c.bf16 %v1546_v46, %v1543_v44  ;;  %v4155_v47 = vpop.f32.mrb[67].mxu1  ;;  %4266 = vmatprep.subr.bf16.mxu0 %v4925_v39 }
 0x493   : > { %v1599_v48 = vadd.bf16 %v1596_v29, %v1584_v7 }
 0x494   : > { %4267 = vmatpush3.bf16.msra.mxu0 %v4619_v23  ;;  %v4626_v23 = vld [vmem:[#allocation7 + $0x190] sm:$0xff]  }
 0x495   : > { %v1606_v49 = vmax.bf16 %v4927_v22, %v1599_v48  ;;  %4268 = vmatprep.subr.bf16.mxu0 %v4925_v39 }
 0x496   : > { %v1551_v50 = vpop.f32.mrb[68].mxu1 }
 0x497   : > { %v4158_v20 = vpop.f32.mrb[69].mxu1  ;;  %4197 = vmatmul.mubr.bf16.gmra.mrb[92].mxu0 %v1606_v49 }
 0x498   : > { %v1554_v52 = vpop.f32.mrb[70].mxu1  ;;  %4200 = vmatprep.mubr.msk.bf16.mxu0 %vm4926_vm0, %v4925_v39  ;;  %4269 = vmatpush3.bf16.msra.mxu0 %v4620_v24  ;;  %v4627_v24 = vld [vmem:[#allocation7 + $0x198] sm:$0xff]  }
 0x499   : > { %v1585_v54 = vpack.c.bf16 %v1554_v52, %v1551_v50  ;;  %v4159_v55 = vpop.f32.mrb[71].mxu1  ;;  %4270 = vmatprep.subr.bf16.mxu0 %v4925_v39 }
 0x49b   : > { %v1600_v21 = vadd.bf16 %v1596_v29, %v1585_v54 }
 0x49c   : > { %4271 = vmatpush3.bf16.msra.mxu0 %v4621_v25  ;;  %v4628_v25 = vld [vmem:[#allocation7 + $0x1a0] sm:$0xff]  }
 0x49d   : > { %v1607_v58 = vmax.bf16 %v4927_v22, %v1600_v21  ;;  %4272 = vmatprep.subr.bf16.mxu0 %v4925_v39 }
 0x49e   : > { %v1559_v59 = vpop.f32.mrb[72].mxu1 }
 0x49f   : > { %v4162_v60 = vpop.f32.mrb[73].mxu1  ;;  %4201 = vmatmul.mubr.bf16.gmra.mrb[96].mxu0 %v1607_v58 }
 0x4a0   : > { %v1562_v61 = vpop.f32.mrb[74].mxu1  ;;  %4204 = vmatprep.mubr.msk.bf16.mxu0 %vm4926_vm0, %v4925_v39  ;;  %4273 = vmatpush3.bf16.msra.mxu0 %v4622_v26  ;;  %v4629_v26 = vld [vmem:[#allocation7 + $0x1a8] sm:$0xff]  }
 0x4a1   : > { %v1586_v34 = vpack.c.bf16 %v1562_v61, %v1559_v59  ;;  %v4163_v62 = vpop.f32.mrb[75].mxu1  ;;  %4274 = vmatprep.subr.bf16.mxu0 %v4925_v39 }
 0x4a3   : > { %v1601_v63 = vadd.bf16 %v1596_v29, %v1586_v34 }
 0x4a4   : > { %4275 = vmatpush3.bf16.msra.mxu0 %v4623_v15 }
 0x4a5   : > { %v1608_v0 = vmax.bf16 %v4927_v22, %v1601_v63  ;;  %4348 = vmatprep.subr.bf16.mxu0 %v4925_v39 }
 0x4a6   : > { %v1567_v35 = vpop.f32.mrb[76].mxu1 }
 0x4a7   : > { %v4166_v1 = vpop.f32.mrb[77].mxu1  ;;  %4205 = vmatmul.mubr.bf16.gmra.mrb[100].mxu0 %v1608_v0 }
 0x4a8   : > { %v1570_v3 = vpop.f32.mrb[78].mxu1  ;;  %4208 = vmatprep.mubr.msk.bf16.mxu0 %vm4926_vm0, %v4925_v39 }
 0x4a9   : > { %v1587_v4 = vpack.c.bf16 %v1570_v3, %v1567_v35  ;;  %v4167_v8 = vpop.f32.mrb[79].mxu1 }
 0x4ab   : > { %v1602_v51 = vadd.bf16 %v1596_v29, %v1587_v4 }
 0x4ad   : > { %v1609_v10 = vmax.bf16 %v4927_v22, %v1602_v51 }
 0x4ae   : > { %v1575_v11 = vpop.f32.mrb[80].mxu1 }
 0x4af   : > { %v1588_v12 = vpack.c.bf16 %v1575_v11, %v1575_v11  ;;  %v4170_v53 = vpop.f32.mrb[81].mxu1  ;;  %4209 = vmatmul.mubr.bf16.gmra.mrb[104].mxu0 %v1609_v10 }
 0x4b0   : > { %v1578_v13 = vpop.f32.mrb[82].mxu1  ;;  %4212 = vmatprep.mubr.msk.bf16.mxu0 %vm4926_vm0, %v4925_v39 }
 0x4b1   : > { %v1603_v14 = vadd.bf16 %v1596_v29, %v1588_v12  ;;  %v4171_v5 = vpop.f32.mrb[83].mxu1 }
 0x4b3   : > { %v1610_v16 = vmax.bf16 %v4927_v22, %v1603_v14 }
 0x4b7   : > { %4213 = vmatmul.mubr.bf16.gmra.mrb[108].mxu0 %v1610_v16 }
 0x4b8   : > { %4276 = vmatprep.mubr.msk.bf16.mxu0 %vm4926_vm0, %v4925_v39 }
 0x55a   : > { %v1710_v28 = vpop.f32.mrb[84].mxu0 }
 0x55b   : > { %v4190_v29 = vpop.f32.mrb[85].mxu0 }
 0x55c   : > { %v1713_v31 = vpop.f32.mrb[86].mxu0 }
 0x55d   : > { %v1765_v32 = vpack.c.bf16 %v1713_v31, %v1710_v28  ;;  %v4191_v33 = vpop.f32.mrb[87].mxu0  ;;  %v1957_v28 = vpack.i.b16 %v1955_v42, %v1955_v42  ;;  %v2130_v42 = vld [vmem:[#allocation10 + $0x6] sm:$0x1] }
 0x55f   : > { %v1780_v56 = vadd.bf16 %v1779_v30, %v1765_v32  ;;  %v1962_v31 = vrot.slane %v1957_v28, %v5334_v9  ;;  %v2138_v28 = vpack.c.bf16 %v2130_v42, %v2130_v42  ;;  %v4646_v42 = vld [vmem:[#allocation8 + $0x50] ss:$20 sps:$4 sm:$0xff]  }
 0x561   : > { %v1787_v36 = vmax.bf16 %v4927_v22, %v1780_v56 }
 0x562   : > { %v1718_v57 = vpop.f32.mrb[88].mxu0 }
 0x563   : > { %v4194_v37 = vpop.f32.mrb[89].mxu0  ;;  %4233 = vmatmul.mubr.bf16.vlgmr.msra.gmra.mrb[84].mxu1 %v1787_v36 }
 0x564   : > { %v1721_v38 = vpop.f32.mrb[90].mxu0  ;;  %4236 = vmatprep.mubr.msk.bf16.mxu1 %vm4926_vm0, %v4925_v39  ;;  %4305 = vmatpush3.bf16.msra.mxu1 %v4624_v18  ;;  %v4631_v18 = vld [vmem:[#allocation7 + $0x1b8] sm:$0xff]  }
 0x565   : > { %v1766_v41 = vpack.c.bf16 %v1721_v38, %v1718_v57  ;;  %v4195_v43 = vpop.f32.mrb[91].mxu0  ;;  %4306 = vmatprep.subr.bf16.mxu1 %v4925_v39 }
 0x567   : > { %v1781_v6 = vadd.bf16 %v1779_v30, %v1766_v41 }
 0x568   : > { %4307 = vmatpush3.bf16.msra.mxu1 %v4625_v19  ;;  %v4632_v19 = vld [vmem:[#allocation7 + $0x1c0] sm:$0xff]  }
 0x569   : > { %v1788_v44 = vmax.bf16 %v4927_v22, %v1781_v6  ;;  %4308 = vmatprep.subr.bf16.mxu1 %v4925_v39 }
 0x56a   : > { %v1726_v45 = vpop.f32.mrb[92].mxu0 }
 0x56b   : > { %v4198_v46 = vpop.f32.mrb[93].mxu0  ;;  %4237 = vmatmul.mubr.bf16.gmra.mrb[88].mxu1 %v1788_v44 }
 0x56c   : > { %v1729_v7 = vpop.f32.mrb[94].mxu0  ;;  %4240 = vmatprep.mubr.msk.bf16.mxu1 %vm4926_vm0, %v4925_v39  ;;  %4309 = vmatpush3.bf16.msra.mxu1 %v4626_v23  ;;  %v4633_v23 = vld [vmem:[#allocation7 + $0x1c8] sm:$0xff]  }
 0x56d   : > { %v1767_v47 = vpack.c.bf16 %v1729_v7, %v1726_v45  ;;  %v4199_v48 = vpop.f32.mrb[95].mxu0  ;;  %4310 = vmatprep.subr.bf16.mxu1 %v4925_v39 }
 0x56f   : > { %v1782_v49 = vadd.bf16 %v1779_v30, %v1767_v47 }
 0x570   : > { %4311 = vmatpush3.bf16.msra.mxu1 %v4627_v24  ;;  %v4634_v24 = vld [vmem:[#allocation7 + $0x1d0] sm:$0xff]  }
 0x571   : > { %v1789_v50 = vmax.bf16 %v4927_v22, %v1782_v49  ;;  %4312 = vmatprep.subr.bf16.mxu1 %v4925_v39 }
 0x572   : > { %v1734_v20 = vpop.f32.mrb[96].mxu0 }
 0x573   : > { %v4202_v52 = vpop.f32.mrb[97].mxu0  ;;  %4241 = vmatmul.mubr.bf16.gmra.mrb[92].mxu1 %v1789_v50 }
 0x574   : > { %v1737_v54 = vpop.f32.mrb[98].mxu0  ;;  %4244 = vmatprep.mubr.msk.bf16.mxu1 %vm4926_vm0, %v4925_v39  ;;  %4313 = vmatpush3.bf16.msra.mxu1 %v4628_v25  ;;  %v4635_v25 = vld [vmem:[#allocation7 + $0x1d8] sm:$0xff]  }
 0x575   : > { %v1768_v55 = vpack.c.bf16 %v1737_v54, %v1734_v20  ;;  %v4203_v21 = vpop.f32.mrb[99].mxu0  ;;  %4314 = vmatprep.subr.bf16.mxu1 %v4925_v39 }
 0x577   : > { %v1783_v58 = vadd.bf16 %v1779_v30, %v1768_v55 }
 0x578   : > { %4315 = vmatpush3.bf16.msra.mxu1 %v4629_v26  ;;  %v4636_v26 = vld [vmem:[#allocation7 + $0x1e0] sm:$0xff]  }
 0x579   : > { %v1790_v59 = vmax.bf16 %v4927_v22, %v1783_v58  ;;  %4316 = vmatprep.subr.bf16.mxu1 %v4925_v39 }
 0x57a   : > { %v1742_v60 = vpop.f32.mrb[100].mxu0 }
 0x57b   : > { %v4206_v61 = vpop.f32.mrb[101].mxu0  ;;  %4245 = vmatmul.mubr.bf16.gmra.mrb[96].mxu1 %v1790_v59 }
 0x57c   : > { %v1745_v34 = vpop.f32.mrb[102].mxu0  ;;  %4248 = vmatprep.mubr.msk.bf16.mxu1 %vm4926_vm0, %v4925_v39  ;;  %4317 = vmatpush3.bf16.msra.mxu1 %v4630_v40  ;;  %v4637_v40 = vld [vmem:[#allocation7 + $0x1e8] sm:$0xff]  }
 0x57d   : > { %v1769_v62 = vpack.c.bf16 %v1745_v34, %v1742_v60  ;;  %v4207_v63 = vpop.f32.mrb[103].mxu0  ;;  %4318 = vmatprep.subr.bf16.mxu1 %v4925_v39 }
 0x57f   : > { %v1784_v0 = vadd.bf16 %v1779_v30, %v1769_v62 }
 0x580   : > { %4319 = vmatpush3.bf16.msra.mxu1 %v4631_v18 }
 0x581   : > { %v1791_v35 = vmax.bf16 %v4927_v22, %v1784_v0 }
 0x582   : > { %v1750_v1 = vpop.f32.mrb[104].mxu0 }
 0x583   : > { %v4210_v3 = vpop.f32.mrb[105].mxu0  ;;  %4249 = vmatmul.mubr.bf16.gmra.mrb[100].mxu1 %v1791_v35 }
 0x584   : > { %v1753_v4 = vpop.f32.mrb[106].mxu0  ;;  %4252 = vmatprep.mubr.msk.bf16.mxu1 %vm4926_vm0, %v4925_v39 }
 0x585   : > { %v1770_v8 = vpack.c.bf16 %v1753_v4, %v1750_v1  ;;  %v4211_v51 = vpop.f32.mrb[107].mxu0 }
 0x587   : > { %v1785_v10 = vadd.bf16 %v1779_v30, %v1770_v8 }
 0x589   : > { %v1792_v11 = vmax.bf16 %v4927_v22, %v1785_v10 }
 0x58a   : > { %v1758_v12 = vpop.f32.mrb[108].mxu0 }
 0x58b   : > { %v1771_v53 = vpack.c.bf16 %v1758_v12, %v1758_v12  ;;  %v4214_v13 = vpop.f32.mrb[109].mxu0  ;;  %4253 = vmatmul.mubr.bf16.gmra.mrb[104].mxu1 %v1792_v11 }
 0x58c   : > { %v1761_v14 = vpop.f32.mrb[110].mxu0  ;;  %4256 = vmatprep.mubr.msk.bf16.mxu1 %vm4926_vm0, %v4925_v39 }
 0x58d   : > { %v1786_v5 = vadd.bf16 %v1779_v30, %v1771_v53  ;;  %v4215_v16 = vpop.f32.mrb[111].mxu0 }
 0x58f   : > { %v1793_v17 = vmax.bf16 %v4927_v22, %v1786_v5 }
 0x593   : > { %4257 = vmatmul.mubr.bf16.gmra.mrb[108].mxu1 %v1793_v17 }
 0x594   : > { %4320 = vmatprep.mubr.msk.bf16.mxu1 %vm4926_vm0, %v4925_v39 }
 0x636   : > { %v1893_v29 = vpop.f32.mrb[84].mxu1 }
 0x637   : > { %v4234_v30 = vpop.f32.mrb[85].mxu1 }
 0x638   : > { %v1896_v32 = vpop.f32.mrb[86].mxu1 }
 0x639   : > { %v1948_v33 = vpack.c.bf16 %v1896_v32, %v1893_v29  ;;  %v4235_v56 = vpop.f32.mrb[87].mxu1  ;;  %v2140_v29 = vpack.i.b16 %v2138_v28, %v2138_v28  ;;  %v4651_v28 = vld [vmem:[#allocation8 + $0x7c] ss:$20 sps:$4 sm:$0xff]  }
 0x63b   : > { %v1963_v36 = vadd.bf16 %v1962_v31, %v1948_v33  ;;  %v2145_v32 = vrot.slane %v2140_v29, %v5334_v9  ;;  %v4649_v29 = vld [vmem:[#allocation8 + $0x78] ss:$20 sps:$4 sm:$0xff]  }
 0x63d   : > { %v1970_v57 = vmax.bf16 %v4927_v22, %v1963_v36 }
 0x63e   : > { %v1901_v37 = vpop.f32.mrb[88].mxu1 }
 0x63f   : > { %v4238_v38 = vpop.f32.mrb[89].mxu1  ;;  %4277 = vmatmul.mubr.bf16.vlgmr.msra.gmra.mrb[112].mxu0 %v1970_v57 }
 0x640   : > { %v1904_v41 = vpop.f32.mrb[90].mxu1  ;;  %4280 = vmatprep.mubr.msk.bf16.mxu0 %vm4926_vm0, %v4925_v39  ;;  %4349 = vmatpush3.bf16.msra.mxu0 %v4632_v19  ;;  %v4639_v19 = vld [vmem:[#allocation7 + $0x1f8] sm:$0xff]  }
 0x641   : > { %v1949_v43 = vpack.c.bf16 %v1904_v41, %v1901_v37  ;;  %v4239_v6 = vpop.f32.mrb[91].mxu1  ;;  %4350 = vmatprep.subr.bf16.mxu0 %v4925_v39 }
 0x643   : > { %v1964_v44 = vadd.bf16 %v1962_v31, %v1949_v43 }
 0x644   : > { %4351 = vmatpush3.bf16.msra.mxu0 %v4633_v23  ;;  %v4640_v23 = vld [vmem:[#allocation8] ss:$20 sps:$4 sm:$0xff]  }
 0x645   : > { %v1971_v45 = vmax.bf16 %v4927_v22, %v1964_v44  ;;  %4352 = vmatprep.subr.bf16.mxu0 %v4925_v39 }
 0x646   : > { %v1909_v46 = vpop.f32.mrb[92].mxu1 }
 0x647   : > { %v4242_v7 = vpop.f32.mrb[93].mxu1  ;;  %4281 = vmatmul.mubr.bf16.gmra.mrb[116].mxu0 %v1971_v45 }
 0x648   : > { %v1912_v47 = vpop.f32.mrb[94].mxu1  ;;  %4284 = vmatprep.mubr.msk.bf16.mxu0 %vm4926_vm0, %v4925_v39  ;;  %4353 = vmatpush3.bf16.msra.mxu0 %v4634_v24  ;;  %v4642_v24 = vld [vmem:[#allocation8 + $0x4] ss:$20 sps:$4 sm:$0xff]  }
 0x649   : > { %v1950_v48 = vpack.c.bf16 %v1912_v47, %v1909_v46  ;;  %v4243_v49 = vpop.f32.mrb[95].mxu1  ;;  %4354 = vmatprep.subr.bf16.mxu0 %v4925_v39  ;;  %2809 = vmatprep.subr.bf16.mxu1 %v4642_v24 }
 0x64b   : > { %v1965_v50 = vadd.bf16 %v1962_v31, %v1950_v48 }
 0x64c   : > { %4355 = vmatpush3.bf16.msra.mxu0 %v4635_v25  ;;  %v4645_v25 = vld [vmem:[#allocation8 + $0x2c] ss:$20 sps:$4 sm:$0xff]  }
 0x64d   : > { %v1972_v20 = vmax.bf16 %v4927_v22, %v1965_v50  ;;  %4356 = vmatprep.subr.bf16.mxu0 %v4925_v39 }
 0x64e   : > { %v1917_v52 = vpop.f32.mrb[96].mxu1 }
 0x64f   : > { %v4246_v54 = vpop.f32.mrb[97].mxu1  ;;  %4285 = vmatmul.mubr.bf16.gmra.mrb[120].mxu0 %v1972_v20 }
 0x650   : > { %v1920_v55 = vpop.f32.mrb[98].mxu1  ;;  %4288 = vmatprep.mubr.msk.bf16.mxu0 %vm4926_vm0, %v4925_v39  ;;  %4357 = vmatpush3.bf16.msra.mxu0 %v4636_v26  ;;  %v4643_v26 = vld [vmem:[#allocation8 + $0x28] ss:$20 sps:$4 sm:$0xff]  }
 0x651   : > { %v1951_v21 = vpack.c.bf16 %v1920_v55, %v1917_v52  ;;  %v4247_v58 = vpop.f32.mrb[99].mxu1  ;;  %4358 = vmatprep.subr.bf16.mxu0 %v4925_v39 }
 0x653   : > { %v1966_v59 = vadd.bf16 %v1962_v31, %v1951_v21 }
 0x654   : > { %4359 = vmatpush3.bf16.msra.mxu0 %v4637_v40  ;;  %v4654_v40 = vld [vmem:[#allocation8 + $0xc] ss:$20 sps:$4 sm:$0xff]  }
 0x655   : > { %v1973_v60 = vmax.bf16 %v4927_v22, %v1966_v59  ;;  %4360 = vmatprep.subr.bf16.mxu0 %v4925_v39 }
 0x656   : > { %v1925_v61 = vpop.f32.mrb[100].mxu1 }
 0x657   : > { %v4250_v34 = vpop.f32.mrb[101].mxu1  ;;  %4289 = vmatmul.mubr.bf16.gmra.mrb[124].mxu0 %v1973_v60 }
 0x658   : > { %v1928_v62 = vpop.f32.mrb[102].mxu1  ;;  %4292 = vmatprep.mubr.msk.bf16.mxu0 %vm4926_vm0, %v4925_v39  ;;  %4361 = vmatpush3.bf16.msra.mxu0 %v4638_v27  ;;  %v4648_v27 = vld [vmem:[#allocation8 + $0x54] ss:$20 sps:$4 sm:$0xff]  }
 0x659   : > { %v1952_v63 = vpack.c.bf16 %v1928_v62, %v1925_v61  ;;  %v4251_v0 = vpop.f32.mrb[103].mxu1  ;;  %4362 = vmatprep.subr.bf16.mxu0 %v4925_v39 }
 0x65b   : > { %v1967_v35 = vadd.bf16 %v1962_v31, %v1952_v63 }
 0x65c   : > { %4363 = vmatpush3.bf16.msra.mxu0 %v4639_v19 }
 0x65d   : > { %v1974_v1 = vmax.bf16 %v4927_v22, %v1967_v35  ;;  %2910 = vmatprep.subr.bf16.mxu0 %v4654_v40 }
 0x65e   : > { %v1933_v3 = vpop.f32.mrb[104].mxu1 }
 0x65f   : > { %v4254_v4 = vpop.f32.mrb[105].mxu1  ;;  %4293 = vmatmul.mubr.bf16.gmra.mrb[128].mxu0 %v1974_v1 }
 0x660   : > { %v1936_v8 = vpop.f32.mrb[106].mxu1  ;;  %4296 = vmatprep.mubr.msk.bf16.mxu0 %vm4926_vm0, %v4925_v39 }
 0x661   : > { %v1953_v51 = vpack.c.bf16 %v1936_v8, %v1933_v3  ;;  %v4255_v10 = vpop.f32.mrb[107].mxu1 }
 0x663   : > { %v1968_v11 = vadd.bf16 %v1962_v31, %v1953_v51 }
 0x665   : > { %v1975_v12 = vmax.bf16 %v4927_v22, %v1968_v11 }
 0x666   : > { %v1941_v53 = vpop.f32.mrb[108].mxu1 }
 0x667   : > { %v1954_v13 = vpack.c.bf16 %v1941_v53, %v1941_v53  ;;  %v4258_v14 = vpop.f32.mrb[109].mxu1  ;;  %4297 = vmatmul.mubr.bf16.gmra.mrb[132].mxu0 %v1975_v12 }
 0x668   : > { %v1944_v5 = vpop.f32.mrb[110].mxu1  ;;  %4300 = vmatprep.mubr.msk.bf16.mxu0 %vm4926_vm0, %v4925_v39 }
 0x669   : > { %v1969_v16 = vadd.bf16 %v1962_v31, %v1954_v13  ;;  %v4259_v17 = vpop.f32.mrb[111].mxu1 }
 0x66b   : > { %v1976_v15 = vmax.bf16 %v4927_v22, %v1969_v16 }
 0x66f   : > { %4301 = vmatmul.mubr.bf16.gmra.mrb[136].mxu0 %v1976_v15 }
 0x670   : > { %4364 = vmatprep.mubr.msk.bf16.mxu0 %vm4926_vm0, %v4925_v39 }
 0x712   : > { %v2076_v30 = vpop.f32.mrb[112].mxu0 }
 0x713   : > { %v4278_v31 = vpop.f32.mrb[113].mxu0 }
 0x714   : > { %v2079_v33 = vpop.f32.mrb[114].mxu0  ;;  %v4655_v31 = vld [vmem:[#allocation8 + $0xa0] ss:$20 sps:$4 sm:$0xff]  }
 0x715   : > { %v2131_v56 = vpack.c.bf16 %v2079_v33, %v2076_v30  ;;  %v4279_v36 = vpop.f32.mrb[115].mxu0  ;;  %v4657_v30 = vld [vmem:[#allocation8 + $0xa4] ss:$20 sps:$4 sm:$0xff]   ;;  %v4664_v33 = vld [vmem:[#allocation8 + $0xc8] ss:$20 sps:$4 sm:$0xff]  }
 0x716   : > { %v4673_v36 = vld [vmem:[#allocation8 + $0xf0] ss:$20 sps:$4 sm:$0xff]  }
 0x717   : > { %v2146_v57 = vadd.bf16 %v2145_v32, %v2131_v56  ;;  %v4675_v56 = vld [vmem:[#allocation8 + $0xf4] ss:$20 sps:$4 sm:$0xff]  }
 0x719   : > { %v2153_v37 = vmax.bf16 %v4927_v22, %v2146_v57  ;;  %v2313_v57 = vld [vmem:[#allocation10 + $0x7] sm:$0x1] }
 0x71a   : > { %v2084_v38 = vpop.f32.mrb[116].mxu0 }
 0x71b   : > { %v4282_v41 = vpop.f32.mrb[117].mxu0  ;;  %4321 = vmatmul.mubr.bf16.vlgmr.msra.gmra.mrb[112].mxu1 %v2153_v37  ;;  %v2321_v37 = vpack.c.bf16 %v2313_v57, %v2313_v57 }
 0x71c   : > { %v2087_v43 = vpop.f32.mrb[118].mxu0  ;;  %4324 = vmatprep.mubr.msk.bf16.mxu1 %vm4926_vm0, %v4925_v39  ;;  %2810 = vmatpush1.bf16.msra.mxu1 %v4640_v23 }
 0x71d   : > { %v2132_v6 = vpack.c.bf16 %v2087_v43, %v2084_v38  ;;  %v4283_v44 = vpop.f32.mrb[119].mxu0  ;;  %2811 = vmatprep.subr.bf16.mxu1 %v4645_v25  ;;  %v2323_v38 = vpack.i.b16 %v2321_v37, %v2321_v37 }
 0x71f   : > { %v2147_v45 = vadd.bf16 %v2145_v32, %v2132_v6  ;;  %v5559_v6 = vrot.slane %v2323_v38, %v5334_v9 }
 0x720   : > { %2812 = vmatpush1.bf16.msra.mxu1 %v4643_v26 }
 0x721   : > { %v2154_v46 = vmax.bf16 %v4927_v22, %v2147_v45  ;;  %2813 = vmatprep.subr.bf16.mxu1 %v4648_v27 }
 0x722   : > { %v2092_v7 = vpop.f32.mrb[120].mxu0 }
 0x723   : > { %v4286_v47 = vpop.f32.mrb[121].mxu0  ;;  %4325 = vmatmul.mubr.bf16.gmra.mrb[116].mxu1 %v2154_v46 }
 0x724   : > { %v2095_v48 = vpop.f32.mrb[122].mxu0  ;;  %4328 = vmatprep.mubr.msk.bf16.mxu1 %vm4926_vm0, %v4925_v39  ;;  %2814 = vmatpush1.bf16.msra.mxu1 %v4646_v42  ;;  %v4652_v47 = vld [vmem:[#allocation8 + $0x8] ss:$20 sps:$4 sm:$0xff]  }
 0x725   : > { %v2133_v49 = vpack.c.bf16 %v2095_v48, %v2092_v7  ;;  %v4287_v50 = vpop.f32.mrb[123].mxu0  ;;  %2815 = vmatprep.subr.bf16.mxu1 %v4651_v28 }
 0x727   : > { %v2148_v20 = vadd.bf16 %v2145_v32, %v2133_v49  ;;  %v4660_v49 = vld [vmem:[#allocation8 + $0x34] ss:$20 sps:$4 sm:$0xff]  }
 0x728   : > { %2816 = vmatpush1.bf16.msra.mxu1 %v4649_v29 }
 0x729   : > { %v2155_v52 = vmax.bf16 %v4927_v22, %v2148_v20  ;;  %2817 = vmatprep.subr.bf16.mxu1 %v4657_v30 }
 0x72a   : > { %v2100_v54 = vpop.f32.mrb[124].mxu0 }
 0x72b   : > { %v4290_v55 = vpop.f32.mrb[125].mxu0  ;;  %4329 = vmatmul.mubr.bf16.gmra.mrb[120].mxu1 %v2155_v52 }
 0x72c   : > { %v2103_v21 = vpop.f32.mrb[126].mxu0  ;;  %4332 = vmatprep.mubr.msk.bf16.mxu1 %vm4926_vm0, %v4925_v39  ;;  %2818 = vmatpush1.bf16.msra.mxu1 %v4655_v31 }
 0x72d   : > { %v2134_v58 = vpack.c.bf16 %v2103_v21, %v2100_v54  ;;  %v4291_v59 = vpop.f32.mrb[127].mxu0  ;;  %v4658_v54 = vld [vmem:[#allocation8 + $0x30] ss:$20 sps:$4 sm:$0xff]  }
 0x72f   : > { %v2149_v60 = vadd.bf16 %v2145_v32, %v2134_v58  ;;  %v4663_v58 = vld [vmem:[#allocation8 + $0x5c] ss:$20 sps:$4 sm:$0xff]  }
 0x731   : > { %v2156_v61 = vmax.bf16 %v4927_v22, %v2149_v60  ;;  %v4661_v60 = vld [vmem:[#allocation8 + $0x58] ss:$20 sps:$4 sm:$0xff]  }
 0x732   : > { %v2108_v34 = vpop.f32.mrb[128].mxu0 }
 0x733   : > { %v4294_v62 = vpop.f32.mrb[129].mxu0  ;;  %4333 = vmatmul.mubr.bf16.gmra.mrb[124].mxu1 %v2156_v61 }
 0x734   : > { %v2111_v63 = vpop.f32.mrb[130].mxu0  ;;  %4336 = vmatprep.mubr.msk.bf16.mxu1 %vm4926_vm0, %v4925_v39 }
 0x735   : > { %v2135_v0 = vpack.c.bf16 %v2111_v63, %v2108_v34  ;;  %v4295_v35 = vpop.f32.mrb[131].mxu0  ;;  %v4669_v34 = vld [vmem:[#allocation8 + $0x84] ss:$20 sps:$4 sm:$0xff]  }
 0x736   : > { %v4667_v35 = vld [vmem:[#allocation8 + $0x80] ss:$20 sps:$4 sm:$0xff]  }
 0x737   : > { %v2150_v1 = vadd.bf16 %v2145_v32, %v2135_v0 }
 0x739   : > { %v2157_v3 = vmax.bf16 %v4927_v22, %v2150_v1 }
 0x73a   : > { %v2116_v4 = vpop.f32.mrb[132].mxu0 }
 0x73b   : > { %v4298_v8 = vpop.f32.mrb[133].mxu0  ;;  %4337 = vmatmul.mubr.bf16.gmra.mrb[128].mxu1 %v2157_v3 }
 0x73c   : > { %v2119_v51 = vpop.f32.mrb[134].mxu0  ;;  %4340 = vmatprep.mubr.msk.bf16.mxu1 %vm4926_vm0, %v4925_v39 }
 0x73d   : > { %v2136_v10 = vpack.c.bf16 %v2119_v51, %v2116_v4  ;;  %v4299_v11 = vpop.f32.mrb[135].mxu0  ;;  %v4672_v4 = vld [vmem:[#allocation8 + $0xac] ss:$20 sps:$4 sm:$0xff]   ;;  %v4670_v51 = vld [vmem:[#allocation8 + $0xa8] ss:$20 sps:$4 sm:$0xff]  }
 0x73e   : > { %v4678_v11 = vld [vmem:[#allocation8 + $0xd4] ss:$20 sps:$4 sm:$0xff]  }
 0x73f   : > { %v2151_v12 = vadd.bf16 %v2145_v32, %v2136_v10 }
 0x741   : > { %v2158_v53 = vmax.bf16 %v4927_v22, %v2151_v12 }
 0x742   : > { %v2124_v13 = vpop.f32.mrb[136].mxu0 }
 0x743   : > { %v2137_v14 = vpack.c.bf16 %v2124_v13, %v2124_v13  ;;  %v4302_v5 = vpop.f32.mrb[137].mxu0  ;;  %4341 = vmatmul.mubr.bf16.gmra.mrb[132].mxu1 %v2158_v53 }
 0x744   : > { %v2127_v16 = vpop.f32.mrb[138].mxu0  ;;  %4344 = vmatprep.mubr.msk.bf16.mxu1 %vm4926_vm0, %v4925_v39 }
 0x745   : > { %v2152_v17 = vadd.bf16 %v2145_v32, %v2137_v14  ;;  %v4303_v15 = vpop.f32.mrb[139].mxu0  ;;  %v4666_v32 = vld [vmem:[#allocation8 + $0xcc] ss:$20 sps:$4 sm:$0xff]   ;;  %v4676_v14 = vld [vmem:[#allocation8 + $0xd0] ss:$20 sps:$4 sm:$0xff]  }
 0x746   : > { %2819 = vmatprep.subr.bf16.mxu1 %v4666_v32 }
 0x747   : > { %v2159_v18 = vmax.bf16 %v4927_v22, %v2152_v17  ;;  %2820 = vmatpush1.bf16.msra.mxu1 %v4664_v33 }
 0x748   : > { %2821 = vmatprep.subr.bf16.mxu1 %v4675_v56 }
 0x74b   : > { %4345 = vmatmul.mubr.bf16.gmra.mrb[136].mxu1 %v2159_v18 }
 0x74c   : > { %2841 = vmatprep.mubr.bf16.mxu1 %v4927_v22  ;;  %2822 = vmatpush1.bf16.msra.mxu1 %v4673_v36 }
 0x7ee   : > { %v2259_v41 = vpop.f32.mrb[112].mxu1 }
 0x7ef   : > { %v4322_v43 = vpop.f32.mrb[113].mxu1 }
 0x7f0   : > { %v2262_v44 = vpop.f32.mrb[114].mxu1  ;;  %v4681_v43 = vld [vmem:[#allocation8 + $0xfc] ss:$20 sps:$4 sm:$0xff]  }
 0x7f1   : > { %v2314_v45 = vpack.c.bf16 %v2262_v44, %v2259_v41  ;;  %v4323_v46 = vpop.f32.mrb[115].mxu1  ;;  %v4679_v44 = vld [vmem:[#allocation8 + $0xf8] ss:$20 sps:$4 sm:$0xff]  }
 0x7f2   : > { %v4687_v46 = vld [vmem:[#allocation8 + $0x124] ss:$20 sps:$4 sm:$0xff]  }
 0x7f3   : > { %v2329_v7 = vadd.bf16 %v5559_v6, %v2314_v45  ;;  %v4684_v45 = vld [vmem:[#allocation8 + $0x11c] ss:$20 sps:$4 sm:$0xff]  }
 0x7f4   : > { %2823 = vmatprep.subr.bf16.mxu1 %v4684_v45 }
 0x7f5   : > { %v2336_v48 = vmax.bf16 %v4927_v22, %v2329_v7  ;;  %v4682_v7 = vld [vmem:[#allocation8 + $0x118] ss:$20 sps:$4 sm:$0xff]  }
 0x7f6   : > { %v2267_v50 = vpop.f32.mrb[116].mxu1  ;;  %2824 = vmatpush1.bf16.msra.mxu1 %v4682_v7 }
 0x7f7   : > { %v4326_v20 = vpop.f32.mrb[117].mxu1  ;;  %4365 = vmatmul.mubr.bf16.vlgmr.msra.gmra.mrb[140].mxu0 %v2336_v48  ;;  %4392 = vmatprep.subr.bf16.mxu1 %v4925_v39 }
 0x7f8   : > { %v2270_v52 = vpop.f32.mrb[118].mxu1  ;;  %4368 = vmatprep.mubr.msk.bf16.mxu0 %vm4926_vm0, %v4925_v39  ;;  %2911 = vmatpush1.bf16.msra.mxu0 %v4652_v47  ;;  %v4685_v47 = vld [vmem:[#allocation8 + $0x120] ss:$20 sps:$4 sm:$0xff]  }
 0x7f9   : > { %v2315_v55 = vpack.c.bf16 %v2270_v52, %v2267_v50  ;;  %v4327_v21 = vpop.f32.mrb[119].mxu1  ;;  %2912 = vmatprep.subr.bf16.mxu0 %v4660_v49 }
 0x7fb   : > { %v2330_v59 = vadd.bf16 %v5559_v6, %v2315_v55 }
 0x7fc   : > { %2913 = vmatpush1.bf16.msra.mxu0 %v4658_v54 }
 0x7fd   : > { %v2337_v61 = vmax.bf16 %v4927_v22, %v2330_v59  ;;  %2914 = vmatprep.subr.bf16.mxu0 %v4663_v58  ;;  %v4688_v59 = vld [vmem:[#allocation8 + $0x10] ss:$20 sps:$4 sm:$0xff]  }
 0x7fe   : > { %v2275_v62 = vpop.f32.mrb[120].mxu1 }
 0x7ff   : > { %v4330_v63 = vpop.f32.mrb[121].mxu1  ;;  %4369 = vmatmul.mubr.bf16.gmra.mrb[144].mxu0 %v2337_v61 }
 0x800   : > { %v2278_v0 = vpop.f32.mrb[122].mxu1  ;;  %4372 = vmatprep.mubr.msk.bf16.mxu0 %vm4926_vm0, %v4925_v39  ;;  %2915 = vmatpush1.bf16.msra.mxu0 %v4661_v60  ;;  %v4689_v63 = vld [vmem:[#allocation8 + $0x38] ss:$20 sps:$4 sm:$0xff]  }
 0x801   : > { %v2316_v1 = vpack.c.bf16 %v2278_v0, %v2275_v62  ;;  %v4331_v3 = vpop.f32.mrb[123].mxu1  ;;  %2916 = vmatprep.subr.bf16.mxu0 %v4669_v34 }
 0x803   : > { %v2331_v8 = vadd.bf16 %v5559_v6, %v2316_v1 }
 0x804   : > { %2917 = vmatpush1.bf16.msra.mxu0 %v4667_v35 }
 0x805   : > { %v2338_v10 = vmax.bf16 %v4927_v22, %v2331_v8  ;;  %2918 = vmatprep.subr.bf16.mxu0 %v4672_v4  ;;  %v4690_v4 = vld [vmem:[#allocation8 + $0x60] ss:$20 sps:$4 sm:$0xff]  }
 0x806   : > { %v2283_v12 = vpop.f32.mrb[124].mxu1 }
 0x807   : > { %v4334_v53 = vpop.f32.mrb[125].mxu1  ;;  %4373 = vmatmul.mubr.bf16.gmra.mrb[148].mxu0 %v2338_v10 }
 0x808   : > { %v2286_v13 = vpop.f32.mrb[126].mxu1  ;;  %4376 = vmatprep.mubr.msk.bf16.mxu0 %vm4926_vm0, %v4925_v39  ;;  %2919 = vmatpush1.bf16.msra.mxu0 %v4670_v51  ;;  %v4691_v53 = vld [vmem:[#allocation8 + $0x88] ss:$20 sps:$4 sm:$0xff]  }
 0x809   : > { %v2317_v5 = vpack.c.bf16 %v2286_v13, %v2283_v12  ;;  %v4335_v16 = vpop.f32.mrb[127].mxu1  ;;  %2920 = vmatprep.subr.bf16.mxu0 %v4678_v11 }
 0x80b   : > { %v2332_v17 = vadd.bf16 %v5559_v6, %v2317_v5  ;;  %v4692_v5 = vld [vmem:[#allocation8 + $0xb0] ss:$20 sps:$4 sm:$0xff]  }
 0x80c   : > { %2921 = vmatpush1.bf16.msra.mxu0 %v4676_v14 }
 0x80d   : > { %v2339_v15 = vmax.bf16 %v4927_v22, %v2332_v17  ;;  %2922 = vmatprep.subr.bf16.mxu0 %v4681_v43 }
 0x80e   : > { %v2291_v18 = vpop.f32.mrb[128].mxu1 }
 0x80f   : > { %v4338_v19 = vpop.f32.mrb[129].mxu1  ;;  %4377 = vmatmul.mubr.bf16.gmra.mrb[152].mxu0 %v2339_v15 }
 0x810   : > { %v2294_v23 = vpop.f32.mrb[130].mxu1  ;;  %4380 = vmatprep.mubr.msk.bf16.mxu0 %vm4926_vm0, %v4925_v39  ;;  %2923 = vmatpush1.bf16.msra.mxu0 %v4679_v44 }
 0x811   : > { %v2318_v24 = vpack.c.bf16 %v2294_v23, %v2291_v18  ;;  %v4339_v25 = vpop.f32.mrb[131].mxu1  ;;  %2924 = vmatprep.subr.bf16.mxu0 %v4687_v46  ;;  %v4693_v23 = vld [vmem:[#allocation8 + $0xd8] ss:$20 sps:$4 sm:$0xff]  }
 0x813   : > { %v2333_v26 = vadd.bf16 %v5559_v6, %v2318_v24 }
 0x814   : > { %2925 = vmatpush1.bf16.msra.mxu0 %v4685_v47 }
 0x815   : > { %v2340_v40 = vmax.bf16 %v4927_v22, %v2333_v26  ;;  %v4694_v26 = vld [vmem:[#allocation8 + $0x100] ss:$20 sps:$4 sm:$0xff]  }
 0x816   : > { %v2299_v27 = vpop.f32.mrb[132].mxu1 }
 0x817   : > { %v4342_v42 = vpop.f32.mrb[133].mxu1  ;;  %4381 = vmatmul.mubr.bf16.gmra.mrb[156].mxu0 %v2340_v40 }
 0x818   : > { %v2302_v28 = vpop.f32.mrb[134].mxu1  ;;  %4384 = vmatprep.mubr.msk.bf16.mxu0 %vm4926_vm0, %v4925_v39 }
 0x819   : > { %v2319_v29 = vpack.c.bf16 %v2302_v28, %v2299_v27  ;;  %v4343_v30 = vpop.f32.mrb[135].mxu1 }
 0x81a   : > { %v4695_v30 = vld [vmem:[#allocation8 + $0x128] ss:$20 sps:$4 sm:$0xff]  }
 0x81b   : > { %v2334_v31 = vadd.bf16 %v5559_v6, %v2319_v29 }
 0x81d   : > { %v2341_v32 = vmax.bf16 %v4927_v22, %v2334_v31 }
 0x81e   : > { %v2307_v33 = vpop.f32.mrb[136].mxu1 }
 0x81f   : > { %v2320_v56 = vpack.c.bf16 %v2307_v33, %v2307_v33  ;;  %v4346_v36 = vpop.f32.mrb[137].mxu1  ;;  %4385 = vmatmul.mubr.bf16.gmra.mrb[160].mxu0 %v2341_v32 }
 0x820   : > { %v2310_v57 = vpop.f32.mrb[138].mxu1  ;;  %4388 = vmatprep.mubr.msk.bf16.mxu0 %vm4926_vm0, %v4925_v39 }
 0x821   : > { %v2335_v37 = vadd.bf16 %v5559_v6, %v2320_v56  ;;  %v4347_v38 = vpop.f32.mrb[139].mxu1  ;;  %v2496_v6 = vld [vmem:[#allocation10 + $0x8] sm:$0x1] }
 0x822   : > { %v2504_v48 = vpack.c.bf16 %v2496_v6, %v2496_v6 }
 0x823   : > { %v2342_v41 = vmax.bf16 %v4927_v22, %v2335_v37 }
 0x824   : > { %v2506_v49 = vpack.i.b16 %v2504_v48, %v2504_v48  ;;  %v5658_v48 = vld [vmem:[%s5854_s5] sm:$0x1f] }
 0x826   : > { %v5590_v52 = vrot.slane %v2506_v49, %v5334_v9  ;;  %v2582_v49 = vsub.s32 1, %v5329_v2 }
 0x827   : > { %4389 = vmatmul.mubr.bf16.gmra.mrb[164].mxu0 %v2342_v41 }
 0x828   : > { %2942 = vmatprep.mubr.bf16.mxu0 %v4927_v22 }
 0x8ca   : > { %v2442_v50 = vpop.f32.mrb[140].mxu0 }
 0x8cb   : > { %v4366_v20 = vpop.f32.mrb[141].mxu0 }
 0x8cc   : > { %v2445_v54 = vpop.f32.mrb[142].mxu0  ;;  %v5664_v20 = vrot.slane %v5658_v48, %v5334_v9 }
 0x8cd   : > { %v2497_v55 = vpack.c.bf16 %v2445_v54, %v2442_v50  ;;  %v4367_v21 = vpop.f32.mrb[143].mxu0  ;;  %v2590_v50 = vsub.s32 3, %v5329_v2 }
 0x8cf   : > { %v2512_v58 = vadd.bf16 %v5590_v52, %v2497_v55  ;;  %v5673_v54 = vrot.slane %v5658_v48, %v2590_v50 }
 0x8d1   : > { %v5594_v60 = vmax.bf16 %v4927_v22, %v2512_v58 }
 0x8d2   : > { %v2450_v61 = vpop.f32.mrb[144].mxu0 }
 0x8d3   : > { %v4370_v34 = vpop.f32.mrb[145].mxu0  ;;  %2842 = vmatmul.mubr.bf16.vlgmr.msra.gmra.mrb[140].mxu1 %v5594_v60  ;;  %2943 = vmatmul.mubr.bf16.vlgmr.msra.gmra.mrb[168].mxu0 %v5594_v60 }
 0x8d4   : > { %v2453_v62 = vpop.f32.mrb[146].mxu0  ;;  %4393 = vmatpush3.bf16.msra.mxu1 %v4688_v59  ;;  %2851 = vmatprep.mubr.bf16.mxu1 %v4927_v22 }
 0x8d5   : > { %v2498_v0 = vpack.c.bf16 %v2453_v62, %v2450_v61  ;;  %v4371_v35 = vpop.f32.mrb[147].mxu0  ;;  %2952 = vmatprep.mubr.bf16.mxu0 %v4927_v22  ;;  %4394 = vmatprep.subr.bf16.mxu1 %v4925_v39 }
 0x8d7   : > { %v2513_v1 = vadd.bf16 %v5590_v52, %v2498_v0 }
 0x8d8   : > { %4395 = vmatpush3.bf16.msra.mxu1 %v4689_v63 }
 0x8d9   : > { %v5603_v3 = vmax.bf16 %v4927_v22, %v2513_v1  ;;  %4396 = vmatprep.subr.bf16.mxu1 %v4925_v39 }
 0x8da   : > { %v2458_v8 = vpop.f32.mrb[148].mxu0 }
 0x8db   : > { %v4374_v51 = vpop.f32.mrb[149].mxu0  ;;  %2852 = vmatmul.mubr.bf16.gmra.mrb[144].mxu1 %v5603_v3  ;;  %2953 = vmatmul.mubr.bf16.gmra.mrb[172].mxu0 %v5603_v3 }
 0x8dc   : > { %v2461_v10 = vpop.f32.mrb[150].mxu0  ;;  %2861 = vmatprep.mubr.bf16.mxu1 %v4927_v22  ;;  %2962 = vmatprep.mubr.bf16.mxu0 %v4927_v22 }
 0x8dd   : > { %v2499_v11 = vpack.c.bf16 %v2461_v10, %v2458_v8  ;;  %v4375_v12 = vpop.f32.mrb[151].mxu0  ;;  %4397 = vmatpush3.bf16.msra.mxu1 %v4690_v4 }
 0x8de   : > { %4398 = vmatprep.subr.bf16.mxu1 %v4925_v39 }
 0x8df   : > { %v2514_v13 = vadd.bf16 %v5590_v52, %v2499_v11 }
 0x8e1   : > { %v5613_v14 = vmax.bf16 %v4927_v22, %v2514_v13  ;;  %4399 = vmatpush3.bf16.msra.mxu1 %v4691_v53 }
 0x8e2   : > { %v2466_v16 = vpop.f32.mrb[152].mxu0  ;;  %4400 = vmatprep.subr.bf16.mxu1 %v4925_v39 }
 0x8e3   : > { %v4378_v17 = vpop.f32.mrb[153].mxu0  ;;  %2862 = vmatmul.mubr.bf16.gmra.mrb[148].mxu1 %v5613_v14  ;;  %2963 = vmatmul.mubr.bf16.gmra.mrb[176].mxu0 %v5613_v14 }
 0x8e4   : > { %v2469_v15 = vpop.f32.mrb[154].mxu0  ;;  %2871 = vmatprep.mubr.bf16.mxu1 %v4927_v22  ;;  %2972 = vmatprep.mubr.bf16.mxu0 %v4927_v22 }
 0x8e5   : > { %v2500_v18 = vpack.c.bf16 %v2469_v15, %v2466_v16  ;;  %v4379_v19 = vpop.f32.mrb[155].mxu0  ;;  %4401 = vmatpush3.bf16.msra.mxu1 %v4692_v5 }
 0x8e6   : > { %4402 = vmatprep.subr.bf16.mxu1 %v4925_v39 }
 0x8e7   : > { %v2515_v24 = vadd.bf16 %v5590_v52, %v2500_v18 }
 0x8e9   : > { %v2522_v25 = vmax.bf16 %v4927_v22, %v2515_v24  ;;  %4403 = vmatpush3.bf16.msra.mxu1 %v4693_v23 }
 0x8ea   : > { %v2474_v40 = vpop.f32.mrb[156].mxu0  ;;  %4404 = vmatprep.subr.bf16.mxu1 %v4925_v39 }
 0x8eb   : > { %v4382_v27 = vpop.f32.mrb[157].mxu0  ;;  %2872 = vmatmul.mubr.bf16.gmra.mrb[152].mxu1 %v2522_v25  ;;  %2973 = vmatmul.mubr.bf16.gmra.mrb[180].mxu0 %v2522_v25 }
 0x8ec   : > { %v2477_v42 = vpop.f32.mrb[158].mxu0  ;;  %2881 = vmatprep.mubr.bf16.mxu1 %v4927_v22  ;;  %2982 = vmatprep.mubr.bf16.mxu0 %v4927_v22 }
 0x8ed   : > { %v2501_v28 = vpack.c.bf16 %v2477_v42, %v2474_v40  ;;  %v4383_v29 = vpop.f32.mrb[159].mxu0  ;;  %4405 = vmatpush3.bf16.msra.mxu1 %v4694_v26 }
 0x8ee   : > { %4406 = vmatprep.subr.bf16.mxu1 %v4925_v39 }
 0x8ef   : > { %v2516_v31 = vadd.bf16 %v5590_v52, %v2501_v28 }
 0x8f1   : > { %v2523_v32 = vmax.bf16 %v4927_v22, %v2516_v31  ;;  %4407 = vmatpush3.bf16.msra.mxu1 %v4695_v30 }
 0x8f2   : > { %v2482_v33 = vpop.f32.mrb[160].mxu0 }
 0x8f3   : > { %v4386_v56 = vpop.f32.mrb[161].mxu0  ;;  %2882 = vmatmul.mubr.bf16.gmra.mrb[156].mxu1 %v2523_v32  ;;  %2983 = vmatmul.mubr.bf16.gmra.mrb[184].mxu0 %v2523_v32 }
 0x8f4   : > { %v2485_v36 = vpop.f32.mrb[162].mxu0  ;;  %2891 = vmatprep.mubr.bf16.mxu1 %v4927_v22  ;;  %2992 = vmatprep.mubr.bf16.mxu0 %v4927_v22 }
 0x8f5   : > { %v2502_v57 = vpack.c.bf16 %v2485_v36, %v2482_v33  ;;  %v4387_v37 = vpop.f32.mrb[163].mxu0 }
 0x8f7   : > { %v2517_v38 = vadd.bf16 %v5590_v52, %v2502_v57 }
 0x8f9   : > { %v2524_v41 = vmax.bf16 %v4927_v22, %v2517_v38 }
 0x8fa   : > { %v2490_v43 = vpop.f32.mrb[164].mxu0 }
 0x8fb   : > { %v2503_v44 = vpack.c.bf16 %v2490_v43, %v2490_v43  ;;  %v4390_v45 = vpop.f32.mrb[165].mxu0  ;;  %2892 = vmatmul.mubr.bf16.gmra.mrb[160].mxu1 %v2524_v41  ;;  %2993 = vmatmul.mubr.bf16.gmra.mrb[188].mxu0 %v2524_v41 }
 0x8fc   : > { %v2493_v46 = vpop.f32.mrb[166].mxu0  ;;  %2901 = vmatprep.mubr.bf16.mxu1 %v4927_v22  ;;  %3002 = vmatprep.mubr.bf16.mxu0 %v4927_v22 }
 0x8fd   : > { %v2518_v7 = vadd.bf16 %v5590_v52, %v2503_v44  ;;  %v4391_v47 = vpop.f32.mrb[167].mxu0 }
 0x8ff   : > { %v2525_v6 = vmax.bf16 %v4927_v22, %v2518_v7  ;;  %v2586_v22 = vsub.s32 2, %v5329_v2 }
 0x901   : > { %v5667_v52 = vrot.slane %v5658_v48, %v2586_v22 }
 0x903   : > { %2902 = vmatmul.mubr.bf16.gmra.mrb[164].mxu1 %v2525_v6  ;;  %3003 = vmatmul.mubr.bf16.gmra.mrb[192].mxu0 %v2525_v6 }
 0x904   : > { %4408 = vmatprep.mubr.msk.bf16.mxu1 %vm4926_vm0, %v4925_v39 }
 0x90b   : > { %4409 = vmatmul.mubr.bf16.vlgmr.msra.gmra.mrb[168].mxu1 %v5594_v60 }
 0x90c   : > { %4412 = vmatprep.mubr.msk.bf16.mxu1 %vm4926_vm0, %v4925_v39 }
 0x913   : > { %4413 = vmatmul.mubr.bf16.gmra.mrb[172].mxu1 %v5603_v3 }
 0x914   : > { %4416 = vmatprep.mubr.msk.bf16.mxu1 %vm4926_vm0, %v4925_v39 }
 0x91b   : > { %4417 = vmatmul.mubr.bf16.gmra.mrb[176].mxu1 %v5613_v14 }
 0x91c   : > { %4420 = vmatprep.mubr.msk.bf16.mxu1 %vm4926_vm0, %v4925_v39 }
 0x923   : > { %4421 = vmatmul.mubr.bf16.gmra.mrb[180].mxu1 %v2522_v25 }
 0x924   : > { %4424 = vmatprep.mubr.msk.bf16.mxu1 %vm4926_vm0, %v4925_v39 }
 0x92b   : > { %4425 = vmatmul.mubr.bf16.gmra.mrb[184].mxu1 %v2523_v32 }
 0x92c   : > { %4428 = vmatprep.mubr.msk.bf16.mxu1 %vm4926_vm0, %v4925_v39 }
 0x933   : > { %4429 = vmatmul.mubr.bf16.gmra.mrb[188].mxu1 %v2524_v41 }
 0x934   : > { %4432 = vmatprep.mubr.msk.bf16.mxu1 %vm4926_vm0, %v4925_v39  ;;  %v5670_v39 = vrot.slane %v5658_v48, %v2582_v49 }
 0x93b   : > { %4433 = vmatmul.mubr.bf16.gmra.mrb[192].mxu1 %v2525_v6 }
 0x9a6   : > { %v2843_v55 = vpop.f32.mrb[140].mxu1  ;;  %v2944_v21 = vpop.f32.mrb[168].mxu0 }
 0x9a7   : > { %v2844_v58 = vadd.f32 %v2843_v55, %v5664_v20  ;;  %v2945_v59 = vadd.f32 %v2944_v21, %v5667_v52  ;;  %v2845_v60 = vpop.f32.mrb[141].mxu1  ;;  %v2946_v61 = vpop.f32.mrb[169].mxu0 }
 0x9a8   : > { %v2846_v9 = vadd.f32 %v2845_v60, %v5670_v39  ;;  %v2947_v34 = vadd.f32 %v2946_v61, %v5673_v54  ;;  %v2847_v62 = vpop.f32.mrb[142].mxu1  ;;  %v2948_v63 = vpop.f32.mrb[170].mxu0 }
 0x9a9   : > { %v2848_v0 = vadd.f32 %v2847_v62, %v5664_v20  ;;  %v2949_v35 = vadd.f32 %v2948_v63, %v5667_v52  ;;  %v2849_v1 = vpop.f32.mrb[143].mxu1  ;;  %v2950_v3 = vpop.f32.mrb[171].mxu0 }
 0x9aa   : > { %v3691_v4 = vpack.c.bf16 %v2846_v9, %v2844_v58  ;;  %v3692_v8 = vpack.c.bf16 %v2947_v34, %v2945_v59  ;;  %v2850_v51 = vadd.f32 %v2849_v1, %v5670_v39  ;;  %v2951_v10 = vadd.f32 %v2950_v3, %v5673_v54 }
 0x9ac   : > { %3312 = vst [vmem:[%s5684_s17] sm:$0xff] %v3691_v4  ;;  %3313 = vst [vmem:[%s5684_s17 + $0x8] sm:$0xff] %v3692_v8  ;;  %v3694_v11 = vpack.c.bf16 %v2850_v51, %v2848_v0  ;;  %v3695_v12 = vpack.c.bf16 %v2951_v10, %v2949_v35 }
 0x9ae   : > { %3315 = vst [vmem:[%s5684_s17 + $0x14] sm:$0xff] %v3694_v11  ;;  %3316 = vst [vmem:[%s5684_s17 + $0x1c] sm:$0xff] %v3695_v12  ;;  %v2853_v53 = vpop.f32.mrb[144].mxu1  ;;  %v2954_v13 = vpop.f32.mrb[172].mxu0 }
 0x9af   : > { %v2854_v14 = vadd.f32 %v2853_v53, %v5664_v20  ;;  %v2955_v5 = vadd.f32 %v2954_v13, %v5667_v52  ;;  %v2855_v16 = vpop.f32.mrb[145].mxu1  ;;  %v2956_v17 = vpop.f32.mrb[173].mxu0 }
 0x9b0   : > { %v2856_v15 = vadd.f32 %v2855_v16, %v5670_v39  ;;  %v2957_v18 = vadd.f32 %v2956_v17, %v5673_v54  ;;  %v2857_v19 = vpop.f32.mrb[146].mxu1  ;;  %v2958_v23 = vpop.f32.mrb[174].mxu0 }
 0x9b1   : > { %v2858_v24 = vadd.f32 %v2857_v19, %v5664_v20  ;;  %v2959_v25 = vadd.f32 %v2958_v23, %v5667_v52  ;;  %v2859_v26 = vpop.f32.mrb[147].mxu1  ;;  %v2960_v40 = vpop.f32.mrb[175].mxu0 }
 0x9b2   : > { %v3697_v27 = vpack.c.bf16 %v2856_v15, %v2854_v14  ;;  %v3698_v42 = vpack.c.bf16 %v2957_v18, %v2955_v5  ;;  %v2860_v28 = vadd.f32 %v2859_v26, %v5670_v39  ;;  %v2961_v29 = vadd.f32 %v2960_v40, %v5673_v54 }
 0x9b4   : > { %3318 = vst [vmem:[%s5684_s17 + $0x28] sm:$0xff] %v3697_v27  ;;  %3319 = vst [vmem:[%s5684_s17 + $0x30] sm:$0xff] %v3698_v42  ;;  %v3700_v30 = vpack.c.bf16 %v2860_v28, %v2858_v24  ;;  %v3701_v31 = vpack.c.bf16 %v2961_v29, %v2959_v25 }
 0x9b6   : > { %3321 = vst [vmem:[%s5684_s17 + $0x3c] sm:$0xff] %v3700_v30  ;;  %3322 = vst [vmem:[%s5684_s17 + $0x44] sm:$0xff] %v3701_v31  ;;  %v2863_v32 = vpop.f32.mrb[148].mxu1  ;;  %v2964_v33 = vpop.f32.mrb[176].mxu0 }
 0x9b7   : > { %v2864_v56 = vadd.f32 %v2863_v32, %v5664_v20  ;;  %v2965_v36 = vadd.f32 %v2964_v33, %v5667_v52  ;;  %v2865_v57 = vpop.f32.mrb[149].mxu1  ;;  %v2966_v37 = vpop.f32.mrb[177].mxu0 }
 0x9b8   : > { %v2866_v38 = vadd.f32 %v2865_v57, %v5670_v39  ;;  %v2967_v41 = vadd.f32 %v2966_v37, %v5673_v54  ;;  %v2867_v43 = vpop.f32.mrb[150].mxu1  ;;  %v2968_v44 = vpop.f32.mrb[178].mxu0 }
 0x9b9   : > { %v2868_v45 = vadd.f32 %v2867_v43, %v5664_v20  ;;  %v2969_v46 = vadd.f32 %v2968_v44, %v5667_v52  ;;  %v2869_v7 = vpop.f32.mrb[151].mxu1  ;;  %v2970_v47 = vpop.f32.mrb[179].mxu0 }
 0x9ba   : > { %v3703_v6 = vpack.c.bf16 %v2866_v38, %v2864_v56  ;;  %v3704_v22 = vpack.c.bf16 %v2967_v41, %v2965_v36  ;;  %v2870_v49 = vadd.f32 %v2869_v7, %v5670_v39  ;;  %v2971_v50 = vadd.f32 %v2970_v47, %v5673_v54 }
 0x9bc   : > { %3324 = vst [vmem:[%s5684_s17 + $0x50] sm:$0xff] %v3703_v6  ;;  %3325 = vst [vmem:[%s5684_s17 + $0x58] sm:$0xff] %v3704_v22  ;;  %v3706_v55 = vpack.c.bf16 %v2870_v49, %v2868_v45  ;;  %v3707_v21 = vpack.c.bf16 %v2971_v50, %v2969_v46 }
 0x9be   : > { %3327 = vst [vmem:[%s5684_s17 + $0x64] sm:$0xff] %v3706_v55  ;;  %3328 = vst [vmem:[%s5684_s17 + $0x6c] sm:$0xff] %v3707_v21  ;;  %v2873_v58 = vpop.f32.mrb[152].mxu1  ;;  %v2974_v59 = vpop.f32.mrb[180].mxu0 }
 0x9bf   : > { %v2874_v60 = vadd.f32 %v2873_v58, %v5664_v20  ;;  %v2975_v61 = vadd.f32 %v2974_v59, %v5667_v52  ;;  %v2875_v9 = vpop.f32.mrb[153].mxu1  ;;  %v2976_v34 = vpop.f32.mrb[181].mxu0 }
 0x9c0   : > { %v2876_v62 = vadd.f32 %v2875_v9, %v5670_v39  ;;  %v2977_v63 = vadd.f32 %v2976_v34, %v5673_v54  ;;  %v2877_v0 = vpop.f32.mrb[154].mxu1  ;;  %v2978_v35 = vpop.f32.mrb[182].mxu0 }
 0x9c1   : > { %v2878_v1 = vadd.f32 %v2877_v0, %v5664_v20  ;;  %v2979_v3 = vadd.f32 %v2978_v35, %v5667_v52  ;;  %v2879_v4 = vpop.f32.mrb[155].mxu1  ;;  %v2980_v8 = vpop.f32.mrb[183].mxu0  ;;  %v2594_v0 = vsub.s32 4, %v5329_v2 }
 0x9c2   : > { %v3709_v51 = vpack.c.bf16 %v2876_v62, %v2874_v60  ;;  %v3710_v10 = vpack.c.bf16 %v2977_v63, %v2975_v61  ;;  %v2880_v11 = vadd.f32 %v2879_v4, %v5670_v39  ;;  %v2981_v12 = vadd.f32 %v2980_v8, %v5673_v54 }
 0x9c4   : > { %3330 = vst [vmem:[%s5684_s17 + $0x78] sm:$0xff] %v3709_v51  ;;  %3331 = vst [vmem:[%s5684_s17 + $0x80] sm:$0xff] %v3710_v10  ;;  %v3712_v53 = vpack.c.bf16 %v2880_v11, %v2878_v1  ;;  %v3713_v13 = vpack.c.bf16 %v2981_v12, %v2979_v3 }
 0x9c6   : > { %3333 = vst [vmem:[%s5684_s17 + $0x8c] sm:$0xff] %v3712_v53  ;;  %3334 = vst [vmem:[%s5684_s17 + $0x94] sm:$0xff] %v3713_v13  ;;  %v2883_v14 = vpop.f32.mrb[156].mxu1  ;;  %v2984_v5 = vpop.f32.mrb[184].mxu0 }
 0x9c7   : > { %v2884_v16 = vadd.f32 %v2883_v14, %v5664_v20  ;;  %v2985_v17 = vadd.f32 %v2984_v5, %v5667_v52  ;;  %v2885_v15 = vpop.f32.mrb[157].mxu1  ;;  %v2986_v18 = vpop.f32.mrb[185].mxu0 }
 0x9c8   : > { %v2886_v19 = vadd.f32 %v2885_v15, %v5670_v39  ;;  %v2987_v23 = vadd.f32 %v2986_v18, %v5673_v54  ;;  %v2887_v24 = vpop.f32.mrb[158].mxu1  ;;  %v2988_v25 = vpop.f32.mrb[186].mxu0 }
 0x9c9   : > { %v2888_v26 = vadd.f32 %v2887_v24, %v5664_v20  ;;  %v2989_v40 = vadd.f32 %v2988_v25, %v5667_v52  ;;  %v2889_v27 = vpop.f32.mrb[159].mxu1  ;;  %v2990_v42 = vpop.f32.mrb[187].mxu0 }
 0x9ca   : > { %v3715_v28 = vpack.c.bf16 %v2886_v19, %v2884_v16  ;;  %v3716_v29 = vpack.c.bf16 %v2987_v23, %v2985_v17  ;;  %v2890_v30 = vadd.f32 %v2889_v27, %v5670_v39  ;;  %v2991_v31 = vadd.f32 %v2990_v42, %v5673_v54 }
 0x9cc   : > { %3336 = vst [vmem:[%s5684_s17 + $0xa0] sm:$0xff] %v3715_v28  ;;  %3337 = vst [vmem:[%s5684_s17 + $0xa8] sm:$0xff] %v3716_v29  ;;  %v3718_v32 = vpack.c.bf16 %v2890_v30, %v2888_v26  ;;  %v3719_v33 = vpack.c.bf16 %v2991_v31, %v2989_v40 }
 0x9ce   : > { %3339 = vst [vmem:[%s5684_s17 + $0xb4] sm:$0xff] %v3718_v32  ;;  %3340 = vst [vmem:[%s5684_s17 + $0xbc] sm:$0xff] %v3719_v33  ;;  %v2893_v56 = vpop.f32.mrb[160].mxu1  ;;  %v2994_v36 = vpop.f32.mrb[188].mxu0 }
 0x9cf   : > { %v2894_v57 = vadd.f32 %v2893_v56, %v5664_v20  ;;  %v2995_v37 = vadd.f32 %v2994_v36, %v5667_v52  ;;  %v2895_v38 = vpop.f32.mrb[161].mxu1  ;;  %v2996_v41 = vpop.f32.mrb[189].mxu0 }
 0x9d0   : > { %v2896_v43 = vadd.f32 %v2895_v38, %v5670_v39  ;;  %v2997_v44 = vadd.f32 %v2996_v41, %v5673_v54  ;;  %v2897_v45 = vpop.f32.mrb[162].mxu1  ;;  %v2998_v46 = vpop.f32.mrb[190].mxu0 }
 0x9d1   : > { %v2898_v7 = vadd.f32 %v2897_v45, %v5664_v20  ;;  %v2999_v47 = vadd.f32 %v2998_v46, %v5667_v52  ;;  %v2899_v6 = vpop.f32.mrb[163].mxu1  ;;  %v3000_v22 = vpop.f32.mrb[191].mxu0 }
 0x9d2   : > { %v3721_v49 = vpack.c.bf16 %v2896_v43, %v2894_v57  ;;  %v3722_v50 = vpack.c.bf16 %v2997_v44, %v2995_v37  ;;  %v2900_v55 = vadd.f32 %v2899_v6, %v5670_v39  ;;  %v3001_v21 = vadd.f32 %v3000_v22, %v5673_v54 }
 0x9d4   : > { %3342 = vst [vmem:[%s5684_s17 + $0xc8] sm:$0xff] %v3721_v49  ;;  %3343 = vst [vmem:[%s5684_s17 + $0xd0] sm:$0xff] %v3722_v50  ;;  %v3724_v58 = vpack.c.bf16 %v2900_v55, %v2898_v7  ;;  %v3725_v59 = vpack.c.bf16 %v3001_v21, %v2999_v47 }
 0x9d6   : > { %3345 = vst [vmem:[%s5684_s17 + $0xdc] sm:$0xff] %v3724_v58  ;;  %3346 = vst [vmem:[%s5684_s17 + $0xe4] sm:$0xff] %v3725_v59  ;;  %v2903_v60 = vpop.f32.mrb[164].mxu1  ;;  %v3004_v61 = vpop.f32.mrb[192].mxu0 }
 0x9d7   : > { %v2904_v9 = vadd.f32 %v2903_v60, %v5664_v20  ;;  %v3005_v34 = vadd.f32 %v3004_v61, %v5667_v52  ;;  %v2905_v62 = vpop.f32.mrb[165].mxu1  ;;  %v3006_v63 = vpop.f32.mrb[193].mxu0  ;;  %v5756_v20 = vrot.slane %v5658_v48, %v2594_v0 }
 0x9d8   : > { %v2906_v35 = vadd.f32 %v2905_v62, %v5670_v39  ;;  %v3007_v1 = vadd.f32 %v3006_v63, %v5673_v54  ;;  %v2907_v3 = vpop.f32.mrb[166].mxu1  ;;  %v3008_v4 = vpop.f32.mrb[194].mxu0 }
 0x9d9   : > { %v2908_v8 = vpop.f32.mrb[167].mxu1  ;;  %v3009_v51 = vpop.f32.mrb[195].mxu0 }
 0x9da   : > { %v3727_v10 = vpack.c.bf16 %v2906_v35, %v2904_v9  ;;  %v3728_v11 = vpack.c.bf16 %v3007_v1, %v3005_v34 }
 0x9dc   : > { %3348 = vst [vmem:[%s5684_s17 + $0xf0] sm:$0xff] %v3727_v10  ;;  %3349 = vst [vmem:[%s5684_s17 + $0xf8] sm:$0xff] %v3728_v11 }
 0x9de   : > { %v3045_v52 = vpop.f32.mrb[168].mxu1 }
 0x9df   : > { %v3046_v2 = vadd.f32 %v3045_v52, %v5756_v20  ;;  %v4410_v39 = vpop.f32.mrb[169].mxu1 }
 0x9e0   : > { %v3048_v12 = vpop.f32.mrb[170].mxu1 }
 0x9e1   : > { %v3693_v54 = vpack.c.bf16 %v3046_v2, %v3046_v2  ;;  %v3049_v53 = vadd.f32 %v3048_v12, %v5756_v20  ;;  %v4411_v13 = vpop.f32.mrb[171].mxu1 }
 0x9e3   : > { %3314 = vst [vmem:[%s5684_s17 + $0x10] sm:$0xf] %v3693_v54  ;;  %v3696_v14 = vpack.c.bf16 %v3049_v53, %v3049_v53 }
 0x9e5   : > { %3317 = vst [vmem:[%s5684_s17 + $0x24] sm:$0xf] %v3696_v14 }
 0x9e6   : > { %v3053_v5 = vpop.f32.mrb[172].mxu1 }
 0x9e7   : > { %v3054_v48 = vadd.f32 %v3053_v5, %v5756_v20  ;;  %v4414_v16 = vpop.f32.mrb[173].mxu1 }
 0x9e8   : > { %v3056_v17 = vpop.f32.mrb[174].mxu1 }
 0x9e9   : > { %v3699_v15 = vpack.c.bf16 %v3054_v48, %v3054_v48  ;;  %v3057_v18 = vadd.f32 %v3056_v17, %v5756_v20  ;;  %v4415_v19 = vpop.f32.mrb[175].mxu1 }
 0x9eb   : > { %3320 = vst [vmem:[%s5684_s17 + $0x38] sm:$0xf] %v3699_v15  ;;  %v3702_v23 = vpack.c.bf16 %v3057_v18, %v3057_v18 }
 0x9ed   : > { %3323 = vst [vmem:[%s5684_s17 + $0x4c] sm:$0xf] %v3702_v23 }
 0x9ee   : > { %v3061_v24 = vpop.f32.mrb[176].mxu1 }
 0x9ef   : > { %v3062_v25 = vadd.f32 %v3061_v24, %v5756_v20  ;;  %v4418_v26 = vpop.f32.mrb[177].mxu1 }
 0x9f0   : > { %v3064_v40 = vpop.f32.mrb[178].mxu1 }
 0x9f1   : > { %v3705_v27 = vpack.c.bf16 %v3062_v25, %v3062_v25  ;;  %v3065_v42 = vadd.f32 %v3064_v40, %v5756_v20  ;;  %v4419_v28 = vpop.f32.mrb[179].mxu1 }
 0x9f3   : > { %3326 = vst [vmem:[%s5684_s17 + $0x60] sm:$0xf] %v3705_v27  ;;  %v3708_v29 = vpack.c.bf16 %v3065_v42, %v3065_v42 }
 0x9f5   : > { %3329 = vst [vmem:[%s5684_s17 + $0x74] sm:$0xf] %v3708_v29 }
 0x9f6   : > { %v3069_v30 = vpop.f32.mrb[180].mxu1 }
 0x9f7   : > { %v3070_v31 = vadd.f32 %v3069_v30, %v5756_v20  ;;  %v4422_v32 = vpop.f32.mrb[181].mxu1 }
 0x9f8   : > { %v3072_v33 = vpop.f32.mrb[182].mxu1 }
 0x9f9   : > { %v3711_v56 = vpack.c.bf16 %v3070_v31, %v3070_v31  ;;  %v3073_v36 = vadd.f32 %v3072_v33, %v5756_v20  ;;  %v4423_v57 = vpop.f32.mrb[183].mxu1 }
 0x9fb   : > { %3332 = vst [vmem:[%s5684_s17 + $0x88] sm:$0xf] %v3711_v56  ;;  %v3714_v37 = vpack.c.bf16 %v3073_v36, %v3073_v36 }
 0x9fd   : > { %3335 = vst [vmem:[%s5684_s17 + $0x9c] sm:$0xf] %v3714_v37 }
 0x9fe   : > { %v3077_v38 = vpop.f32.mrb[184].mxu1 }
 0x9ff   : > { %v3078_v41 = vadd.f32 %v3077_v38, %v5756_v20  ;;  %v4426_v43 = vpop.f32.mrb[185].mxu1 }
 0xa00   : > { %v3080_v44 = vpop.f32.mrb[186].mxu1 }
 0xa01   : > { %v3717_v45 = vpack.c.bf16 %v3078_v41, %v3078_v41  ;;  %v3081_v46 = vadd.f32 %v3080_v44, %v5756_v20  ;;  %v4427_v7 = vpop.f32.mrb[187].mxu1 }
 0xa03   : > { %3338 = vst [vmem:[%s5684_s17 + $0xb0] sm:$0xf] %v3717_v45  ;;  %v3720_v47 = vpack.c.bf16 %v3081_v46, %v3081_v46 }
 0xa05   : > { %3341 = vst [vmem:[%s5684_s17 + $0xc4] sm:$0xf] %v3720_v47 }
 0xa06   : > { %v3085_v6 = vpop.f32.mrb[188].mxu1 }
 0xa07   : > { %v3086_v22 = vadd.f32 %v3085_v6, %v5756_v20  ;;  %v4430_v49 = vpop.f32.mrb[189].mxu1 }
 0xa08   : > { %v3088_v50 = vpop.f32.mrb[190].mxu1 }
 0xa09   : > { %v3723_v55 = vpack.c.bf16 %v3086_v22, %v3086_v22  ;;  %v3089_v21 = vadd.f32 %v3088_v50, %v5756_v20  ;;  %v4431_v58 = vpop.f32.mrb[191].mxu1 }
 0xa0b   : > { %3344 = vst [vmem:[%s5684_s17 + $0xd8] sm:$0xf] %v3723_v55  ;;  %v3726_v59 = vpack.c.bf16 %v3089_v21, %v3089_v21 }
 0xa0d   : > { %3347 = vst [vmem:[%s5684_s17 + $0xec] sm:$0xf] %v3726_v59  ;;  %3358 = sbr.rel (!%p5889_p1) target bundleno = 2610 (0xa32), region = 68 }
 0xa0e   : > { %v3093_v60 = vpop.f32.mrb[192].mxu1 }
 0xa0f   : > { %v3094_v61 = vadd.f32 %v3093_v60, %v5756_v20  ;;  %v4434_v9 = vpop.f32.mrb[193].mxu1 }
 0xa10   : > { %v3096_v34 = vpop.f32.mrb[194].mxu1 }
 0xa11   : > { %v3729_v62 = vpack.c.bf16 %v3094_v61, %v3094_v61  ;;  %v4435_v63 = vpop.f32.mrb[195].mxu1 }
 0xa13   : > { %3350 = vst [vmem:[%s5684_s17 + $0x100] sm:$0xf] %v3729_v62 }
 0xa14   : > { %s5902_s15 = smov (!%p3361_p3, %s3360_s15), 13 }
 0xa15   : > { %s5790_s26 = smul.u32 320, %s5902_s15 }
 0xa17   : > { %s3366_s13 = ssub.s32 4160, %s5790_s26 }
 0xa18   : > { %3367 = vsyncadd %s3352_s27, %s3366_s13  ;;  %p3686_p5 = scmp.ne.s32.totalorder %s5790_s26, 0  ;;  %s4485_s9 = smul.u32 4160, %s4987_s25 }
 0xa19   : > { %s3373_s16 = sshll.u32 %s5684_s17, 4  ;;  %s5890_s18 = sld [smem:[#allocation21_spill]]  ;;  %s5803_s16 = int_to_ptr.vmem [resolvable:$true] %s3373_s16 }
 0xa1a   : > { %s4836_s21 = scalar_lea.vmem %s5803_s16, %s5790_s26  ;;  %s4928_s12 = smov [#allocation11]  }
 0xa1b   : > { %p4837_p6 = scmp.ne.s32.totalorder %s5803_s16, %s4836_s21  ;;  %s4840_s30 = sshll.u32 %s4928_s12, 4  ;;  %s4841_s30 = int_to_ptr.vmem [resolvable:$false] %s4840_s30 }
 0xa1c   : > { %s4842_s25 = scalar_lea.vmem %s4841_s30, 8320  ;;  %p4843_p0 = scmp.lt.s32.totalorder %s5803_s16, %s4841_s30 }
 0xa1d   : > { %p4838_p11 = pnand %p4837_p6, %p3686_p5  ;;  %p4844_p12 = scmp.lt.s32.totalorder %s4842_s25, %s4836_s21 }
 0xa1f   : > { %s5801_s6 = scalar_lea.hbm %s5890_s18, %s4485_s9  ;;  %p4839_p13 = pneg %p4838_p11 }
 0xa20   : > { %p4845_p7 = por %p4844_p12, %p4843_p0 }
 0xa22   : > { %p4846_p2 = pnand %p4845_p7, %p4839_p13 }
 0xa24   : > { %4849 = shalt.err (!%p4846_p2)
}
 0xa25   : > { %s4850_s10 = scalar_lea.hbm %s5801_s6, %s5790_s26  ;;  %s4854_s8 = scalar_lea.hbm %s5890_s18, 8000 }
 0xa26   : > { %p4851_p8 = scmp.ne.s32.totalorder %s5801_s6, %s4850_s10  ;;  %p4855_p1 = scmp.lt.u32.totalorder %s5801_s6, %s5890_s18 }
 0xa27   : > { %p4856_p3 = scmp.lt.u32.totalorder %s4854_s8, %s4850_s10  ;;  %p4858_p11 = scmp.lt.u32.totalorder %s4850_s10, %s5801_s6 }
 0xa28   : > { %p4852_p9 = pnand %p4851_p8, %p3686_p5 }
 0xa29   : > { %p4857_p6 = por %p4856_p3, %p4855_p1 }
 0xa2a   : > { %p4853_p10 = pneg %p4852_p9 }
 0xa2b   : > { %p4859_p13 = por %p4858_p11, %p4857_p6 }
 0xa2d   : > { %p4860_p0 = pnand %p4859_p13, %p4853_p10 }
 0xa2f   : > { %4863 = shalt.err (!%p4860_p0)
}
 0xa30   : > { %s4929_s17 = smov 320   ;;  %s4930_s20 = smov 20  }
 0xa31   : > { %3379 = dma.vmem_to_hbm [thread:$0]  (%p3686_p5), %s5803_s16, %s5790_s26, %s5801_s6, %s3352_s27, %s4929_s17, %s4929_s17, %s4930_s20  }
 0xa32 PF: > { %s5891_s15 = sld [smem:[#allocation16_spill]]  ;;  %s5892_s13 = sld [smem:[#allocation19_spill]] }
 0xa38   : > { %s3388_s9 = sand.u32 1, %s5891_s15   ;;  %p5893_p12 = scmp.ne.s32.totalorder %s5892_s13, 0 }
 0xa39   : > { %s3389_s1 = scalar_lea.sflag [#allocation4], %s3388_s9 }
 0xa3a   : > { %p4473_p7 = pnand %p3490_p4, %p5893_p12 }
 0xa3c   : > { %4893 = dma.done.wait (!%p4473_p7), %s3389_s1, 4160  }
 0xa3d   : > { %4895 = vsyncadd (!%p4473_p7), %s3389_s1, 4294963136  ;;  %s5894_s24 = sld [smem:[#allocation17_spill]]  ;;  %s5895_s28 = sld [smem:[#allocation18_spill]] }
 0xa3e   : > { %s5896_s21 = smov %s4902_s22  ;;  %s5897_s22 = smov %s4906_s23 }
 0xa43   : > { %p21_p2 = scmp.ge.s32.totalorder %s5894_s24, 4   ;;  %s5898_s23 = smov %s5895_s28 }
 0xa45   :  { %23 = sbr.rel (!%p21_p2) target bundleno = 10 (0xa), region = 112 }
 0xa4c   :  { %3394 = vsyncpa [#allocation3], 1 }
 0xa4d   :  { %3396 = vsyncpa [#allocation3 + $0x1], 1 }
 0xa4e   :  { %3397 = vsyncpa [#allocation6], 1 }
 0xa4f   :  { %3398 = vsyncpa [#allocation9], 1 }
 0xa50   :  { %3399 = vsyncpa [#allocation4], 1 }
 0xa51   :  { %3401 = vsyncpa [#allocation4 + $0x1], 1 }

</bundles_post_ra>
